<compile_context>
chip_gen: v7x
topology: tpu7x:2x2x1
jax: 0.10.0
libtpu: 0.0.40
codegen_flags: <defaults>
</compile_context>

<pallas_src>
import math
import functools

import jax
import jax.numpy as jnp
from jax import lax
from jax.experimental import pallas as pl
from jax.experimental.pallas import tpu as pltpu

LN_EPS = 1e-5
_INV_SQRT2 = 0.7071067811865476
_TILE_M = 256          # row tile for the (B*S, D) slab kernels
_FFN_CHUNK = 2048      # F-axis chunk in the FFN kernel (bounds the (tm, F) f32 intermediate)


@functools.lru_cache(maxsize=None)
def _vmem_limit():
    """~3/4 of physical VMEM (48 MiB on v7x, 96 MiB on v5e/v6e), with a safe fallback."""
    try:
        cap = int(pltpu.get_tpu_info().vmem_capacity_bytes)
        return max(32 * 1024 * 1024, min(cap * 3 // 4, 100 * 1024 * 1024))
    except Exception:
        return 48 * 1024 * 1024


def _cparams(dims):
    return pltpu.CompilerParams(dimension_semantics=dims,
                                vmem_limit_bytes=_vmem_limit())


def _erf(x):
    # Abramowitz & Stegun 7.1.26 rational approximation (|err| < 1.5e-7).
    # Avoids relying on a lax.erf lowering inside Mosaic; uses only VPU ops + one EUP exp.
    ax = jnp.where(x < 0.0, -x, x)
    t = 1.0 / (1.0 + 0.3275911 * ax)
    poly = t * (0.254829592 + t * (-0.284496736 + t * (1.421413741
               + t * (-1.453152027 + t * 1.061405429))))
    y = 1.0 - poly * jnp.exp(-ax * ax)
    return jnp.where(x < 0.0, -y, y)


def _gelu_exact(x):
    # torch nn.GELU() default (exact erf form)
    return 0.5 * x * (1.0 + _erf(x * _INV_SQRT2))


# ----------------------------- Pallas kernels ------------------------------

def _ln_linear_kernel(x_ref, g_ref, b_ref, w_ref, bias_ref, o_ref):
    # pre-norm fused into the QKV projection: y = LN(x) @ W + b   (bf16 output slab)
    x = x_ref[...].astype(jnp.float32)
    mean = jnp.mean(x, axis=-1, keepdims=True)
    xc = x - mean
    var = jnp.mean(xc * xc, axis=-1, keepdims=True)           # biased var (torch LN)
    h = xc * lax.rsqrt(var + LN_EPS) * g_ref[...] + b_ref[...]
    acc = jnp.dot(h.astype(w_ref.dtype), w_ref[...], preferred_element_type=jnp.float32)
    o_ref[...] = (acc + bias_ref[...]).astype(o_ref.dtype)


def ln_linear(x2d, gamma, beta, w, bias):
    M, D = x2d.shape
    N = w.shape[1]
    tm = min(_TILE_M, M)
    return pl.pallas_call(
        _ln_linear_kernel,
        out_shape=jax.ShapeDtypeStruct((M, N), jnp.bfloat16),
        grid=(pl.cdiv(M, tm),),
        in_specs=[
            pl.BlockSpec((tm, D), lambda i: (i, 0)),
            pl.BlockSpec((1, D), lambda i: (0, 0)),
            pl.BlockSpec((1, D), lambda i: (0, 0)),
            pl.BlockSpec((D, N), lambda i: (0, 0)),          # weight stays VMEM-resident
            pl.BlockSpec((1, N), lambda i: (0, 0)),
        ],
        out_specs=pl.BlockSpec((tm, N), lambda i: (i, 0)),
        compiler_params=_cparams(("parallel",)),
        cost_estimate=pl.CostEstimate(
            flops=2 * M * D * N, transcendentals=0,
            bytes_accessed=4 * M * D + 2 * M * N + 2 * D * N),
    )(x2d, gamma.reshape(1, -1), beta.reshape(1, -1), w, bias.reshape(1, -1))


def _attention_kernel(qkv_ref, cos_ref, sa_ref, sb_ref, res_ref, wo_ref, bo_ref, o_ref,
                      *, num_heads, scale, roll_mode):
    # one batch per grid step; heads are a static loop; each head's PV result is folded
    # straight into the Wo accumulation (no (S, D) attention intermediate, no concatenate).
    D = res_ref.shape[-1]
    Dh = D // num_heads
    cos = cos_ref[...]          # (S, Dh) f32 per-head tables
    sa = sa_ref[...]
    sb = sb_ref[...]

    def rope(x):                # x: (S, Dh) f32
        if roll_mode == "pltpu_fwd":          # pltpu.roll == jnp.roll convention
            x_next = pltpu.roll(x, Dh - 1, 1)     # x[j+1]
            x_prev = pltpu.roll(x, 1, 1)          # x[j-1]
        elif roll_mode == "pltpu_rev":        # opposite rotate convention
            x_next = pltpu.roll(x, 1, 1)
            x_prev = pltpu.roll(x, Dh - 1, 1)
        else:                                  # safe fallback (slice + concat)
            x_next = jnp.roll(x, -1, axis=-1)
            x_prev = jnp.roll(x, 1, axis=-1)
        # interleaved rotate_half with the sign folded into sa/sb; wrap positions have sa/sb == 0
        return x * cos + x_next * sa + x_prev * sb

    acc = res_ref[...].astype(jnp.float32) + bo_ref[...]       # residual + out-proj bias
    for h in range(num_heads):                                  # static loop over heads
        q = qkv_ref[:, h * Dh:(h + 1) * Dh].astype(jnp.float32)
        k = qkv_ref[:, D + h * Dh:D + (h + 1) * Dh].astype(jnp.float32)
        v = qkv_ref[:, 2 * D + h * Dh:2 * D + (h + 1) * Dh]     # bf16
        q = (rope(q) * scale).astype(jnp.bfloat16)              # fold 1/sqrt(Dh) into q
        k = rope(k).astype(jnp.bfloat16)
        s = lax.dot_general(q, k, (((1,), (1,)), ((), ())),     # (S, S), no k transpose
                            preferred_element_type=jnp.float32)
        m = jnp.max(s, axis=-1, keepdims=True)
        p = jnp.exp(s - m)
        l = jnp.sum(p, axis=-1, keepdims=True)
        p = (p * pl.reciprocal(l, approx=True)).astype(jnp.bfloat16)   # EUP reciprocal
        pv = jnp.dot(p, v, preferred_element_type=jnp.float32)          # (S, Dh)
        # partial out-projection: sum_h pv_h @ Wo[h*Dh:(h+1)*Dh, :] == (attn @ Wo)
        acc = acc + jnp.dot(pv.astype(jnp.bfloat16),
                            wo_ref[h * Dh:(h + 1) * Dh, :],
                            preferred_element_type=jnp.float32)
    o_ref[...] = acc.astype(o_ref.dtype)


def attention(qkv_bsd, res_bsd, cos, sa, sb, wo, bo, num_heads, roll_mode):
    # TODO(synk): flash-tile (grid over q/kv blocks with m/l/acc scratch) for S >= ~1k so the
    #             kernel fits v7x's 64 MiB VMEM and exposes more parallel grid to 2 TCs.
    B, S, D3 = qkv_bsd.shape
    D = D3 // 3
    Dh = D // num_heads
    kern = functools.partial(_attention_kernel, num_heads=num_heads,
                             scale=1.0 / math.sqrt(Dh), roll_mode=roll_mode)
    return pl.pallas_call(
        kern,
        out_shape=jax.ShapeDtypeStruct((B, S, D), jnp.float32),
        grid=(B,),
        in_specs=[
            pl.BlockSpec((None, S, D3), lambda b: (b, 0, 0)),   # (S, 3D) bf16 qkv slab
            pl.BlockSpec((S, Dh), lambda b: (0, 0)),            # per-head rotary tables
            pl.BlockSpec((S, Dh), lambda b: (0, 0)),
            pl.BlockSpec((S, Dh), lambda b: (0, 0)),
            pl.BlockSpec((None, S, D), lambda b: (b, 0, 0)),    # residual stream tile
            pl.BlockSpec((D, D), lambda b: (0, 0)),             # Wo (bf16), VMEM-resident
            pl.BlockSpec((1, D), lambda b: (0, 0)),
        ],
        out_specs=pl.BlockSpec((None, S, D), lambda b: (b, 0, 0)),
        compiler_params=_cparams(("parallel",)),
        cost_estimate=pl.CostEstimate(
            flops=4 * B * S * S * D + 2 * B * S * D * D,
            transcendentals=B * num_heads * S * S,
            bytes_accessed=2 * B * S * D3 + 8 * B * S * D + 2 * D * D),
    )(qkv_bsd, cos, sa, sb, res_bsd, wo, bo.reshape(1, -1))


def _ln_ffn_residual_kernel(x_ref, g_ref, b_ref, w1_ref, b1_ref, w2_ref, b2_ref,
                            gf_ref, bf_ref, o_ref, *, final_ln):
    # y = x + GELU(LN(x) @ W1 + b1) @ W2 + b2 ; optionally y = LN_final(y)
    # The F axis is processed in chunks so the (tm, F) f32 intermediate stays bounded.
    x = x_ref[...].astype(jnp.float32)
    mean = jnp.mean(x, axis=-1, keepdims=True)
    xc = x - mean
    var = jnp.mean(xc * xc, axis=-1, keepdims=True)
    h = (xc * lax.rsqrt(var + LN_EPS) * g_ref[...] + b_ref[...]).astype(w1_ref.dtype)
    F = w1_ref.shape[1]
    acc = x + b2_ref[...]
    for c0 in range(0, F, _FFN_CHUNK):
        c1 = min(c0 + _FFN_CHUNK, F)
        h1 = jnp.dot(h, w1_ref[:, c0:c1], preferred_element_type=jnp.float32) + b1_ref[:, c0:c1]
        h1 = _gelu_exact(h1)
        acc = acc + jnp.dot(h1.astype(w2_ref.dtype), w2_ref[c0:c1, :],
                            preferred_element_type=jnp.float32)
    y = acc
    if final_ln:
        m2 = jnp.mean(y, axis=-1, keepdims=True)
        yc = y - m2
        v2 = jnp.mean(yc * yc, axis=-1, keepdims=True)
        y = yc * lax.rsqrt(v2 + LN_EPS) * gf_ref[...] + bf_ref[...]
    o_ref[...] = y.astype(o_ref.dtype)


def ln_ffn_residual(x2d, gamma, beta, w1, b1, w2, b2, gf, bf, final_ln):
    M, D = x2d.shape
    F = w1.shape[1]
    tm = min(_TILE_M, M)
    kern = functools.partial(_ln_ffn_residual_kernel, final_ln=final_ln)
    return pl.pallas_call(
        kern,
        out_shape=jax.ShapeDtypeStruct((M, D), jnp.float32),
        grid=(pl.cdiv(M, tm),),
        in_specs=[
            pl.BlockSpec((tm, D), lambda i: (i, 0)),
            pl.BlockSpec((1, D), lambda i: (0, 0)),
            pl.BlockSpec((1, D), lambda i: (0, 0)),
            pl.BlockSpec((D, F), lambda i: (0, 0)),
            pl.BlockSpec((1, F), lambda i: (0, 0)),
            pl.BlockSpec((F, D), lambda i: (0, 0)),
            pl.BlockSpec((1, D), lambda i: (0, 0)),
            pl.BlockSpec((1, D), lambda i: (0, 0)),      # final-LN gamma (used only on last layer)
            pl.BlockSpec((1, D), lambda i: (0, 0)),      # final-LN beta
        ],
        out_specs=pl.BlockSpec((tm, D), lambda i: (i, 0)),
        compiler_params=_cparams(("parallel",)),
        cost_estimate=pl.CostEstimate(
            flops=4 * M * D * F, transcendentals=M * F,
            bytes_accessed=8 * M * D + 4 * D * F),
    )(x2d, gamma.reshape(1, -1), beta.reshape(1, -1),
      w1, b1.reshape(1, -1), w2, b2.reshape(1, -1),
      gf.reshape(1, -1), bf.reshape(1, -1))


# ------------------------------ JAX glue ------------------------------------

def detect_roll_mode(width=8):
    """Probe how pltpu.roll lowers on this backend.

    Returns "pltpu_fwd" if pltpu.roll matches jnp.roll semantics, "pltpu_rev" if it
    rotates the opposite way, and "jnp" if it does not lower (fall back to jnp.roll).
    Keeps the RoPE rotate correct on any backend while using the XLU slot when possible.
    """
    try:
        def k(x_ref, o_ref):
            o_ref[...] = pltpu.roll(x_ref[...], 1, 1)
        x = jnp.tile(jnp.arange(width, dtype=jnp.float32)[None, :], (8, 1))
        y = jax.block_until_ready(
            pl.pallas_call(k, out_shape=jax.ShapeDtypeStruct((8, width), jnp.float32))(x))
        if bool(jnp.allclose(y, jnp.roll(x, 1, axis=1))):
            return "pltpu_fwd"
        if bool(jnp.allclose(y, jnp.roll(x, -1, axis=1))):
            return "pltpu_rev"
    except Exception:
        pass
    return "jnp"


def rotary_tables(seq_len, head_dim, theta=10000.0):
    """Per-head (S, Dh) rotary tables with the interleaved rotate_half signs folded in.

    RotaryEmbedding(dim=head_dim//2): rot_dim = head_dim//2 dims get pairwise-repeated
    frequencies, the remaining dims pass through unrotated.  Returns (cos, sin_a, sin_b)
    such that rope(x) = x*cos + x_next*sin_a + x_prev*sin_b equals x*cos + rotate_half(x)*sin.
    sin_a / sin_b are exactly zero at the positions where a cyclic roll wraps.
    """
    assert head_dim % 2 == 0
    rd = head_dim // 2
    assert rd % 2 == 0, "rotary dim must be even (pairwise-interleaved frequencies)"
    freqs = 1.0 / (theta ** (jnp.arange(0, rd, 2, dtype=jnp.float32) / rd))
    t = jnp.arange(seq_len, dtype=jnp.float32)
    ang = jnp.repeat(t[:, None] * freqs[None, :], 2, axis=-1)                   # (S, rd)
    cos = jnp.concatenate(
        [jnp.cos(ang), jnp.ones((seq_len, head_dim - rd), jnp.float32)], axis=-1)
    sin = jnp.concatenate(
        [jnp.sin(ang), jnp.zeros((seq_len, head_dim - rd), jnp.float32)], axis=-1)
    parity = (jnp.arange(head_dim) % 2).astype(jnp.float32)                     # 0 even, 1 odd
    sin_a = -sin * (1.0 - parity)      # multiplies x[j+1]  (even j of the rotated region)
    sin_b = sin * parity               # multiplies x[j-1]  (odd j of the rotated region)
    return cos, sin_a, sin_b


def init_params(key, num_tokens, dim, num_heads, num_layers, ffn_dim):
    keys = jax.random.split(key, 1 + num_layers)

    def nrm(k, shape):
        return 0.02 * jax.random.normal(k, shape, jnp.float32)

    params = {"token_emb": nrm(keys[0], (num_tokens, dim)), "layers": []}
    for li in range(num_layers):
        ks = jax.random.split(keys[1 + li], 4)
        params["layers"].append(dict(
            wqkv=nrm(ks[0], (dim, 3 * dim)), bqkv=jnp.zeros((3 * dim,), jnp.float32),
            wo=nrm(ks[1], (dim, dim)),        bo=jnp.zeros((dim,), jnp.float32),
            w1=nrm(ks[2], (dim, ffn_dim)),    b1=jnp.zeros((ffn_dim,), jnp.float32),
            w2=nrm(ks[3], (ffn_dim, dim)),    b2=jnp.zeros((dim,), jnp.float32),
            ln1_g=jnp.ones((dim,), jnp.float32), ln1_b=jnp.zeros((dim,), jnp.float32),
            ln2_g=jnp.ones((dim,), jnp.float32), ln2_b=jnp.zeros((dim,), jnp.float32),
        ))
    params["ln_f_g"] = jnp.ones((dim,), jnp.float32)
    params["ln_f_b"] = jnp.zeros((dim,), jnp.float32)
    return params


def prepare_params(params):
    """Pre-cast matmul weights to bf16 once (halves HBM->VMEM weight traffic)."""
    out = {k: v for k, v in params.items() if k != "layers"}
    out["layers"] = []
    for layer in params["layers"]:
        l = dict(layer)
        for k in ("wqkv", "wo", "w1", "w2"):
            l[k] = layer[k].astype(jnp.bfloat16)
        out["layers"].append(l)
    return out


def roformer_forward(params, token_ids, num_heads, roll_mode):
    B, S = token_ids.shape
    D = params["token_emb"].shape[1]
    Dh = D // num_heads
    cos, sa, sb = rotary_tables(S, Dh)

    # token embedding gather stays as XLA glue
    x = jnp.take(params["token_emb"], token_ids, axis=0).reshape(B * S, D)

    n_layers = len(params["layers"])
    for li, layer in enumerate(params["layers"]):
        # pre-norm MHSA: LN fused into the QKV projection (bf16 qkv slab, no q/k/v transpose)
        qkv = ln_linear(x, layer["ln1_g"], layer["ln1_b"], layer["wqkv"], layer["bqkv"])
        # rotary MHSA + out-projection + residual, fully fused (dropout == identity at eval)
        x = attention(qkv.reshape(B, S, 3 * D), x.reshape(B, S, D), cos, sa, sb,
                      layer["wo"], layer["bo"], num_heads, roll_mode).reshape(B * S, D)
        # pre-norm FFN with residual folded in; final LayerNorm fused into the last layer
        x = ln_ffn_residual(x, layer["ln2_g"], layer["ln2_b"],
                            layer["w1"], layer["b1"], layer["w2"], layer["b2"],
                            params["ln_f_g"], params["ln_f_b"],
                            final_ln=(li == n_layers - 1))
    return x.reshape(B, S, D)


# --------------------- pure-JAX f32 reference (for checking) ----------------

def roformer_reference(params, token_ids, num_heads):
    B, S = token_ids.shape
    D = params["token_emb"].shape[1]
    H = num_heads
    Dh = D // H
    rd = Dh // 2
    freqs = 1.0 / (10000.0 ** (jnp.arange(0, rd, 2, dtype=jnp.float32) / rd))
    ang = jnp.repeat(jnp.arange(S, dtype=jnp.float32)[:, None] * freqs[None, :], 2, axis=-1)
    cos = jnp.concatenate([jnp.cos(ang), jnp.ones((S, Dh - rd), jnp.float32)], axis=-1)
    sin = jnp.concatenate([jnp.sin(ang), jnp.zeros((S, Dh - rd), jnp.float32)], axis=-1)

    def rot_half(t):
        tp = t.reshape(t.shape[:-1] + (t.shape[-1] // 2, 2))
        a, b = tp[..., 0], tp[..., 1]
        return jnp.stack((-b, a), axis=-1).reshape(t.shape)

    def ln(v, g, b):
        m = v.mean(-1, keepdims=True)
        c = v - m
        return c * lax.rsqrt((c * c).mean(-1, keepdims=True) + LN_EPS) * g + b

    x = jnp.take(params["token_emb"], token_ids, axis=0)
    for layer in params["layers"]:
        h = ln(x, layer["ln1_g"], layer["ln1_b"])
        qkv = h @ layer["wqkv"] + layer["bqkv"]
        qkv = qkv.reshape(B, S, 3, H, Dh).transpose(2, 0, 3, 1, 4)
        q, k, v = qkv[0], qkv[1], qkv[2]                       # (B, H, S, Dh)
        q = q * cos + rot_half(q) * sin
        k = k * cos + rot_half(k) * sin
        s = jnp.einsum("bhqd,bhkd->bhqk", q, k) / math.sqrt(Dh)
        p = jax.nn.softmax(s, axis=-1)
        o = jnp.einsum("bhqk,bhkd->bhqd", p, v)
        o = o.transpose(0, 2, 1, 3).reshape(B, S, D)
        x = x + o @ layer["wo"] + layer["bo"]
        h = ln(x, layer["ln2_g"], layer["ln2_b"])
        f = jax.nn.gelu(h @ layer["w1"] + layer["b1"], approximate=False)
        x = x + f @ layer["w2"] + layer["b2"]
    return ln(x, params["ln_f_g"], params["ln_f_b"])


if __name__ == "__main__":
    num_tokens, dim, num_heads, num_layers, ffn_dim = 16, 32, 4, 2, 64
    B, S = 2, 16

    key = jax.random.PRNGKey(0)
    kp, kx = jax.random.split(key)
    params = init_params(kp, num_tokens, dim, num_heads, num_layers, ffn_dim)
    token_ids = jax.random.randint(kx, (B, S), 0, num_tokens, dtype=jnp.int32)

    roll_mode = detect_roll_mode(dim // num_heads)
    kernel_params = prepare_params(params)
    fwd = jax.jit(functools.partial(roformer_forward, num_heads=num_heads,
                                    roll_mode=roll_mode))
    out = jax.block_until_ready(fwd(kernel_params, token_ids))

    assert out.shape == (B, S, dim)
    assert bool(jnp.all(jnp.isfinite(out)))

    ref = roformer_reference(params, token_ids, num_heads)
    err = float(jnp.max(jnp.abs(out - ref)))
    assert err < 8e-2, f"max abs err vs reference: {err}"
    print("KERNEL_OK")
</pallas_src>

<mosaic_0001>
module attributes {stable_mosaic.version = 11 : i64} {
  func.func @k(%arg0: memref<8x8xf32, #tpu.memory_space<vmem>>, %arg1: memref<8x8xf32, #tpu.memory_space<vmem>>) attributes {dimension_semantics = [], scalar_prefetch = 0 : i64, scratch_operands = 0 : i64, tpu.core_type = #tpu.core_type<tc>} {
    %c0 = arith.constant 0 : index
    %c0_0 = arith.constant 0 : index
    %0 = vector.load %arg0[%c0, %c0_0] : memref<8x8xf32, #tpu.memory_space<vmem>>, vector<8x8xf32>
    %c1_i32 = arith.constant 1 : i32
    %1 = tpu.dynamic_rotate %0 by %c1_i32 dim 1 : vector<8x8xf32>, i32 -> vector<8x8xf32>
    %c0_1 = arith.constant 0 : index
    %c0_2 = arith.constant 0 : index
    %2 = vector.load %arg1[%c0_1, %c0_2] : memref<8x8xf32, #tpu.memory_space<vmem>>, vector<8x8xf32>
    tpu.vector_store %arg1[%c0_1, %c0_2], %1 {strides = array<i32>} : memref<8x8xf32, #tpu.memory_space<vmem>>, vector<8x8xf32>,
    return
  }
}

module attributes {stable_mosaic.version = 11 : i64} {
  func.func @_attention_kernel(%arg0: i32, %arg1: memref<1x16x96xbf16, #tpu.memory_space<vmem>>, %arg2: memref<16x8xf32, #tpu.memory_space<vmem>>, %arg3: memref<16x8xf32, #tpu.memory_space<vmem>>, %arg4: memref<16x8xf32, #tpu.memory_space<vmem>>, %arg5: memref<1x16x32xf32, #tpu.memory_space<vmem>>, %arg6: memref<32x32xbf16, #tpu.memory_space<vmem>>, %arg7: memref<1x32xf32, #tpu.memory_space<vmem>>, %arg8: memref<1x16x32xf32, #tpu.memory_space<vmem>>) attributes {dimension_semantics = [#tpu.dimension_semantics<parallel>], iteration_bounds = array<i64: 2>, scalar_prefetch = 0 : i64, scratch_operands = 0 : i64, tpu.core_type = #tpu.core_type<tc>, window_params = [{transform_indices = @transform_0, window_bounds = array<i64: 1, 16, 96>}, {pipeline_mode = #tpu.pipeline_mode<synchronous>, transform_indices = @transform_1, window_bounds = array<i64: 16, 8>}, {pipeline_mode = #tpu.pipeline_mode<synchronous>, transform_indices = @transform_2, window_bounds = array<i64: 16, 8>}, {pipeline_mode = #tpu.pipeline_mode<synchronous>, transform_indices = @transform_3, window_bounds = array<i64: 16, 8>}, {transform_indices = @transform_4, window_bounds = array<i64: 1, 16, 32>}, {pipeline_mode = #tpu.pipeline_mode<synchronous>, transform_indices = @transform_5, window_bounds = array<i64: 32, 32>}, {pipeline_mode = #tpu.pipeline_mode<synchronous>, transform_indices = @transform_6, window_bounds = array<i64: 1, 32>}, {transform_indices = @transform_7, window_bounds = array<i64: 1, 16, 32>}]} {
    %c0 = arith.constant 0 : index
    %c0_0 = arith.constant 0 : index
    %0 = vector.load %arg2[%c0, %c0_0] : memref<16x8xf32, #tpu.memory_space<vmem>>, vector<16x8xf32>
    %c0_1 = arith.constant 0 : index
    %c0_2 = arith.constant 0 : index
    %1 = vector.load %arg3[%c0_1, %c0_2] : memref<16x8xf32, #tpu.memory_space<vmem>>, vector<16x8xf32>
    %c0_3 = arith.constant 0 : index
    %c0_4 = arith.constant 0 : index
    %2 = vector.load %arg4[%c0_3, %c0_4] : memref<16x8xf32, #tpu.memory_space<vmem>>, vector<16x8xf32>
    %c0_5 = arith.constant 0 : index
    %c0_6 = arith.constant 0 : index
    %c0_7 = arith.constant 0 : index
    %3 = vector.load %arg5[%c0_5, %c0_6, %c0_7] : memref<1x16x32xf32, #tpu.memory_space<vmem>>, vector<1x16x32xf32>
    %4 = vector.shape_cast %3 : vector<1x16x32xf32> to vector<16x32xf32>
    %c0_8 = arith.constant 0 : index
    %c0_9 = arith.constant 0 : index
    %5 = vector.load %arg7[%c0_8, %c0_9] : memref<1x32xf32, #tpu.memory_space<vmem>>, vector<1x32xf32>
    %6 = vector.broadcast %5 : vector<1x32xf32> to vector<16x32xf32>
    %7 = arith.addf %4, %6 : vector<16x32xf32>
    %c0_10 = arith.constant 0 : index
    %c0_11 = arith.constant 0 : index
    %c0_12 = arith.constant 0 : index
    %8 = vector.load %arg1[%c0_10, %c0_11, %c0_12] : memref<1x16x96xbf16, #tpu.memory_space<vmem>>, vector<1x16x8xbf16>
    %9 = vector.shape_cast %8 : vector<1x16x8xbf16> to vector<16x8xbf16>
    %10 = arith.extf %9 : vector<16x8xbf16> to vector<16x8xf32>
    %c0_13 = arith.constant 0 : index
    %c0_14 = arith.constant 0 : index
    %c32 = arith.constant 32 : index
    %11 = vector.load %arg1[%c0_13, %c0_14, %c32] : memref<1x16x96xbf16, #tpu.memory_space<vmem>>, vector<1x16x8xbf16>
    %12 = vector.shape_cast %11 : vector<1x16x8xbf16> to vector<16x8xbf16>
    %13 = arith.extf %12 : vector<16x8xbf16> to vector<16x8xf32>
    %c0_15 = arith.constant 0 : index
    %c0_16 = arith.constant 0 : index
    %c64 = arith.constant 64 : index
    %14 = vector.load %arg1[%c0_15, %c0_16, %c64] : memref<1x16x96xbf16, #tpu.memory_space<vmem>>, vector<1x16x8xbf16>
    %15 = vector.shape_cast %14 : vector<1x16x8xbf16> to vector<16x8xbf16>
    %16 = vector.extract_strided_slice %10 {offsets = [0, 1], sizes = [16, 7], strides = [1, 1]} : vector<16x8xf32> to vector<16x7xf32>
    %17 = vector.extract_strided_slice %10 {offsets = [0, 0], sizes = [16, 1], strides = [1, 1]} : vector<16x8xf32> to vector<16x1xf32>
    %18 = tpu.concatenate %16, %17 in 1 : vector<16x7xf32>, vector<16x1xf32> -> vector<16x8xf32>
    %19 = vector.extract_strided_slice %10 {offsets = [0, 7], sizes = [16, 1], strides = [1, 1]} : vector<16x8xf32> to vector<16x1xf32>
    %20 = vector.extract_strided_slice %10 {offsets = [0, 0], sizes = [16, 7], strides = [1, 1]} : vector<16x8xf32> to vector<16x7xf32>
    %21 = tpu.concatenate %19, %20 in 1 : vector<16x1xf32>, vector<16x7xf32> -> vector<16x8xf32>
    %22 = arith.mulf %10, %0 : vector<16x8xf32>
    %23 = arith.mulf %18, %1 : vector<16x8xf32>
    %24 = arith.addf %22, %23 : vector<16x8xf32>
    %25 = arith.mulf %21, %2 : vector<16x8xf32>
    %26 = arith.addf %24, %25 : vector<16x8xf32>
    %cst = arith.constant 0.353553385 : f32
    %27 = vector.broadcast %cst : f32 to vector<16x8xf32>
    %28 = arith.mulf %26, %27 : vector<16x8xf32>
    %29 = arith.truncf %28 : vector<16x8xf32> to vector<16x8xbf16>
    %30 = vector.extract_strided_slice %13 {offsets = [0, 1], sizes = [16, 7], strides = [1, 1]} : vector<16x8xf32> to vector<16x7xf32>
    %31 = vector.extract_strided_slice %13 {offsets = [0, 0], sizes = [16, 1], strides = [1, 1]} : vector<16x8xf32> to vector<16x1xf32>
    %32 = tpu.concatenate %30, %31 in 1 : vector<16x7xf32>, vector<16x1xf32> -> vector<16x8xf32>
    %33 = vector.extract_strided_slice %13 {offsets = [0, 7], sizes = [16, 1], strides = [1, 1]} : vector<16x8xf32> to vector<16x1xf32>
    %34 = vector.extract_strided_slice %13 {offsets = [0, 0], sizes = [16, 7], strides = [1, 1]} : vector<16x8xf32> to vector<16x7xf32>
    %35 = tpu.concatenate %33, %34 in 1 : vector<16x1xf32>, vector<16x7xf32> -> vector<16x8xf32>
    %36 = arith.mulf %13, %0 : vector<16x8xf32>
    %37 = arith.mulf %32, %1 : vector<16x8xf32>
    %38 = arith.addf %36, %37 : vector<16x8xf32>
    %39 = arith.mulf %35, %2 : vector<16x8xf32>
    %40 = arith.addf %38, %39 : vector<16x8xf32>
    %41 = arith.truncf %40 : vector<16x8xf32> to vector<16x8xbf16>
    %cst_17 = arith.constant dense<0.000000e+00> : vector<16x16xf32>
    %42 = tpu.matmul %29, %41, %cst_17 {dimension_numbers = #tpu.dot_dimension_numbers<[1], [1], [0], [0], [0, 0, 1, 0], [], []>} : vector<16x8xbf16>, vector<16x8xbf16>, vector<16x16xf32> -> vector<16x16xf32>
    %cst_18 = arith.constant dense<0xFF800000> : vector<16xf32>
    %43 = vector.multi_reduction <maximumf>, %42, %cst_18 [1] : vector<16x16xf32> to vector<16xf32>
    %44 = vector.shape_cast %43 : vector<16xf32> to vector<16x1xf32>
    %45 = vector.broadcast %44 : vector<16x1xf32> to vector<16x16xf32>
    %46 = arith.subf %42, %45 : vector<16x16xf32>
    %47 = math.exp %46 : vector<16x16xf32>
    %cst_19 = arith.constant dense<0.000000e+00> : vector<16xf32>
    %48 = vector.multi_reduction <add>, %47, %cst_19 [1] : vector<16x16xf32> to vector<16xf32>
    %49 = vector.shape_cast %48 : vector<16xf32> to vector<16x1xf32>
    %50 = tpu.reciprocal %49 {approx = true} : vector<16x1xf32> -> vector<16x1xf32>
    %51 = vector.broadcast %50 : vector<16x1xf32> to vector<16x16xf32>
    %52 = arith.mulf %47, %51 : vector<16x16xf32>
    %53 = arith.truncf %52 : vector<16x16xf32> to vector<16x16xbf16>
    %cst_20 = arith.constant dense<0.000000e+00> : vector<16x8xf32>
    %54 = tpu.matmul %53, %15, %cst_20 {dimension_numbers = #tpu.dot_dimension_numbers<[1], [0], [0], [1], [0, 0, 1, 1], [], []>} : vector<16x16xbf16>, vector<16x8xbf16>, vector<16x8xf32> -> vector<16x8xf32>
    %55 = arith.truncf %54 : vector<16x8xf32> to vector<16x8xbf16>
    %c0_21 = arith.constant 0 : index
    %c0_22 = arith.constant 0 : index
    %56 = vector.load %arg6[%c0_21, %c0_22] : memref<32x32xbf16, #tpu.memory_space<vmem>>, vector<8x32xbf16>
    %cst_23 = arith.constant dense<0.000000e+00> : vector<16x32xf32>
    %57 = tpu.matmul %55, %56, %cst_23 {dimension_numbers = #tpu.dot_dimension_numbers<[1], [0], [0], [1], [0, 0, 1, 1], [], []>} : vector<16x8xbf16>, vector<8x32xbf16>, vector<16x32xf32> -> vector<16x32xf32>
    %58 = arith.addf %7, %57 : vector<16x32xf32>
    %c0_24 = arith.constant 0 : index
    %c0_25 = arith.constant 0 : index
    %c8 = arith.constant 8 : index
    %59 = vector.load %arg1[%c0_24, %c0_25, %c8] : memref<1x16x96xbf16, #tpu.memory_space<vmem>>, vector<1x16x8xbf16>
    %60 = vector.shape_cast %59 : vector<1x16x8xbf16> to vector<16x8xbf16>
    %61 = arith.extf %60 : vector<16x8xbf16> to vector<16x8xf32>
    %c0_26 = arith.constant 0 : index
    %c0_27 = arith.constant 0 : index
    %c40 = arith.constant 40 : index
    %62 = vector.load %arg1[%c0_26, %c0_27, %c40] : memref<1x16x96xbf16, #tpu.memory_space<vmem>>, vector<1x16x8xbf16>
    %63 = vector.shape_cast %62 : vector<1x16x8xbf16> to vector<16x8xbf16>
    %64 = arith.extf %63 : vector<16x8xbf16> to vector<16x8xf32>
    %c0_28 = arith.constant 0 : index
    %c0_29 = arith.constant 0 : index
    %c72 = arith.constant 72 : index
    %65 = vector.load %arg1[%c0_28, %c0_29, %c72] : memref<1x16x96xbf16, #tpu.memory_space<vmem>>, vector<1x16x8xbf16>
    %66 = vector.shape_cast %65 : vector<1x16x8xbf16> to vector<16x8xbf16>
    %67 = vector.extract_strided_slice %61 {offsets = [0, 1], sizes = [16, 7], strides = [1, 1]} : vector<16x8xf32> to vector<16x7xf32>
    %68 = vector.extract_strided_slice %61 {offsets = [0, 0], sizes = [16, 1], strides = [1, 1]} : vector<16x8xf32> to vector<16x1xf32>
    %69 = tpu.concatenate %67, %68 in 1 : vector<16x7xf32>, vector<16x1xf32> -> vector<16x8xf32>
    %70 = vector.extract_strided_slice %61 {offsets = [0, 7], sizes = [16, 1], strides = [1, 1]} : vector<16x8xf32> to vector<16x1xf32>
    %71 = vector.extract_strided_slice %61 {offsets = [0, 0], sizes = [16, 7], strides = [1, 1]} : vector<16x8xf32> to vector<16x7xf32>
    %72 = tpu.concatenate %70, %71 in 1 : vector<16x1xf32>, vector<16x7xf32> -> vector<16x8xf32>
    %73 = arith.mulf %61, %0 : vector<16x8xf32>
    %74 = arith.mulf %69, %1 : vector<16x8xf32>
    %75 = arith.addf %73, %74 : vector<16x8xf32>
    %76 = arith.mulf %72, %2 : vector<16x8xf32>
    %77 = arith.addf %75, %76 : vector<16x8xf32>
    %cst_30 = arith.constant 0.353553385 : f32
    %78 = vector.broadcast %cst_30 : f32 to vector<16x8xf32>
    %79 = arith.mulf %77, %78 : vector<16x8xf32>
    %80 = arith.truncf %79 : vector<16x8xf32> to vector<16x8xbf16>
    %81 = vector.extract_strided_slice %64 {offsets = [0, 1], sizes = [16, 7], strides = [1, 1]} : vector<16x8xf32> to vector<16x7xf32>
    %82 = vector.extract_strided_slice %64 {offsets = [0, 0], sizes = [16, 1], strides = [1, 1]} : vector<16x8xf32> to vector<16x1xf32>
    %83 = tpu.concatenate %81, %82 in 1 : vector<16x7xf32>, vector<16x1xf32> -> vector<16x8xf32>
    %84 = vector.extract_strided_slice %64 {offsets = [0, 7], sizes = [16, 1], strides = [1, 1]} : vector<16x8xf32> to vector<16x1xf32>
    %85 = vector.extract_strided_slice %64 {offsets = [0, 0], sizes = [16, 7], strides = [1, 1]} : vector<16x8xf32> to vector<16x7xf32>
    %86 = tpu.concatenate %84, %85 in 1 : vector<16x1xf32>, vector<16x7xf32> -> vector<16x8xf32>
    %87 = arith.mulf %64, %0 : vector<16x8xf32>
    %88 = arith.mulf %83, %1 : vector<16x8xf32>
    %89 = arith.addf %87, %88 : vector<16x8xf32>
    %90 = arith.mulf %86, %2 : vector<16x8xf32>
    %91 = arith.addf %89, %90 : vector<16x8xf32>
    %92 = arith.truncf %91 : vector<16x8xf32> to vector<16x8xbf16>
    %cst_31 = arith.constant dense<0.000000e+00> : vector<16x16xf32>
    %93 = tpu.matmul %80, %92, %cst_31 {dimension_numbers = #tpu.dot_dimension_numbers<[1], [1], [0], [0], [0, 0, 1, 0], [], []>} : vector<16x8xbf16>, vector<16x8xbf16>, vector<16x16xf32> -> vector<16x16xf32>
    %cst_32 = arith.constant dense<0xFF800000> : vector<16xf32>
    %94 = vector.multi_reduction <maximumf>, %93, %cst_32 [1] : vector<16x16xf32> to vector<16xf32>
    %95 = vector.shape_cast %94 : vector<16xf32> to vector<16x1xf32>
    %96 = vector.broadcast %95 : vector<16x1xf32> to vector<16x16xf32>
    %97 = arith.subf %93, %96 : vector<16x16xf32>
    %98 = math.exp %97 : vector<16x16xf32>
    %cst_33 = arith.constant dense<0.000000e+00> : vector<16xf32>
    %99 = vector.multi_reduction <add>, %98, %cst_33 [1] : vector<16x16xf32> to vector<16xf32>
    %100 = vector.shape_cast %99 : vector<16xf32> to vector<16x1xf32>
    %101 = tpu.reciprocal %100 {approx = true} : vector<16x1xf32> -> vector<16x1xf32>
    %102 = vector.broadcast %101 : vector<16x1xf32> to vector<16x16xf32>
    %103 = arith.mulf %98, %102 : vector<16x16xf32>
    %104 = arith.truncf %103 : vector<16x16xf32> to vector<16x16xbf16>
    %cst_34 = arith.constant dense<0.000000e+00> : vector<16x8xf32>
    %105 = tpu.matmul %104, %66, %cst_34 {dimension_numbers = #tpu.dot_dimension_numbers<[1], [0], [0], [1], [0, 0, 1, 1], [], []>} : vector<16x16xbf16>, vector<16x8xbf16>, vector<16x8xf32> -> vector<16x8xf32>
    %106 = arith.truncf %105 : vector<16x8xf32> to vector<16x8xbf16>
    %c8_35 = arith.constant 8 : index
    %c0_36 = arith.constant 0 : index
    %107 = vector.load %arg6[%c8_35, %c0_36] : memref<32x32xbf16, #tpu.memory_space<vmem>>, vector<8x32xbf16>
    %cst_37 = arith.constant dense<0.000000e+00> : vector<16x32xf32>
    %108 = tpu.matmul %106, %107, %cst_37 {dimension_numbers = #tpu.dot_dimension_numbers<[1], [0], [0], [1], [0, 0, 1, 1], [], []>} : vector<16x8xbf16>, vector<8x32xbf16>, vector<16x32xf32> -> vector<16x32xf32>
    %109 = arith.addf %58, %108 : vector<16x32xf32>
    %c0_38 = arith.constant 0 : index
    %c0_39 = arith.constant 0 : index
    %c16 = arith.constant 16 : index
    %110 = vector.load %arg1[%c0_38, %c0_39, %c16] : memref<1x16x96xbf16, #tpu.memory_space<vmem>>, vector<1x16x8xbf16>
    %111 = vector.shape_cast %110 : vector<1x16x8xbf16> to vector<16x8xbf16>
    %112 = arith.extf %111 : vector<16x8xbf16> to vector<16x8xf32>
    %c0_40 = arith.constant 0 : index
    %c0_41 = arith.constant 0 : index
    %c48 = arith.constant 48 : index
    %113 = vector.load %arg1[%c0_40, %c0_41, %c48] : memref<1x16x96xbf16, #tpu.memory_space<vmem>>, vector<1x16x8xbf16>
    %114 = vector.shape_cast %113 : vector<1x16x8xbf16> to vector<16x8xbf16>
    %115 = arith.extf %114 : vector<16x8xbf16> to vector<16x8xf32>
    %c0_42 = arith.constant 0 : index
    %c0_43 = arith.constant 0 : index
    %c80 = arith.constant 80 : index
    %116 = vector.load %arg1[%c0_42, %c0_43, %c80] : memref<1x16x96xbf16, #tpu.memory_space<vmem>>, vector<1x16x8xbf16>
    %117 = vector.shape_cast %116 : vector<1x16x8xbf16> to vector<16x8xbf16>
    %118 = vector.extract_strided_slice %112 {offsets = [0, 1], sizes = [16, 7], strides = [1, 1]} : vector<16x8xf32> to vector<16x7xf32>
    %119 = vector.extract_strided_slice %112 {offsets = [0, 0], sizes = [16, 1], strides = [1, 1]} : vector<16x8xf32> to vector<16x1xf32>
    %120 = tpu.concatenate %118, %119 in 1 : vector<16x7xf32>, vector<16x1xf32> -> vector<16x8xf32>
    %121 = vector.extract_strided_slice %112 {offsets = [0, 7], sizes = [16, 1], strides = [1, 1]} : vector<16x8xf32> to vector<16x1xf32>
    %122 = vector.extract_strided_slice %112 {offsets = [0, 0], sizes = [16, 7], strides = [1, 1]} : vector<16x8xf32> to vector<16x7xf32>
    %123 = tpu.concatenate %121, %122 in 1 : vector<16x1xf32>, vector<16x7xf32> -> vector<16x8xf32>
    %124 = arith.mulf %112, %0 : vector<16x8xf32>
    %125 = arith.mulf %120, %1 : vector<16x8xf32>
    %126 = arith.addf %124, %125 : vector<16x8xf32>
    %127 = arith.mulf %123, %2 : vector<16x8xf32>
    %128 = arith.addf %126, %127 : vector<16x8xf32>
    %cst_44 = arith.constant 0.353553385 : f32
    %129 = vector.broadcast %cst_44 : f32 to vector<16x8xf32>
    %130 = arith.mulf %128, %129 : vector<16x8xf32>
    %131 = arith.truncf %130 : vector<16x8xf32> to vector<16x8xbf16>
    %132 = vector.extract_strided_slice %115 {offsets = [0, 1], sizes = [16, 7], strides = [1, 1]} : vector<16x8xf32> to vector<16x7xf32>
    %133 = vector.extract_strided_slice %115 {offsets = [0, 0], sizes = [16, 1], strides = [1, 1]} : vector<16x8xf32> to vector<16x1xf32>
    %134 = tpu.concatenate %132, %133 in 1 : vector<16x7xf32>, vector<16x1xf32> -> vector<16x8xf32>
    %135 = vector.extract_strided_slice %115 {offsets = [0, 7], sizes = [16, 1], strides = [1, 1]} : vector<16x8xf32> to vector<16x1xf32>
    %136 = vector.extract_strided_slice %115 {offsets = [0, 0], sizes = [16, 7], strides = [1, 1]} : vector<16x8xf32> to vector<16x7xf32>
    %137 = tpu.concatenate %135, %136 in 1 : vector<16x1xf32>, vector<16x7xf32> -> vector<16x8xf32>
    %138 = arith.mulf %115, %0 : vector<16x8xf32>
    %139 = arith.mulf %134, %1 : vector<16x8xf32>
    %140 = arith.addf %138, %139 : vector<16x8xf32>
    %141 = arith.mulf %137, %2 : vector<16x8xf32>
    %142 = arith.addf %140, %141 : vector<16x8xf32>
    %143 = arith.truncf %142 : vector<16x8xf32> to vector<16x8xbf16>
    %cst_45 = arith.constant dense<0.000000e+00> : vector<16x16xf32>
    %144 = tpu.matmul %131, %143, %cst_45 {dimension_numbers = #tpu.dot_dimension_numbers<[1], [1], [0], [0], [0, 0, 1, 0], [], []>} : vector<16x8xbf16>, vector<16x8xbf16>, vector<16x16xf32> -> vector<16x16xf32>
    %cst_46 = arith.constant dense<0xFF800000> : vector<16xf32>
    %145 = vector.multi_reduction <maximumf>, %144, %cst_46 [1] : vector<16x16xf32> to vector<16xf32>
    %146 = vector.shape_cast %145 : vector<16xf32> to vector<16x1xf32>
    %147 = vector.broadcast %146 : vector<16x1xf32> to vector<16x16xf32>
    %148 = arith.subf %144, %147 : vector<16x16xf32>
    %149 = math.exp %148 : vector<16x16xf32>
    %cst_47 = arith.constant dense<0.000000e+00> : vector<16xf32>
    %150 = vector.multi_reduction <add>, %149, %cst_47 [1] : vector<16x16xf32> to vector<16xf32>
    %151 = vector.shape_cast %150 : vector<16xf32> to vector<16x1xf32>
    %152 = tpu.reciprocal %151 {approx = true} : vector<16x1xf32> -> vector<16x1xf32>
    %153 = vector.broadcast %152 : vector<16x1xf32> to vector<16x16xf32>
    %154 = arith.mulf %149, %153 : vector<16x16xf32>
    %155 = arith.truncf %154 : vector<16x16xf32> to vector<16x16xbf16>
    %cst_48 = arith.constant dense<0.000000e+00> : vector<16x8xf32>
    %156 = tpu.matmul %155, %117, %cst_48 {dimension_numbers = #tpu.dot_dimension_numbers<[1], [0], [0], [1], [0, 0, 1, 1], [], []>} : vector<16x16xbf16>, vector<16x8xbf16>, vector<16x8xf32> -> vector<16x8xf32>
    %157 = arith.truncf %156 : vector<16x8xf32> to vector<16x8xbf16>
    %c16_49 = arith.constant 16 : index
    %c0_50 = arith.constant 0 : index
    %158 = vector.load %arg6[%c16_49, %c0_50] : memref<32x32xbf16, #tpu.memory_space<vmem>>, vector<8x32xbf16>
    %cst_51 = arith.constant dense<0.000000e+00> : vector<16x32xf32>
    %159 = tpu.matmul %157, %158, %cst_51 {dimension_numbers = #tpu.dot_dimension_numbers<[1], [0], [0], [1], [0, 0, 1, 1], [], []>} : vector<16x8xbf16>, vector<8x32xbf16>, vector<16x32xf32> -> vector<16x32xf32>
    %160 = arith.addf %109, %159 : vector<16x32xf32>
    %c0_52 = arith.constant 0 : index
    %c0_53 = arith.constant 0 : index
    %c24 = arith.constant 24 : index
    %161 = vector.load %arg1[%c0_52, %c0_53, %c24] : memref<1x16x96xbf16, #tpu.memory_space<vmem>>, vector<1x16x8xbf16>
    %162 = vector.shape_cast %161 : vector<1x16x8xbf16> to vector<16x8xbf16>
    %163 = arith.extf %162 : vector<16x8xbf16> to vector<16x8xf32>
    %c0_54 = arith.constant 0 : index
    %c0_55 = arith.constant 0 : index
    %c56 = arith.constant 56 : index
    %164 = vector.load %arg1[%c0_54, %c0_55, %c56] : memref<1x16x96xbf16, #tpu.memory_space<vmem>>, vector<1x16x8xbf16>
    %165 = vector.shape_cast %164 : vector<1x16x8xbf16> to vector<16x8xbf16>
    %166 = arith.extf %165 : vector<16x8xbf16> to vector<16x8xf32>
    %c0_56 = arith.constant 0 : index
    %c0_57 = arith.constant 0 : index
    %c88 = arith.constant 88 : index
    %167 = vector.load %arg1[%c0_56, %c0_57, %c88] : memref<1x16x96xbf16, #tpu.memory_space<vmem>>, vector<1x16x8xbf16>
    %168 = vector.shape_cast %167 : vector<1x16x8xbf16> to vector<16x8xbf16>
    %169 = vector.extract_strided_slice %163 {offsets = [0, 1], sizes = [16, 7], strides = [1, 1]} : vector<16x8xf32> to vector<16x7xf32>
    %170 = vector.extract_strided_slice %163 {offsets = [0, 0], sizes = [16, 1], strides = [1, 1]} : vector<16x8xf32> to vector<16x1xf32>
    %171 = tpu.concatenate %169, %170 in 1 : vector<16x7xf32>, vector<16x1xf32> -> vector<16x8xf32>
    %172 = vector.extract_strided_slice %163 {offsets = [0, 7], sizes = [16, 1], strides = [1, 1]} : vector<16x8xf32> to vector<16x1xf32>
    %173 = vector.extract_strided_slice %163 {offsets = [0, 0], sizes = [16, 7], strides = [1, 1]} : vector<16x8xf32> to vector<16x7xf32>
    %174 = tpu.concatenate %172, %173 in 1 : vector<16x1xf32>, vector<16x7xf32> -> vector<16x8xf32>
    %175 = arith.mulf %163, %0 : vector<16x8xf32>
    %176 = arith.mulf %171, %1 : vector<16x8xf32>
    %177 = arith.addf %175, %176 : vector<16x8xf32>
    %178 = arith.mulf %174, %2 : vector<16x8xf32>
    %179 = arith.addf %177, %178 : vector<16x8xf32>
    %cst_58 = arith.constant 0.353553385 : f32
    %180 = vector.broadcast %cst_58 : f32 to vector<16x8xf32>
    %181 = arith.mulf %179, %180 : vector<16x8xf32>
    %182 = arith.truncf %181 : vector<16x8xf32> to vector<16x8xbf16>
    %183 = vector.extract_strided_slice %166 {offsets = [0, 1], sizes = [16, 7], strides = [1, 1]} : vector<16x8xf32> to vector<16x7xf32>
    %184 = vector.extract_strided_slice %166 {offsets = [0, 0], sizes = [16, 1], strides = [1, 1]} : vector<16x8xf32> to vector<16x1xf32>
    %185 = tpu.concatenate %183, %184 in 1 : vector<16x7xf32>, vector<16x1xf32> -> vector<16x8xf32>
    %186 = vector.extract_strided_slice %166 {offsets = [0, 7], sizes = [16, 1], strides = [1, 1]} : vector<16x8xf32> to vector<16x1xf32>
    %187 = vector.extract_strided_slice %166 {offsets = [0, 0], sizes = [16, 7], strides = [1, 1]} : vector<16x8xf32> to vector<16x7xf32>
    %188 = tpu.concatenate %186, %187 in 1 : vector<16x1xf32>, vector<16x7xf32> -> vector<16x8xf32>
    %189 = arith.mulf %166, %0 : vector<16x8xf32>
    %190 = arith.mulf %185, %1 : vector<16x8xf32>
    %191 = arith.addf %189, %190 : vector<16x8xf32>
    %192 = arith.mulf %188, %2 : vector<16x8xf32>
    %193 = arith.addf %191, %192 : vector<16x8xf32>
    %194 = arith.truncf %193 : vector<16x8xf32> to vector<16x8xbf16>
    %cst_59 = arith.constant dense<0.000000e+00> : vector<16x16xf32>
    %195 = tpu.matmul %182, %194, %cst_59 {dimension_numbers = #tpu.dot_dimension_numbers<[1], [1], [0], [0], [0, 0, 1, 0], [], []>} : vector<16x8xbf16>, vector<16x8xbf16>, vector<16x16xf32> -> vector<16x16xf32>
    %cst_60 = arith.constant dense<0xFF800000> : vector<16xf32>
    %196 = vector.multi_reduction <maximumf>, %195, %cst_60 [1] : vector<16x16xf32> to vector<16xf32>
    %197 = vector.shape_cast %196 : vector<16xf32> to vector<16x1xf32>
    %198 = vector.broadcast %197 : vector<16x1xf32> to vector<16x16xf32>
    %199 = arith.subf %195, %198 : vector<16x16xf32>
    %200 = math.exp %199 : vector<16x16xf32>
    %cst_61 = arith.constant dense<0.000000e+00> : vector<16xf32>
    %201 = vector.multi_reduction <add>, %200, %cst_61 [1] : vector<16x16xf32> to vector<16xf32>
    %202 = vector.shape_cast %201 : vector<16xf32> to vector<16x1xf32>
    %203 = tpu.reciprocal %202 {approx = true} : vector<16x1xf32> -> vector<16x1xf32>
    %204 = vector.broadcast %203 : vector<16x1xf32> to vector<16x16xf32>
    %205 = arith.mulf %200, %204 : vector<16x16xf32>
    %206 = arith.truncf %205 : vector<16x16xf32> to vector<16x16xbf16>
    %cst_62 = arith.constant dense<0.000000e+00> : vector<16x8xf32>
    %207 = tpu.matmul %206, %168, %cst_62 {dimension_numbers = #tpu.dot_dimension_numbers<[1], [0], [0], [1], [0, 0, 1, 1], [], []>} : vector<16x16xbf16>, vector<16x8xbf16>, vector<16x8xf32> -> vector<16x8xf32>
    %208 = arith.truncf %207 : vector<16x8xf32> to vector<16x8xbf16>
    %c24_63 = arith.constant 24 : index
    %c0_64 = arith.constant 0 : index
    %209 = vector.load %arg6[%c24_63, %c0_64] : memref<32x32xbf16, #tpu.memory_space<vmem>>, vector<8x32xbf16>
    %cst_65 = arith.constant dense<0.000000e+00> : vector<16x32xf32>
    %210 = tpu.matmul %208, %209, %cst_65 {dimension_numbers = #tpu.dot_dimension_numbers<[1], [0], [0], [1], [0, 0, 1, 1], [], []>} : vector<16x8xbf16>, vector<8x32xbf16>, vector<16x32xf32> -> vector<16x32xf32>
    %211 = arith.addf %160, %210 : vector<16x32xf32>
    %c0_66 = arith.constant 0 : index
    %c0_67 = arith.constant 0 : index
    %c0_68 = arith.constant 0 : index
    %212 = vector.load %arg8[%c0_66, %c0_67, %c0_68] : memref<1x16x32xf32, #tpu.memory_space<vmem>>, vector<1x16x32xf32>
    %213 = vector.shape_cast %212 : vector<1x16x32xf32> to vector<16x32xf32>
    %214 = vector.shape_cast %211 : vector<16x32xf32> to vector<1x16x32xf32>
    tpu.vector_store %arg8[%c0_66, %c0_67, %c0_68], %214 {strides = array<i32>} : memref<1x16x32xf32, #tpu.memory_space<vmem>>, vector<1x16x32xf32>,
    return
  }
  func.func @transform_0(%arg0: i32) -> (i32, i32, i32) {
    %c0_i32 = arith.constant 0 : i32
    %c0_i32_0 = arith.constant 0 : i32
    %c0_i32_1 = arith.constant 0 : i32
    return %arg0, %c0_i32, %c0_i32_0 : i32, i32, i32
  }
  func.func @transform_1(%arg0: i32) -> (i32, i32) {
    %c0_i32 = arith.constant 0 : i32
    %c0_i32_0 = arith.constant 0 : i32
    %c0_i32_1 = arith.constant 0 : i32
    return %c0_i32, %c0_i32_0 : i32, i32
  }
  func.func @transform_2(%arg0: i32) -> (i32, i32) {
    %c0_i32 = arith.constant 0 : i32
    %c0_i32_0 = arith.constant 0 : i32
    %c0_i32_1 = arith.constant 0 : i32
    return %c0_i32, %c0_i32_0 : i32, i32
  }
  func.func @transform_3(%arg0: i32) -> (i32, i32) {
    %c0_i32 = arith.constant 0 : i32
    %c0_i32_0 = arith.constant 0 : i32
    %c0_i32_1 = arith.constant 0 : i32
    return %c0_i32, %c0_i32_0 : i32, i32
  }
  func.func @transform_4(%arg0: i32) -> (i32, i32, i32) {
    %c0_i32 = arith.constant 0 : i32
    %c0_i32_0 = arith.constant 0 : i32
    %c0_i32_1 = arith.constant 0 : i32
    return %arg0, %c0_i32, %c0_i32_0 : i32, i32, i32
  }
  func.func @transform_5(%arg0: i32) -> (i32, i32) {
    %c0_i32 = arith.constant 0 : i32
    %c0_i32_0 = arith.constant 0 : i32
    %c0_i32_1 = arith.constant 0 : i32
    return %c0_i32, %c0_i32_0 : i32, i32
  }
  func.func @transform_6(%arg0: i32) -> (i32, i32) {
    %c0_i32 = arith.constant 0 : i32
    %c0_i32_0 = arith.constant 0 : i32
    %c0_i32_1 = arith.constant 0 : i32
    return %c0_i32, %c0_i32_0 : i32, i32
  }
  func.func @transform_7(%arg0: i32) -> (i32, i32, i32) {
    %c0_i32 = arith.constant 0 : i32
    %c0_i32_0 = arith.constant 0 : i32
    %c0_i32_1 = arith.constant 0 : i32
    return %arg0, %c0_i32, %c0_i32_0 : i32, i32, i32
  }
}

module attributes {stable_mosaic.version = 11 : i64} {
  func.func @_ln_linear_kernel(%arg0: i32, %arg1: memref<32x32xf32, #tpu.memory_space<vmem>>, %arg2: memref<1x32xf32, #tpu.memory_space<vmem>>, %arg3: memref<1x32xf32, #tpu.memory_space<vmem>>, %arg4: memref<32x96xbf16, #tpu.memory_space<vmem>>, %arg5: memref<1x96xf32, #tpu.memory_space<vmem>>, %arg6: memref<32x96xbf16, #tpu.memory_space<vmem>>) attributes {dimension_semantics = [#tpu.dimension_semantics<parallel>], iteration_bounds = array<i64: 1>, scalar_prefetch = 0 : i64, scratch_operands = 0 : i64, tpu.core_type = #tpu.core_type<tc>, window_params = [{transform_indices = @transform_0, window_bounds = array<i64: 32, 32>}, {pipeline_mode = #tpu.pipeline_mode<synchronous>, transform_indices = @transform_1, window_bounds = array<i64: 1, 32>}, {pipeline_mode = #tpu.pipeline_mode<synchronous>, transform_indices = @transform_2, window_bounds = array<i64: 1, 32>}, {pipeline_mode = #tpu.pipeline_mode<synchronous>, transform_indices = @transform_3, window_bounds = array<i64: 32, 96>}, {pipeline_mode = #tpu.pipeline_mode<synchronous>, transform_indices = @transform_4, window_bounds = array<i64: 1, 96>}, {transform_indices = @transform_5, window_bounds = array<i64: 32, 96>}]} {
    %c0 = arith.constant 0 : index
    %c0_0 = arith.constant 0 : index
    %0 = vector.load %arg1[%c0, %c0_0] : memref<32x32xf32, #tpu.memory_space<vmem>>, vector<32x32xf32>
    %cst = arith.constant dense<0.000000e+00> : vector<32xf32>
    %1 = vector.multi_reduction <add>, %0, %cst [1] : vector<32x32xf32> to vector<32xf32>
    %2 = vector.shape_cast %1 : vector<32xf32> to vector<32x1xf32>
    %cst_1 = arith.constant 3.200000e+01 : f32
    %3 = vector.broadcast %cst_1 : f32 to vector<32x1xf32>
    %4 = arith.divf %2, %3 : vector<32x1xf32>
    %5 = vector.broadcast %4 : vector<32x1xf32> to vector<32x32xf32>
    %6 = arith.subf %0, %5 : vector<32x32xf32>
    %7 = arith.mulf %6, %6 : vector<32x32xf32>
    %cst_2 = arith.constant dense<0.000000e+00> : vector<32xf32>
    %8 = vector.multi_reduction <add>, %7, %cst_2 [1] : vector<32x32xf32> to vector<32xf32>
    %9 = vector.shape_cast %8 : vector<32xf32> to vector<32x1xf32>
    %cst_3 = arith.constant 3.200000e+01 : f32
    %10 = vector.broadcast %cst_3 : f32 to vector<32x1xf32>
    %11 = arith.divf %9, %10 : vector<32x1xf32>
    %cst_4 = arith.constant 9.99999974E-6 : f32
    %12 = vector.broadcast %cst_4 : f32 to vector<32x1xf32>
    %13 = arith.addf %11, %12 : vector<32x1xf32>
    %14 = math.rsqrt %13 : vector<32x1xf32>
    %15 = vector.broadcast %14 : vector<32x1xf32> to vector<32x32xf32>
    %16 = arith.mulf %6, %15 : vector<32x32xf32>
    %c0_5 = arith.constant 0 : index
    %c0_6 = arith.constant 0 : index
    %17 = vector.load %arg2[%c0_5, %c0_6] : memref<1x32xf32, #tpu.memory_space<vmem>>, vector<1x32xf32>
    %18 = vector.broadcast %17 : vector<1x32xf32> to vector<32x32xf32>
    %19 = arith.mulf %16, %18 : vector<32x32xf32>
    %c0_7 = arith.constant 0 : index
    %c0_8 = arith.constant 0 : index
    %20 = vector.load %arg3[%c0_7, %c0_8] : memref<1x32xf32, #tpu.memory_space<vmem>>, vector<1x32xf32>
    %21 = vector.broadcast %20 : vector<1x32xf32> to vector<32x32xf32>
    %22 = arith.addf %19, %21 : vector<32x32xf32>
    %23 = arith.truncf %22 : vector<32x32xf32> to vector<32x32xbf16>
    %c0_9 = arith.constant 0 : index
    %c0_10 = arith.constant 0 : index
    %24 = vector.load %arg4[%c0_9, %c0_10] : memref<32x96xbf16, #tpu.memory_space<vmem>>, vector<32x96xbf16>
    %cst_11 = arith.constant dense<0.000000e+00> : vector<32x96xf32>
    %25 = tpu.matmul %23, %24, %cst_11 {dimension_numbers = #tpu.dot_dimension_numbers<[1], [0], [0], [1], [0, 0, 1, 1], [], []>} : vector<32x32xbf16>, vector<32x96xbf16>, vector<32x96xf32> -> vector<32x96xf32>
    %c0_12 = arith.constant 0 : index
    %c0_13 = arith.constant 0 : index
    %26 = vector.load %arg5[%c0_12, %c0_13] : memref<1x96xf32, #tpu.memory_space<vmem>>, vector<1x96xf32>
    %27 = vector.broadcast %26 : vector<1x96xf32> to vector<32x96xf32>
    %28 = arith.addf %25, %27 : vector<32x96xf32>
    %29 = arith.truncf %28 : vector<32x96xf32> to vector<32x96xbf16>
    %c0_14 = arith.constant 0 : index
    %c0_15 = arith.constant 0 : index
    %30 = vector.load %arg6[%c0_14, %c0_15] : memref<32x96xbf16, #tpu.memory_space<vmem>>, vector<32x96xbf16>
    tpu.vector_store %arg6[%c0_14, %c0_15], %29 {strides = array<i32>} : memref<32x96xbf16, #tpu.memory_space<vmem>>, vector<32x96xbf16>,
    return
  }
  func.func @transform_0(%arg0: i32) -> (i32, i32) {
    %c0_i32 = arith.constant 0 : i32
    %c0_i32_0 = arith.constant 0 : i32
    return %arg0, %c0_i32 : i32, i32
  }
  func.func @transform_1(%arg0: i32) -> (i32, i32) {
    %c0_i32 = arith.constant 0 : i32
    %c0_i32_0 = arith.constant 0 : i32
    %c0_i32_1 = arith.constant 0 : i32
    return %c0_i32, %c0_i32_0 : i32, i32
  }
  func.func @transform_2(%arg0: i32) -> (i32, i32) {
    %c0_i32 = arith.constant 0 : i32
    %c0_i32_0 = arith.constant 0 : i32
    %c0_i32_1 = arith.constant 0 : i32
    return %c0_i32, %c0_i32_0 : i32, i32
  }
  func.func @transform_3(%arg0: i32) -> (i32, i32) {
    %c0_i32 = arith.constant 0 : i32
    %c0_i32_0 = arith.constant 0 : i32
    %c0_i32_1 = arith.constant 0 : i32
    return %c0_i32, %c0_i32_0 : i32, i32
  }
  func.func @transform_4(%arg0: i32) -> (i32, i32) {
    %c0_i32 = arith.constant 0 : i32
    %c0_i32_0 = arith.constant 0 : i32
    %c0_i32_1 = arith.constant 0 : i32
    return %c0_i32, %c0_i32_0 : i32, i32
  }
  func.func @transform_5(%arg0: i32) -> (i32, i32) {
    %c0_i32 = arith.constant 0 : i32
    %c0_i32_0 = arith.constant 0 : i32
    return %arg0, %c0_i32 : i32, i32
  }
}

module attributes {stable_mosaic.version = 11 : i64} {
  func.func @_ln_ffn_residual_kernel(%arg0: i32, %arg1: memref<32x32xf32, #tpu.memory_space<vmem>>, %arg2: memref<1x32xf32, #tpu.memory_space<vmem>>, %arg3: memref<1x32xf32, #tpu.memory_space<vmem>>, %arg4: memref<32x64xbf16, #tpu.memory_space<vmem>>, %arg5: memref<1x64xf32, #tpu.memory_space<vmem>>, %arg6: memref<64x32xbf16, #tpu.memory_space<vmem>>, %arg7: memref<1x32xf32, #tpu.memory_space<vmem>>, %arg8: memref<1x32xf32, #tpu.memory_space<vmem>>, %arg9: memref<1x32xf32, #tpu.memory_space<vmem>>, %arg10: memref<32x32xf32, #tpu.memory_space<vmem>>) attributes {dimension_semantics = [#tpu.dimension_semantics<parallel>], iteration_bounds = array<i64: 1>, scalar_prefetch = 0 : i64, scratch_operands = 0 : i64, tpu.core_type = #tpu.core_type<tc>, window_params = [{transform_indices = @transform_0, window_bounds = array<i64: 32, 32>}, {pipeline_mode = #tpu.pipeline_mode<synchronous>, transform_indices = @transform_1, window_bounds = array<i64: 1, 32>}, {pipeline_mode = #tpu.pipeline_mode<synchronous>, transform_indices = @transform_2, window_bounds = array<i64: 1, 32>}, {pipeline_mode = #tpu.pipeline_mode<synchronous>, transform_indices = @transform_3, window_bounds = array<i64: 32, 64>}, {pipeline_mode = #tpu.pipeline_mode<synchronous>, transform_indices = @transform_4, window_bounds = array<i64: 1, 64>}, {pipeline_mode = #tpu.pipeline_mode<synchronous>, transform_indices = @transform_5, window_bounds = array<i64: 64, 32>}, {pipeline_mode = #tpu.pipeline_mode<synchronous>, transform_indices = @transform_6, window_bounds = array<i64: 1, 32>}, {pipeline_mode = #tpu.pipeline_mode<synchronous>, transform_indices = @transform_7, window_bounds = array<i64: 1, 32>}, {pipeline_mode = #tpu.pipeline_mode<synchronous>, transform_indices = @transform_8, window_bounds = array<i64: 1, 32>}, {transform_indices = @transform_9, window_bounds = array<i64: 32, 32>}]} {
    %c0 = arith.constant 0 : index
    %c0_0 = arith.constant 0 : index
    %0 = vector.load %arg1[%c0, %c0_0] : memref<32x32xf32, #tpu.memory_space<vmem>>, vector<32x32xf32>
    %cst = arith.constant dense<0.000000e+00> : vector<32xf32>
    %1 = vector.multi_reduction <add>, %0, %cst [1] : vector<32x32xf32> to vector<32xf32>
    %2 = vector.shape_cast %1 : vector<32xf32> to vector<32x1xf32>
    %cst_1 = arith.constant 3.200000e+01 : f32
    %3 = vector.broadcast %cst_1 : f32 to vector<32x1xf32>
    %4 = arith.divf %2, %3 : vector<32x1xf32>
    %5 = vector.broadcast %4 : vector<32x1xf32> to vector<32x32xf32>
    %6 = arith.subf %0, %5 : vector<32x32xf32>
    %7 = arith.mulf %6, %6 : vector<32x32xf32>
    %cst_2 = arith.constant dense<0.000000e+00> : vector<32xf32>
    %8 = vector.multi_reduction <add>, %7, %cst_2 [1] : vector<32x32xf32> to vector<32xf32>
    %9 = vector.shape_cast %8 : vector<32xf32> to vector<32x1xf32>
    %cst_3 = arith.constant 3.200000e+01 : f32
    %10 = vector.broadcast %cst_3 : f32 to vector<32x1xf32>
    %11 = arith.divf %9, %10 : vector<32x1xf32>
    %cst_4 = arith.constant 9.99999974E-6 : f32
    %12 = vector.broadcast %cst_4 : f32 to vector<32x1xf32>
    %13 = arith.addf %11, %12 : vector<32x1xf32>
    %14 = math.rsqrt %13 : vector<32x1xf32>
    %15 = vector.broadcast %14 : vector<32x1xf32> to vector<32x32xf32>
    %16 = arith.mulf %6, %15 : vector<32x32xf32>
    %c0_5 = arith.constant 0 : index
    %c0_6 = arith.constant 0 : index
    %17 = vector.load %arg2[%c0_5, %c0_6] : memref<1x32xf32, #tpu.memory_space<vmem>>, vector<1x32xf32>
    %18 = vector.broadcast %17 : vector<1x32xf32> to vector<32x32xf32>
    %19 = arith.mulf %16, %18 : vector<32x32xf32>
    %c0_7 = arith.constant 0 : index
    %c0_8 = arith.constant 0 : index
    %20 = vector.load %arg3[%c0_7, %c0_8] : memref<1x32xf32, #tpu.memory_space<vmem>>, vector<1x32xf32>
    %21 = vector.broadcast %20 : vector<1x32xf32> to vector<32x32xf32>
    %22 = arith.addf %19, %21 : vector<32x32xf32>
    %23 = arith.truncf %22 : vector<32x32xf32> to vector<32x32xbf16>
    %c0_9 = arith.constant 0 : index
    %c0_10 = arith.constant 0 : index
    %24 = vector.load %arg7[%c0_9, %c0_10] : memref<1x32xf32, #tpu.memory_space<vmem>>, vector<1x32xf32>
    %25 = vector.broadcast %24 : vector<1x32xf32> to vector<32x32xf32>
    %26 = arith.addf %0, %25 : vector<32x32xf32>
    %c0_11 = arith.constant 0 : index
    %c0_12 = arith.constant 0 : index
    %27 = vector.load %arg4[%c0_11, %c0_12] : memref<32x64xbf16, #tpu.memory_space<vmem>>, vector<32x64xbf16>
    %cst_13 = arith.constant dense<0.000000e+00> : vector<32x64xf32>
    %28 = tpu.matmul %23, %27, %cst_13 {dimension_numbers = #tpu.dot_dimension_numbers<[1], [0], [0], [1], [0, 0, 1, 1], [], []>} : vector<32x32xbf16>, vector<32x64xbf16>, vector<32x64xf32> -> vector<32x64xf32>
    %c0_14 = arith.constant 0 : index
    %c0_15 = arith.constant 0 : index
    %29 = vector.load %arg5[%c0_14, %c0_15] : memref<1x64xf32, #tpu.memory_space<vmem>>, vector<1x64xf32>
    %30 = vector.broadcast %29 : vector<1x64xf32> to vector<32x64xf32>
    %31 = arith.addf %28, %30 : vector<32x64xf32>
    %cst_16 = arith.constant 5.000000e-01 : f32
    %32 = vector.broadcast %cst_16 : f32 to vector<32x64xf32>
    %33 = arith.mulf %32, %31 : vector<32x64xf32>
    %cst_17 = arith.constant 0.707106769 : f32
    %34 = vector.broadcast %cst_17 : f32 to vector<32x64xf32>
    %35 = arith.mulf %31, %34 : vector<32x64xf32>
    %cst_18 = arith.constant 0.000000e+00 : f32
    %36 = vector.broadcast %cst_18 : f32 to vector<32x64xf32>
    %37 = arith.cmpf olt, %35, %36 : vector<32x64xf32>
    %cst_19 = arith.constant 0.000000e+00 : f32
    %38 = vector.broadcast %cst_19 : f32 to vector<32x64xf32>
    %39 = arith.subf %38, %35 : vector<32x64xf32>
    %40 = arith.select %37, %39, %35 : vector<32x64xi1>, vector<32x64xf32>
    %cst_20 = arith.constant 0.327591091 : f32
    %41 = vector.broadcast %cst_20 : f32 to vector<32x64xf32>
    %42 = arith.mulf %41, %40 : vector<32x64xf32>
    %cst_21 = arith.constant 1.000000e+00 : f32
    %43 = vector.broadcast %cst_21 : f32 to vector<32x64xf32>
    %44 = arith.addf %43, %42 : vector<32x64xf32>
    %cst_22 = arith.constant 1.000000e+00 : f32
    %45 = vector.broadcast %cst_22 : f32 to vector<32x64xf32>
    %46 = arith.divf %45, %44 : vector<32x64xf32>
    %cst_23 = arith.constant 1.06140542 : f32
    %47 = vector.broadcast %cst_23 : f32 to vector<32x64xf32>
    %48 = arith.mulf %46, %47 : vector<32x64xf32>
    %cst_24 = arith.constant -1.45315206 : f32
    %49 = vector.broadcast %cst_24 : f32 to vector<32x64xf32>
    %50 = arith.addf %49, %48 : vector<32x64xf32>
    %51 = arith.mulf %46, %50 : vector<32x64xf32>
    %cst_25 = arith.constant 1.42141378 : f32
    %52 = vector.broadcast %cst_25 : f32 to vector<32x64xf32>
    %53 = arith.addf %52, %51 : vector<32x64xf32>
    %54 = arith.mulf %46, %53 : vector<32x64xf32>
    %cst_26 = arith.constant -0.284496725 : f32
    %55 = vector.broadcast %cst_26 : f32 to vector<32x64xf32>
    %56 = arith.addf %55, %54 : vector<32x64xf32>
    %57 = arith.mulf %46, %56 : vector<32x64xf32>
    %cst_27 = arith.constant 0.254829586 : f32
    %58 = vector.broadcast %cst_27 : f32 to vector<32x64xf32>
    %59 = arith.addf %58, %57 : vector<32x64xf32>
    %60 = arith.mulf %46, %59 : vector<32x64xf32>
    %cst_28 = arith.constant 0.000000e+00 : f32
    %61 = vector.broadcast %cst_28 : f32 to vector<32x64xf32>
    %62 = arith.subf %61, %40 : vector<32x64xf32>
    %63 = arith.mulf %62, %40 : vector<32x64xf32>
    %64 = math.exp %63 : vector<32x64xf32>
    %65 = arith.mulf %60, %64 : vector<32x64xf32>
    %cst_29 = arith.constant 1.000000e+00 : f32
    %66 = vector.broadcast %cst_29 : f32 to vector<32x64xf32>
    %67 = arith.subf %66, %65 : vector<32x64xf32>
    %cst_30 = arith.constant 0.000000e+00 : f32
    %68 = vector.broadcast %cst_30 : f32 to vector<32x64xf32>
    %69 = arith.cmpf olt, %35, %68 : vector<32x64xf32>
    %cst_31 = arith.constant 0.000000e+00 : f32
    %70 = vector.broadcast %cst_31 : f32 to vector<32x64xf32>
    %71 = arith.subf %70, %67 : vector<32x64xf32>
    %72 = arith.select %69, %71, %67 : vector<32x64xi1>, vector<32x64xf32>
    %cst_32 = arith.constant 1.000000e+00 : f32
    %73 = vector.broadcast %cst_32 : f32 to vector<32x64xf32>
    %74 = arith.addf %73, %72 : vector<32x64xf32>
    %75 = arith.mulf %33, %74 : vector<32x64xf32>
    %76 = arith.truncf %75 : vector<32x64xf32> to vector<32x64xbf16>
    %c0_33 = arith.constant 0 : index
    %c0_34 = arith.constant 0 : index
    %77 = vector.load %arg6[%c0_33, %c0_34] : memref<64x32xbf16, #tpu.memory_space<vmem>>, vector<64x32xbf16>
    %cst_35 = arith.constant dense<0.000000e+00> : vector<32x32xf32>
    %78 = tpu.matmul %76, %77, %cst_35 {dimension_numbers = #tpu.dot_dimension_numbers<[1], [0], [0], [1], [0, 0, 1, 1], [], []>} : vector<32x64xbf16>, vector<64x32xbf16>, vector<32x32xf32> -> vector<32x32xf32>
    %79 = arith.addf %26, %78 : vector<32x32xf32>
    %c0_36 = arith.constant 0 : index
    %c0_37 = arith.constant 0 : index
    %80 = vector.load %arg10[%c0_36, %c0_37] : memref<32x32xf32, #tpu.memory_space<vmem>>, vector<32x32xf32>
    tpu.vector_store %arg10[%c0_36, %c0_37], %79 {strides = array<i32>} : memref<32x32xf32, #tpu.memory_space<vmem>>, vector<32x32xf32>,
    return
  }
  func.func @transform_0(%arg0: i32) -> (i32, i32) {
    %c0_i32 = arith.constant 0 : i32
    %c0_i32_0 = arith.constant 0 : i32
    return %arg0, %c0_i32 : i32, i32
  }
  func.func @transform_1(%arg0: i32) -> (i32, i32) {
    %c0_i32 = arith.constant 0 : i32
    %c0_i32_0 = arith.constant 0 : i32
    %c0_i32_1 = arith.constant 0 : i32
    return %c0_i32, %c0_i32_0 : i32, i32
  }
  func.func @transform_2(%arg0: i32) -> (i32, i32) {
    %c0_i32 = arith.constant 0 : i32
    %c0_i32_0 = arith.constant 0 : i32
    %c0_i32_1 = arith.constant 0 : i32
    return %c0_i32, %c0_i32_0 : i32, i32
  }
  func.func @transform_3(%arg0: i32) -> (i32, i32) {
    %c0_i32 = arith.constant 0 : i32
    %c0_i32_0 = arith.constant 0 : i32
    %c0_i32_1 = arith.constant 0 : i32
    return %c0_i32, %c0_i32_0 : i32, i32
  }
  func.func @transform_4(%arg0: i32) -> (i32, i32) {
    %c0_i32 = arith.constant 0 : i32
    %c0_i32_0 = arith.constant 0 : i32
    %c0_i32_1 = arith.constant 0 : i32
    return %c0_i32, %c0_i32_0 : i32, i32
  }
  func.func @transform_5(%arg0: i32) -> (i32, i32) {
    %c0_i32 = arith.constant 0 : i32
    %c0_i32_0 = arith.constant 0 : i32
    %c0_i32_1 = arith.constant 0 : i32
    return %c0_i32, %c0_i32_0 : i32, i32
  }
  func.func @transform_6(%arg0: i32) -> (i32, i32) {
    %c0_i32 = arith.constant 0 : i32
    %c0_i32_0 = arith.constant 0 : i32
    %c0_i32_1 = arith.constant 0 : i32
    return %c0_i32, %c0_i32_0 : i32, i32
  }
  func.func @transform_7(%arg0: i32) -> (i32, i32) {
    %c0_i32 = arith.constant 0 : i32
    %c0_i32_0 = arith.constant 0 : i32
    %c0_i32_1 = arith.constant 0 : i32
    return %c0_i32, %c0_i32_0 : i32, i32
  }
  func.func @transform_8(%arg0: i32) -> (i32, i32) {
    %c0_i32 = arith.constant 0 : i32
    %c0_i32_0 = arith.constant 0 : i32
    %c0_i32_1 = arith.constant 0 : i32
    return %c0_i32, %c0_i32_0 : i32, i32
  }
  func.func @transform_9(%arg0: i32) -> (i32, i32) {
    %c0_i32 = arith.constant 0 : i32
    %c0_i32_0 = arith.constant 0 : i32
    return %arg0, %c0_i32 : i32, i32
  }
}

module attributes {stable_mosaic.version = 11 : i64} {
  func.func @_ln_ffn_residual_kernel(%arg0: i32, %arg1: memref<32x32xf32, #tpu.memory_space<vmem>>, %arg2: memref<1x32xf32, #tpu.memory_space<vmem>>, %arg3: memref<1x32xf32, #tpu.memory_space<vmem>>, %arg4: memref<32x64xbf16, #tpu.memory_space<vmem>>, %arg5: memref<1x64xf32, #tpu.memory_space<vmem>>, %arg6: memref<64x32xbf16, #tpu.memory_space<vmem>>, %arg7: memref<1x32xf32, #tpu.memory_space<vmem>>, %arg8: memref<1x32xf32, #tpu.memory_space<vmem>>, %arg9: memref<1x32xf32, #tpu.memory_space<vmem>>, %arg10: memref<32x32xf32, #tpu.memory_space<vmem>>) attributes {dimension_semantics = [#tpu.dimension_semantics<parallel>], iteration_bounds = array<i64: 1>, scalar_prefetch = 0 : i64, scratch_operands = 0 : i64, tpu.core_type = #tpu.core_type<tc>, window_params = [{transform_indices = @transform_0, window_bounds = array<i64: 32, 32>}, {pipeline_mode = #tpu.pipeline_mode<synchronous>, transform_indices = @transform_1, window_bounds = array<i64: 1, 32>}, {pipeline_mode = #tpu.pipeline_mode<synchronous>, transform_indices = @transform_2, window_bounds = array<i64: 1, 32>}, {pipeline_mode = #tpu.pipeline_mode<synchronous>, transform_indices = @transform_3, window_bounds = array<i64: 32, 64>}, {pipeline_mode = #tpu.pipeline_mode<synchronous>, transform_indices = @transform_4, window_bounds = array<i64: 1, 64>}, {pipeline_mode = #tpu.pipeline_mode<synchronous>, transform_indices = @transform_5, window_bounds = array<i64: 64, 32>}, {pipeline_mode = #tpu.pipeline_mode<synchronous>, transform_indices = @transform_6, window_bounds = array<i64: 1, 32>}, {pipeline_mode = #tpu.pipeline_mode<synchronous>, transform_indices = @transform_7, window_bounds = array<i64: 1, 32>}, {pipeline_mode = #tpu.pipeline_mode<synchronous>, transform_indices = @transform_8, window_bounds = array<i64: 1, 32>}, {transform_indices = @transform_9, window_bounds = array<i64: 32, 32>}]} {
    %c0 = arith.constant 0 : index
    %c0_0 = arith.constant 0 : index
    %0 = vector.load %arg1[%c0, %c0_0] : memref<32x32xf32, #tpu.memory_space<vmem>>, vector<32x32xf32>
    %cst = arith.constant dense<0.000000e+00> : vector<32xf32>
    %1 = vector.multi_reduction <add>, %0, %cst [1] : vector<32x32xf32> to vector<32xf32>
    %2 = vector.shape_cast %1 : vector<32xf32> to vector<32x1xf32>
    %cst_1 = arith.constant 3.200000e+01 : f32
    %3 = vector.broadcast %cst_1 : f32 to vector<32x1xf32>
    %4 = arith.divf %2, %3 : vector<32x1xf32>
    %5 = vector.broadcast %4 : vector<32x1xf32> to vector<32x32xf32>
    %6 = arith.subf %0, %5 : vector<32x32xf32>
    %7 = arith.mulf %6, %6 : vector<32x32xf32>
    %cst_2 = arith.constant dense<0.000000e+00> : vector<32xf32>
    %8 = vector.multi_reduction <add>, %7, %cst_2 [1] : vector<32x32xf32> to vector<32xf32>
    %9 = vector.shape_cast %8 : vector<32xf32> to vector<32x1xf32>
    %cst_3 = arith.constant 3.200000e+01 : f32
    %10 = vector.broadcast %cst_3 : f32 to vector<32x1xf32>
    %11 = arith.divf %9, %10 : vector<32x1xf32>
    %cst_4 = arith.constant 9.99999974E-6 : f32
    %12 = vector.broadcast %cst_4 : f32 to vector<32x1xf32>
    %13 = arith.addf %11, %12 : vector<32x1xf32>
    %14 = math.rsqrt %13 : vector<32x1xf32>
    %15 = vector.broadcast %14 : vector<32x1xf32> to vector<32x32xf32>
    %16 = arith.mulf %6, %15 : vector<32x32xf32>
    %c0_5 = arith.constant 0 : index
    %c0_6 = arith.constant 0 : index
    %17 = vector.load %arg2[%c0_5, %c0_6] : memref<1x32xf32, #tpu.memory_space<vmem>>, vector<1x32xf32>
    %18 = vector.broadcast %17 : vector<1x32xf32> to vector<32x32xf32>
    %19 = arith.mulf %16, %18 : vector<32x32xf32>
    %c0_7 = arith.constant 0 : index
    %c0_8 = arith.constant 0 : index
    %20 = vector.load %arg3[%c0_7, %c0_8] : memref<1x32xf32, #tpu.memory_space<vmem>>, vector<1x32xf32>
    %21 = vector.broadcast %20 : vector<1x32xf32> to vector<32x32xf32>
    %22 = arith.addf %19, %21 : vector<32x32xf32>
    %23 = arith.truncf %22 : vector<32x32xf32> to vector<32x32xbf16>
    %c0_9 = arith.constant 0 : index
    %c0_10 = arith.constant 0 : index
    %24 = vector.load %arg7[%c0_9, %c0_10] : memref<1x32xf32, #tpu.memory_space<vmem>>, vector<1x32xf32>
    %25 = vector.broadcast %24 : vector<1x32xf32> to vector<32x32xf32>
    %26 = arith.addf %0, %25 : vector<32x32xf32>
    %c0_11 = arith.constant 0 : index
    %c0_12 = arith.constant 0 : index
    %27 = vector.load %arg4[%c0_11, %c0_12] : memref<32x64xbf16, #tpu.memory_space<vmem>>, vector<32x64xbf16>
    %cst_13 = arith.constant dense<0.000000e+00> : vector<32x64xf32>
    %28 = tpu.matmul %23, %27, %cst_13 {dimension_numbers = #tpu.dot_dimension_numbers<[1], [0], [0], [1], [0, 0, 1, 1], [], []>} : vector<32x32xbf16>, vector<32x64xbf16>, vector<32x64xf32> -> vector<32x64xf32>
    %c0_14 = arith.constant 0 : index
    %c0_15 = arith.constant 0 : index
    %29 = vector.load %arg5[%c0_14, %c0_15] : memref<1x64xf32, #tpu.memory_space<vmem>>, vector<1x64xf32>
    %30 = vector.broadcast %29 : vector<1x64xf32> to vector<32x64xf32>
    %31 = arith.addf %28, %30 : vector<32x64xf32>
    %cst_16 = arith.constant 5.000000e-01 : f32
    %32 = vector.broadcast %cst_16 : f32 to vector<32x64xf32>
    %33 = arith.mulf %32, %31 : vector<32x64xf32>
    %cst_17 = arith.constant 0.707106769 : f32
    %34 = vector.broadcast %cst_17 : f32 to vector<32x64xf32>
    %35 = arith.mulf %31, %34 : vector<32x64xf32>
    %cst_18 = arith.constant 0.000000e+00 : f32
    %36 = vector.broadcast %cst_18 : f32 to vector<32x64xf32>
    %37 = arith.cmpf olt, %35, %36 : vector<32x64xf32>
    %cst_19 = arith.constant 0.000000e+00 : f32
    %38 = vector.broadcast %cst_19 : f32 to vector<32x64xf32>
    %39 = arith.subf %38, %35 : vector<32x64xf32>
    %40 = arith.select %37, %39, %35 : vector<32x64xi1>, vector<32x64xf32>
    %cst_20 = arith.constant 0.327591091 : f32
    %41 = vector.broadcast %cst_20 : f32 to vector<32x64xf32>
    %42 = arith.mulf %41, %40 : vector<32x64xf32>
    %cst_21 = arith.constant 1.000000e+00 : f32
    %43 = vector.broadcast %cst_21 : f32 to vector<32x64xf32>
    %44 = arith.addf %43, %42 : vector<32x64xf32>
    %cst_22 = arith.constant 1.000000e+00 : f32
    %45 = vector.broadcast %cst_22 : f32 to vector<32x64xf32>
    %46 = arith.divf %45, %44 : vector<32x64xf32>
    %cst_23 = arith.constant 1.06140542 : f32
    %47 = vector.broadcast %cst_23 : f32 to vector<32x64xf32>
    %48 = arith.mulf %46, %47 : vector<32x64xf32>
    %cst_24 = arith.constant -1.45315206 : f32
    %49 = vector.broadcast %cst_24 : f32 to vector<32x64xf32>
    %50 = arith.addf %49, %48 : vector<32x64xf32>
    %51 = arith.mulf %46, %50 : vector<32x64xf32>
    %cst_25 = arith.constant 1.42141378 : f32
    %52 = vector.broadcast %cst_25 : f32 to vector<32x64xf32>
    %53 = arith.addf %52, %51 : vector<32x64xf32>
    %54 = arith.mulf %46, %53 : vector<32x64xf32>
    %cst_26 = arith.constant -0.284496725 : f32
    %55 = vector.broadcast %cst_26 : f32 to vector<32x64xf32>
    %56 = arith.addf %55, %54 : vector<32x64xf32>
    %57 = arith.mulf %46, %56 : vector<32x64xf32>
    %cst_27 = arith.constant 0.254829586 : f32
    %58 = vector.broadcast %cst_27 : f32 to vector<32x64xf32>
    %59 = arith.addf %58, %57 : vector<32x64xf32>
    %60 = arith.mulf %46, %59 : vector<32x64xf32>
    %cst_28 = arith.constant 0.000000e+00 : f32
    %61 = vector.broadcast %cst_28 : f32 to vector<32x64xf32>
    %62 = arith.subf %61, %40 : vector<32x64xf32>
    %63 = arith.mulf %62, %40 : vector<32x64xf32>
    %64 = math.exp %63 : vector<32x64xf32>
    %65 = arith.mulf %60, %64 : vector<32x64xf32>
    %cst_29 = arith.constant 1.000000e+00 : f32
    %66 = vector.broadcast %cst_29 : f32 to vector<32x64xf32>
    %67 = arith.subf %66, %65 : vector<32x64xf32>
    %cst_30 = arith.constant 0.000000e+00 : f32
    %68 = vector.broadcast %cst_30 : f32 to vector<32x64xf32>
    %69 = arith.cmpf olt, %35, %68 : vector<32x64xf32>
    %cst_31 = arith.constant 0.000000e+00 : f32
    %70 = vector.broadcast %cst_31 : f32 to vector<32x64xf32>
    %71 = arith.subf %70, %67 : vector<32x64xf32>
    %72 = arith.select %69, %71, %67 : vector<32x64xi1>, vector<32x64xf32>
    %cst_32 = arith.constant 1.000000e+00 : f32
    %73 = vector.broadcast %cst_32 : f32 to vector<32x64xf32>
    %74 = arith.addf %73, %72 : vector<32x64xf32>
    %75 = arith.mulf %33, %74 : vector<32x64xf32>
    %76 = arith.truncf %75 : vector<32x64xf32> to vector<32x64xbf16>
    %c0_33 = arith.constant 0 : index
    %c0_34 = arith.constant 0 : index
    %77 = vector.load %arg6[%c0_33, %c0_34] : memref<64x32xbf16, #tpu.memory_space<vmem>>, vector<64x32xbf16>
    %cst_35 = arith.constant dense<0.000000e+00> : vector<32x32xf32>
    %78 = tpu.matmul %76, %77, %cst_35 {dimension_numbers = #tpu.dot_dimension_numbers<[1], [0], [0], [1], [0, 0, 1, 1], [], []>} : vector<32x64xbf16>, vector<64x32xbf16>, vector<32x32xf32> -> vector<32x32xf32>
    %79 = arith.addf %26, %78 : vector<32x32xf32>
    %cst_36 = arith.constant dense<0.000000e+00> : vector<32xf32>
    %80 = vector.multi_reduction <add>, %79, %cst_36 [1] : vector<32x32xf32> to vector<32xf32>
    %81 = vector.shape_cast %80 : vector<32xf32> to vector<32x1xf32>
    %cst_37 = arith.constant 3.200000e+01 : f32
    %82 = vector.broadcast %cst_37 : f32 to vector<32x1xf32>
    %83 = arith.divf %81, %82 : vector<32x1xf32>
    %84 = vector.broadcast %83 : vector<32x1xf32> to vector<32x32xf32>
    %85 = arith.subf %79, %84 : vector<32x32xf32>
    %86 = arith.mulf %85, %85 : vector<32x32xf32>
    %cst_38 = arith.constant dense<0.000000e+00> : vector<32xf32>
    %87 = vector.multi_reduction <add>, %86, %cst_38 [1] : vector<32x32xf32> to vector<32xf32>
    %88 = vector.shape_cast %87 : vector<32xf32> to vector<32x1xf32>
    %cst_39 = arith.constant 3.200000e+01 : f32
    %89 = vector.broadcast %cst_39 : f32 to vector<32x1xf32>
    %90 = arith.divf %88, %89 : vector<32x1xf32>
    %cst_40 = arith.constant 9.99999974E-6 : f32
    %91 = vector.broadcast %cst_40 : f32 to vector<32x1xf32>
    %92 = arith.addf %90, %91 : vector<32x1xf32>
    %93 = math.rsqrt %92 : vector<32x1xf32>
    %94 = vector.broadcast %93 : vector<32x1xf32> to vector<32x32xf32>
    %95 = arith.mulf %85, %94 : vector<32x32xf32>
    %c0_41 = arith.constant 0 : index
    %c0_42 = arith.constant 0 : index
    %96 = vector.load %arg8[%c0_41, %c0_42] : memref<1x32xf32, #tpu.memory_space<vmem>>, vector<1x32xf32>
    %97 = vector.broadcast %96 : vector<1x32xf32> to vector<32x32xf32>
    %98 = arith.mulf %95, %97 : vector<32x32xf32>
    %c0_43 = arith.constant 0 : index
    %c0_44 = arith.constant 0 : index
    %99 = vector.load %arg9[%c0_43, %c0_44] : memref<1x32xf32, #tpu.memory_space<vmem>>, vector<1x32xf32>
    %100 = vector.broadcast %99 : vector<1x32xf32> to vector<32x32xf32>
    %101 = arith.addf %98, %100 : vector<32x32xf32>
    %c0_45 = arith.constant 0 : index
    %c0_46 = arith.constant 0 : index
    %102 = vector.load %arg10[%c0_45, %c0_46] : memref<32x32xf32, #tpu.memory_space<vmem>>, vector<32x32xf32>
    tpu.vector_store %arg10[%c0_45, %c0_46], %101 {strides = array<i32>} : memref<32x32xf32, #tpu.memory_space<vmem>>, vector<32x32xf32>,
    return
  }
  func.func @transform_0(%arg0: i32) -> (i32, i32) {
    %c0_i32 = arith.constant 0 : i32
    %c0_i32_0 = arith.constant 0 : i32
    return %arg0, %c0_i32 : i32, i32
  }
  func.func @transform_1(%arg0: i32) -> (i32, i32) {
    %c0_i32 = arith.constant 0 : i32
    %c0_i32_0 = arith.constant 0 : i32
    %c0_i32_1 = arith.constant 0 : i32
    return %c0_i32, %c0_i32_0 : i32, i32
  }
  func.func @transform_2(%arg0: i32) -> (i32, i32) {
    %c0_i32 = arith.constant 0 : i32
    %c0_i32_0 = arith.constant 0 : i32
    %c0_i32_1 = arith.constant 0 : i32
    return %c0_i32, %c0_i32_0 : i32, i32
  }
  func.func @transform_3(%arg0: i32) -> (i32, i32) {
    %c0_i32 = arith.constant 0 : i32
    %c0_i32_0 = arith.constant 0 : i32
    %c0_i32_1 = arith.constant 0 : i32
    return %c0_i32, %c0_i32_0 : i32, i32
  }
  func.func @transform_4(%arg0: i32) -> (i32, i32) {
    %c0_i32 = arith.constant 0 : i32
    %c0_i32_0 = arith.constant 0 : i32
    %c0_i32_1 = arith.constant 0 : i32
    return %c0_i32, %c0_i32_0 : i32, i32
  }
  func.func @transform_5(%arg0: i32) -> (i32, i32) {
    %c0_i32 = arith.constant 0 : i32
    %c0_i32_0 = arith.constant 0 : i32
    %c0_i32_1 = arith.constant 0 : i32
    return %c0_i32, %c0_i32_0 : i32, i32
  }
  func.func @transform_6(%arg0: i32) -> (i32, i32) {
    %c0_i32 = arith.constant 0 : i32
    %c0_i32_0 = arith.constant 0 : i32
    %c0_i32_1 = arith.constant 0 : i32
    return %c0_i32, %c0_i32_0 : i32, i32
  }
  func.func @transform_7(%arg0: i32) -> (i32, i32) {
    %c0_i32 = arith.constant 0 : i32
    %c0_i32_0 = arith.constant 0 : i32
    %c0_i32_1 = arith.constant 0 : i32
    return %c0_i32, %c0_i32_0 : i32, i32
  }
  func.func @transform_8(%arg0: i32) -> (i32, i32) {
    %c0_i32 = arith.constant 0 : i32
    %c0_i32_0 = arith.constant 0 : i32
    %c0_i32_1 = arith.constant 0 : i32
    return %c0_i32, %c0_i32_0 : i32, i32
  }
  func.func @transform_9(%arg0: i32) -> (i32, i32) {
    %c0_i32 = arith.constant 0 : i32
    %c0_i32_0 = arith.constant 0 : i32
    return %arg0, %c0_i32 : i32, i32
  }
}

</mosaic_0001>

<bundles_post_ra>
// kernel: tpu_custom_call.1
= control target key start
LH: loop header
LB: loop body
LE: loop exit
PB: predicated region body
PF: predicated region fallthrough
CT: control target
= control target key end

     0   :  { %6 = vsyncpa [#allocation3], 0  ;;  %s140_s0 = inlined_call_operand.hbm [shape: f32[8,8], index: 0, kind: input, shape index: {}]   ;;  %s141_s1 = inlined_call_operand.hbm [shape: f32[8,8], index: 1, kind: output, shape index: {}]  }
   0x1   :  { %7 = vsyncpa [#allocation4], 0  ;;  %s102_s6 = smov [#allocation2]   ;;  %s54_s10 = scalar_lea.hbm %s140_s0, 128 }
   0x2   :  { %s14_s7 = sshll.u32 %s102_s6, 4  ;;  %p55_p0 = scmp.ne.s32.totalorder %s140_s0, %s54_s10  ;;  %s15_s7 = int_to_ptr.vmem [resolvable:$true] %s14_s7 }
   0x3   :  { %p58_p1 = scmp.lt.u32.totalorder %s54_s10, %s140_s0 }
   0x5   :  { %p60_p2 = pnand %p58_p1, %p55_p0 }
   0x7   :  { %63 = shalt.err (!%p60_p2)
}
   0x8   :  { %s64_s15 = scalar_lea.vmem %s15_s7, 128  ;;  %p69_p4 = scmp.lt.s32.totalorder %s15_s7, %s15_s7 }
   0x9   :  { %p65_p3 = scmp.ne.s32.totalorder %s15_s7, %s64_s15  ;;  %p70_p5 = scmp.lt.s32.totalorder %s64_s15, %s64_s15 }
   0xb   :  { %p71_p6 = por %p70_p5, %p69_p4 }
   0xd   :  { %p72_p7 = pnand %p71_p6, %p65_p3 }
   0xf   :  { %75 = shalt.err (!%p72_p7)
}
  0x10   :  { %17 = dma.hbm_to_vmem [thread:$0]  %s140_s0, 128, %s15_s7, [#allocation3]  }
  0x11   :  { %98 = dma.done.wait [#allocation3], 128  }
  0x12   :  { %99 = vsyncadd [#allocation3], 4294967168  ;;  %v21_v0 = vld [vmem:[#allocation2] sm:$0xff]  ;;  %s103_s18 = smov 8   ;;  %vm22_vm0 = vcmask 1047616   ;;  %s104_s19 = smov 121  }
  0x13   :  { %23 = vrot.lane.b32.xlu0 %v21_v0, %s103_s18  ;;  %s105_s20 = smov [#allocation5]   ;;  %vm33_vm1 = vcmask 64512  }
  0x14   :  { %s41_s21 = sshll.u32 %s105_s20, 4  ;;  %s42_s21 = int_to_ptr.vmem [resolvable:$true] %s41_s21 }
  0x15   :  { %s76_s0 = scalar_lea.vmem %s42_s21, 128  ;;  %p81_p9 = scmp.lt.s32.totalorder %s42_s21, %s42_s21 }
  0x16   :  { %p77_p8 = scmp.ne.s32.totalorder %s42_s21, %s76_s0  ;;  %p82_p10 = scmp.lt.s32.totalorder %s76_s0, %s76_s0 }
  0x18   :  { %p83_p11 = por %p82_p10, %p81_p9 }
  0x1a   :  { %p84_p12 = pnand %p83_p11, %p77_p8 }
  0x85   :  { %v24_v1 = vpop.permute.xlu0 %23 }
  0x86   :  { %v25_v2 = vsel %vm22_vm0, %v24_v1, %v21_v0 }
  0x87   :  { %26 = vrot.lane.b32.xlu0 %v25_v2, %s103_s18 }
  0xf9   :  { %v27_v3 = vpop.permute.xlu0 %26 }
  0xfa   :  { %v28_v4 = vsel %vm22_vm0, %v27_v3, %v21_v0 }
  0xfb   :  { %30 = vrot.lane.b32.xlu1 %v28_v4, %s104_s19 }
 0x16d   :  { %v31_v5 = vpop.permute.xlu1 %30 }
 0x16e   :  { %34 = vst.msk [vmem:[#allocation5] sm:$0xff] %vm33_vm1, %v31_v5 }
 0x16f   :  { %87 = shalt.err (!%p84_p12)
}
 0x170   :  { %s88_s24 = scalar_lea.hbm %s141_s1, 128 }
 0x171   :  { %p89_p13 = scmp.ne.s32.totalorder %s141_s1, %s88_s24  ;;  %p92_p0 = scmp.lt.u32.totalorder %s88_s24, %s141_s1 }
 0x173   :  { %p94_p1 = pnand %p92_p0, %p89_p13 }
 0x175   :  { %97 = shalt.err (!%p94_p1)
}
 0x176   :  { %44 = dma.vmem_to_hbm [thread:$0]  %s42_s21, 128, %s141_s1, [#allocation4]  }
 0x177   :  { %100 = dma.done.wait [#allocation4], 128  }
 0x178   :  { %101 = vsyncadd [#allocation4], 4294967168 }
 0x179   :  { %48 = vsyncpa [#allocation3], 1 }
 0x17a   :  { %49 = vsyncpa [#allocation4], 1 }

// kernel: roformer_forward.6
= control target key start
LH: loop header
LB: loop body
LE: loop exit
PB: predicated region body
PF: predicated region fallthrough
CT: control target
= control target key end

     0   :  { %vm25_vm0 = vcmask 261120   ;;  %vm197_vm1 = vcmask 781312   ;;  %s322_s0 = inlined_call_operand.vmem [shape: f32[32,32], index: 0, kind: input, shape index: {}]   ;;  %s323_s3 = inlined_call_operand.vmem [shape: bf16[32,96], index: 3, kind: input, shape index: {}]   ;;  %s324_s1 = inlined_call_operand.vmem [shape: f32[1,32], index: 1, kind: input, shape index: {}]   ;;  %s325_s2 = inlined_call_operand.vmem [shape: f32[1,32], index: 2, kind: input, shape index: {}]   ;;  %s326_s4 = inlined_call_operand.vmem [shape: f32[1,96], index: 4, kind: input, shape index: {}]   ;;  %s327_s5 = inlined_call_operand.vmem [shape: bf16[32,96], index: 5, kind: output, shape index: {}]  }
   0x1   :  { %v21_v0 = vld [vmem:[%s322_s0] sm:$0xff]  ;;  %v23_v1 = vld [vmem:[%s322_s0 + $0x10] sm:$0xff]  ;;  %v22_v2 = vld [vmem:[%s322_s0 + $0x8] sm:$0xff] }
   0x2   :  { %v26_v3 = vsel %vm25_vm0, %v21_v0, 0.0  ;;  %v32_v4 = vsel %vm25_vm0, %v23_v1, 0.0  ;;  %v24_v5 = vld [vmem:[%s322_s0 + $0x18] sm:$0xff]  ;;  %v29_v6 = vsel %vm25_vm0, %v22_v2, 0.0  ;;  %v233_v28 = vld [vmem:[%s323_s3] sm:$0xff]   ;;  %v234_v29 = vld [vmem:[%s323_s3 + $0x8] sm:$0xff]  }
   0x3   :  { %27 = vadd.xlane.f32.xlu0 %v26_v3  ;;  %33 = vadd.xlane.f32.xlu1 %v32_v4  ;;  %v35_v7 = vsel %vm25_vm0, %v24_v5, 0.0  ;;  %v206_v44 = vld [vmem:[%s324_s1] ss:$0 sm:$0xff] }
   0x4   :  { %225 = vmatprep.subr.bf16.mxu0 %v233_v28  ;;  %v207_v50 = vld [vmem:[%s325_s2] ss:$0 sm:$0xff] }
   0x5   :  { %226 = vmatpush3.bf16.msra.mxu0 %v233_v28  ;;  %v208_v62 = vld [vmem:[%s326_s4] ss:$0 sm:$0xff] }
   0x6   :  { %227 = vmatprep.subr.bf16.mxu0 %v234_v29 }
   0x7   :  { %30 = vadd.xlane.f32.xlu0 %v29_v6  ;;  %36 = vadd.xlane.f32.xlu1 %v35_v7 }
   0x9   :  { %228 = vmatpush3.bf16.msra.mxu0 %v234_v29 }
  0x90   :  { %v28_v8 = vpop.xlane.xlu0 %27  ;;  %v34_v9 = vpop.xlane.xlu1 %33 }
  0x91   :  { %v39_v10 = vmul.f32 0.03125, %v28_v8  ;;  %v41_v11 = vmul.f32 0.03125, %v34_v9 }
  0x93   :  { %v43_v12 = vsub.f32 %v21_v0, %v39_v10  ;;  %v45_v13 = vsub.f32 %v23_v1, %v41_v11 }
  0x94   :  { %v31_v14 = vpop.xlane.xlu0 %30  ;;  %v37_v15 = vpop.xlane.xlu1 %36 }
  0x95   :  { %v40_v16 = vmul.f32 0.03125, %v31_v14  ;;  %v42_v17 = vmul.f32 0.03125, %v37_v15  ;;  %v47_v18 = vmul.f32 %v43_v12, %v43_v12  ;;  %v49_v19 = vmul.f32 %v45_v13, %v45_v13 }
  0x97   :  { %v44_v20 = vsub.f32 %v22_v2, %v40_v16  ;;  %v46_v21 = vsub.f32 %v24_v5, %v42_v17  ;;  %v51_v22 = vsel %vm25_vm0, %v47_v18, 0.0  ;;  %v57_v23 = vsel %vm25_vm0, %v49_v19, 0.0 }
  0x98   :  { %52 = vadd.xlane.f32.xlu0 %v51_v22 }
  0x99   :  { %v48_v24 = vmul.f32 %v44_v20, %v44_v20  ;;  %v50_v25 = vmul.f32 %v46_v21, %v46_v21 }
  0x9b   :  { %v54_v26 = vsel %vm25_vm0, %v48_v24, 0.0  ;;  %v60_v27 = vsel %vm25_vm0, %v50_v25, 0.0 }
  0x9c   :  { %58 = vadd.xlane.f32.xlu0 %v57_v23  ;;  %55 = vadd.xlane.f32.xlu1 %v54_v26 }
  0xa0   :  { %61 = vadd.xlane.f32.xlu1 %v60_v27 }
 0x125   :  { %v53_v30 = vpop.xlane.xlu0 %52 }
 0x126   :  { %v63_v31 = vmul.f32 0.03125, %v53_v30 }
 0x128   :  { %v67_v32 = vadd.f32 1e-05, %v63_v31 }
 0x129   :  { %v56_v33 = vpop.xlane.xlu1 %55  ;;  %v59_v34 = vpop.xlane.xlu0 %58 }
 0x12a   :  { %235 = vrsqrt.f32 %v67_v32  ;;  %v64_v35 = vmul.f32 0.03125, %v56_v33  ;;  %v65_v36 = vmul.f32 0.03125, %v59_v34 }
 0x12c   :  { %v68_v37 = vadd.f32 1e-05, %v64_v35  ;;  %v69_v38 = vadd.f32 1e-05, %v65_v36 }
 0x12d   :  { %v62_v39 = vpop.xlane.xlu1 %61 }
 0x12e   :  { %237 = vrsqrt.f32 %v68_v37  ;;  %v66_v40 = vmul.f32 0.03125, %v62_v39 }
 0x12f   :  { %239 = vrsqrt.f32 %v69_v38 }
 0x130   :  { %v70_v41 = vadd.f32 1e-05, %v66_v40 }
 0x132   :  { %241 = vrsqrt.f32 %v70_v41 }
 0x134   :  { %v236_v42 = vpop.eup %235 }
 0x135   :  { %v75_v43 = vmul.f32 %v236_v42, %v43_v12 }
 0x137   :  { %v86_v48 = vmul.f32 %v206_v44, %v75_v43 }
 0x138   :  { %v238_v45 = vpop.eup %237 }
 0x139   :  { %v240_v46 = vpop.eup %239  ;;  %v76_v47 = vmul.f32 %v238_v45, %v44_v20  ;;  %v97_v54 = vadd.f32 %v207_v50, %v86_v48 }
 0x13a   :  { %v77_v49 = vmul.f32 %v240_v46, %v45_v13 }
 0x13b   :  { %v87_v51 = vmul.f32 %v206_v44, %v76_v47 }
 0x13c   :  { %v242_v52 = vpop.eup %241  ;;  %v88_v56 = vmul.f32 %v206_v44, %v77_v49 }
 0x13d   :  { %v78_v53 = vmul.f32 %v242_v52, %v46_v21  ;;  %v98_v55 = vadd.f32 %v207_v50, %v87_v51 }
 0x13e   :  { %v99_v59 = vadd.f32 %v207_v50, %v88_v56 }
 0x13f   :  { %v101_v57 = vpack.c.bf16 %v98_v55, %v97_v54  ;;  %v89_v58 = vmul.f32 %v206_v44, %v78_v53 }
 0x141   :  { %229 = vmatprep.mubr.msk.bf16.mxu0 %vm25_vm0, %v101_v57  ;;  %v100_v60 = vadd.f32 %v207_v50, %v89_v58 }
 0x143   :  { %v102_v61 = vpack.c.bf16 %v100_v60, %v99_v59 }
 0x145   :  { %230 = vmatmul.mubr.msk.bf16.vlgmr.msra.gmra.mrb[0].mxu0 %vm25_vm0, %v102_v61 }
 0x218   :  { %v231_v63 = vpop.f32.mrb[0].mxu0 }
 0x219   :  { %v175_v0 = vadd.f32 %v231_v63, %v208_v62  ;;  %v166_v1 = vpop.f32.mrb[1].mxu0 }
 0x21a   :  { %v167_v2 = vadd.f32 %v208_v62, %v166_v1  ;;  %v232_v3 = vpop.f32.mrb[2].mxu0 }
 0x21b   :  { %v219_v4 = vpack.c.bf16 %v175_v0, %v175_v0  ;;  %v178_v5 = vadd.f32 %v232_v3, %v208_v62  ;;  %v169_v6 = vpop.f32.mrb[3].mxu0 }
 0x21c   :  { %v217_v7 = vpack.c.bf16 %v167_v2, %v167_v2  ;;  %v170_v8 = vadd.f32 %v208_v62, %v169_v6 }
 0x21d   :  { %200 = vst.msk [vmem:[%s327_s5 + $0x8] sm:$0xf] %vm197_vm1, %v219_v4  ;;  %v220_v9 = vpack.c.bf16 %v178_v5, %v178_v5 }
 0x21e   :  { %198 = vst.msk [vmem:[%s327_s5] sm:$0xf] %vm197_vm1, %v217_v7  ;;  %v218_v10 = vpack.c.bf16 %v170_v8, %v170_v8 }
 0x21f   :  { %201 = vst.msk [vmem:[%s327_s5 + $0xc] sm:$0xf] %vm197_vm1, %v220_v9 }
 0x220   :  { %199 = vst.msk [vmem:[%s327_s5 + $0x4] sm:$0xf] %vm197_vm1, %v218_v10 }

// kernel: roformer_forward.7
= control target key start
LH: loop header
LB: loop body
LE: loop exit
PB: predicated region body
PF: predicated region fallthrough
CT: control target
= control target key end

     0   :  { %s1878_s24 = smov 0   ;;  %s2338_s0 = inlined_call_operand.vmem [shape: bf16[2,16,96], index: 0, kind: input, shape index: {}]   ;;  %s2339_s1 = inlined_call_operand.vmem [shape: f32[16,8], index: 1, kind: input, shape index: {}]   ;;  %s2340_s2 = inlined_call_operand.vmem [shape: f32[16,8], index: 2, kind: input, shape index: {}]   ;;  %s2341_s3 = inlined_call_operand.vmem [shape: f32[16,8], index: 3, kind: input, shape index: {}]   ;;  %s2342_s4 = inlined_call_operand.vmem [shape: f32[2,16,32], index: 4, kind: input, shape index: {}]   ;;  %s2343_s5 = inlined_call_operand.vmem [shape: bf16[32,32], index: 5, kind: input, shape index: {}]   ;;  %s2344_s6 = inlined_call_operand.vmem [shape: f32[1,32], index: 6, kind: input, shape index: {}]   ;;  %s2345_s7 = inlined_call_operand.vmem [shape: f32[2,16,32], index: 7, kind: output, shape index: {}]  }
   0x1 LB: > { %s1488_s25 = sadd.s32 4294967295, %s1801_s24   ;;  %p1492_p0 = scmp.ge.s32.totalorder %s1801_s24, 1  ;;  %s1801_s24 = sphi %s1878_s24, %s17_s24  }
   0x2   : > { %p247_p1 = scmp.lt.s32.totalorder %s1801_s24, 3 }
   0x4   : > { %p248_p2 = pnand %p1492_p0, %p247_p1 }
   0x5   : > { %p284_p3 = scmp.lt.s32.totalorder (!%p248_p2), %s1488_s25, 1  ;;  %s1803_s30 = smov (!%p248_p2), 89   ;;  %v1911_v4 = vld [vmem:[%s2339_s1 + $0x8] sm:$0xff] (!%p248_p2)  ;;  %v1916_v5 = vld [vmem:[%s2339_s1] sm:$0xff] (!%p248_p2)  ;;  %vm335_vm0 = vcmask (!%p248_p2), 56320   ;;  %vm350_vm1 = vcmask (!%p248_p2), 7168  }
   0x6   : > { %251 = sbr.rel (%p248_p2) target bundleno = 2440 (0x988), region = 48  ;;  %s1804_s8 = smov (!%p248_p2), 95   ;;  %v1941_v18 = vld [vmem:[%s2340_s2 + $0x8] sm:$0xff] (!%p248_p2)  ;;  %v1946_v19 = vld [vmem:[%s2340_s2] sm:$0xff] (!%p248_p2)  ;;  %v1817_v32 = vmov (!%p248_p2), 0.0   ;;  %vm1818_vm2 = vmmov (!%p248_p2), 0  }
   0x7   : > { %s1805_s9 = smov (!%p248_p2), 97   ;;  %s1806_s10 = smov (!%p248_p2), 103   ;;  %v1963_v24 = vld [vmem:[%s2341_s3 + $0x8] sm:$0xff] (!%p248_p2)  ;;  %v1973_v26 = vld [vmem:[%s2341_s3] sm:$0xff] (!%p248_p2)  ;;  %1542 = vmatprep.subr.bf16.mxu0 (!%p248_p2), %v1817_v32  ;;  %1554 = vmatprep.subr.bf16.mxu1 (!%p248_p2), %v1817_v32  ;;  %vm432_vm3 = vcmask (!%p248_p2), 64512   ;;  %vm480_vm4 = vcmask (!%p248_p2), 130048  }
   0x8   : > { %s1807_s15 = smov (!%p248_p2), 32   ;;  %s1809_s27 = smov (!%p248_p2), 127   ;;  %1544 = vmatprep.mubr.msk.bf16.mxu0 (!%p248_p2), %vm1818_vm2, %v1817_v32  ;;  %1556 = vmatprep.mubr.msk.bf16.mxu1 (!%p248_p2), %vm1818_vm2, %v1817_v32  ;;  %vm561_vm5 = vcmask (!%p248_p2), 1043456   ;;  %vm1418_vm6 = vcmask (!%p248_p2), 261120  }
   0x9   : > { %s1810_s28 = smov (!%p248_p2), 1   ;;  %s1816_s11 = smov (!%p248_p2), 40  }
   0xa   : > { %s1819_s12 = smov (!%p248_p2), 96   ;;  %s1820_s13 = smov (!%p248_p2), 81  }
   0xb   : > { %s1821_s14 = smov (!%p248_p2), 113   ;;  %s1823_s16 = smov (!%p248_p2), 105  }
   0xc   : > { %s1824_s17 = smov (!%p248_p2), 8   ;;  %s1825_s18 = smov (!%p248_p2), 48  }
   0xd   : > { %s2355_s25 = smov (!%p284_p3, %s1488_s25), 1  ;;  %s1826_s19 = smov 16  }
   0xe   : > { %s1515_s26 = sshll.u32 %s2355_s25, 3  ;;  %s1827_s20 = smov 88  }
   0xf   : > { %s288_s29 = scalar_lea.vmem %s2338_s0, %s1515_s26  ;;  %s1808_s26 = smov 7  }
  0x10   : > { %v1892_v0 = vld [vmem:[%s288_s29] sm:$0xff]   ;;  %s1811_s29 = smov 121   ;;  %s1828_s21 = smov 120  }
  0x11   : > { %v1895_v1 = vunpack.c.l.bf16 %v1892_v0  ;;  %v1898_v2 = vunpack.c.h.bf16 %v1892_v0  ;;  %s1829_s22 = smov 64   ;;  %s1830_s23 = smov 112  }
  0x13   : > { %v1902_v3 = vpack.i.bf16 %v1898_v2, %v1895_v1  ;;  %v354_v50 = vmul.f32 %v1898_v2, %v1911_v4  ;;  %v353_v51 = vmul.f32 %v1895_v1, %v1916_v5 }
  0x15   : > { %1682 = vrot.lane.b32.xlu1 %v1902_v3, %s1803_s30  ;;  %1672 = vrot.lane.b32.xlu0 %v1902_v3, %s1804_s8  ;;  %s1812_s30 = smov 87   ;;  %s1813_s8 = smov 119  }
  0x19   : > { %1687 = vrot.lane.b32.xlu1 %v1902_v3, %s1805_s9  ;;  %1677 = vrot.lane.b32.xlu0 %v1902_v3, %s1806_s10  ;;  %s1814_s9 = smov 79   ;;  %s1815_s10 = smov 111  }
  0x1d   : > { %398 = vrot.lane.b32.xlu1 %v1911_v4, %s1807_s15  ;;  %396 = vrot.lane.b32.xlu0 %v1916_v5, %s1807_s15 }
  0x87   : > { %v1922_v6 = vpop.permute.xlu1 %1682  ;;  %v1924_v7 = vpop.permute.xlu0 %1672 }
  0x88   : > { %v1685_v8 = vunpack.i.h.bf16 %v1922_v6  ;;  %v1684_v9 = vunpack.i.l.bf16 %v1922_v6  ;;  %v1675_v10 = vunpack.i.h.bf16 %v1924_v7  ;;  %v1674_v11 = vunpack.i.l.bf16 %v1924_v7 }
  0x8b   : > { %v1930_v12 = vpop.permute.xlu1 %1687  ;;  %v1932_v13 = vpop.permute.xlu0 %1677 }
  0x8c   : > { %v2348_v14 = vunpack.i.h.bf16 %v1930_v12  ;;  %v2346_v15 = vunpack.i.l.bf16 %v1930_v12  ;;  %v1680_v16 = vunpack.i.h.bf16 %v1932_v13  ;;  %v1679_v17 = vunpack.i.l.bf16 %v1932_v13 }
  0x8e   : > { %v379_v20 = vsel %vm335_vm0, %v1675_v10, %v1680_v16  ;;  %v378_v21 = vsel %vm335_vm0, %v1674_v11, %v1679_v17  ;;  %v393_v25 = vsel %vm350_vm1, %v1685_v8, %v2348_v14  ;;  %v392_v27 = vsel %vm350_vm1, %v1684_v9, %v2346_v15 }
  0x8f   : > { %v405_v22 = vmul.f32 %v379_v20, %v1941_v18  ;;  %v404_v23 = vmul.f32 %v378_v21, %v1946_v19  ;;  %v417_v28 = vmul.f32 %v393_v25, %v1963_v24  ;;  %v416_v29 = vmul.f32 %v392_v27, %v1973_v26  ;;  %v399_v30 = vpop.permute.xlu1 %398  ;;  %v397_v31 = vpop.permute.xlu0 %396 }
  0x90   : > { %v403_v35 = vmul.f32 %v399_v30, %v1898_v2  ;;  %v402_v36 = vmul.f32 %v397_v31, %v1895_v1 }
  0x91   : > { %410 = vrot.lane.b32.xlu1 %v405_v22, %s1807_s15  ;;  %408 = vrot.lane.b32.xlu0 %v404_v23, %s1807_s15 }
  0x95   : > { %422 = vrot.lane.b32.xlu1 %v417_v28, %s1807_s15  ;;  %420 = vrot.lane.b32.xlu0 %v416_v29, %s1807_s15  ;;  %s1822_s15 = smov 73  }
  0x99   : > { %1697 = vrot.lane.b32.xlu1 %v1902_v3, %s1808_s26  ;;  %1692 = vrot.lane.b32.xlu0 %v1902_v3, %s1809_s27  ;;  %s1831_s26 = smov 80   ;;  %s1832_s27 = smov 65  }
  0x9d   : > { %1707 = vrot.lane.b32.xlu1 %v1902_v3, %s1810_s28  ;;  %1702 = vrot.lane.b32.xlu0 %v1902_v3, %s1811_s29  ;;  %s1833_s28 = smov 71  }
  0xa1   : > { %1712 = vrot.lane.b32.xlu1 %v1902_v3, %s1812_s30 }
  0xa5   : > { %1722 = vrot.lane.b32.xlu1 %v1902_v3, %s1813_s8  ;;  %s1834_s8 = smov 56  }
  0xa9   : > { %1732 = vrot.lane.b32.xlu1 %v1902_v3, %s1814_s9  ;;  %s1835_s9 = smov 24  }
  0xad   : > { %1742 = vrot.lane.b32.xlu1 %v1902_v3, %s1815_s10  ;;  %s1836_s10 = smov 72  }
  0xb1   : > { %675 = vrot.lane.b32.xlu1 %v1916_v5, %s1816_s11 }
 0x103   : > { %v411_v33 = vpop.permute.xlu1 %410  ;;  %v409_v34 = vpop.permute.xlu0 %408 }
 0x104   : > { %v415_v37 = vadd.f32 %v411_v33, %v403_v35  ;;  %v414_v38 = vadd.f32 %v409_v34, %v402_v36 }
 0x107   : > { %v423_v39 = vpop.permute.xlu1 %422  ;;  %v421_v40 = vpop.permute.xlu0 %420 }
 0x108   : > { %v427_v41 = vadd.f32 %v423_v39, %v415_v37  ;;  %v426_v42 = vadd.f32 %v421_v40, %v414_v38 }
 0x10a   : > { %v428_v43 = vpack.c.bf16 %v427_v41, %v426_v42 }
 0x10b   : > { %v1698_v44 = vpop.permute.xlu1 %1697  ;;  %v2004_v45 = vpop.permute.xlu0 %1692 }
 0x10c   : > { %v1700_v46 = vunpack.i.h.bf16 %v1698_v44  ;;  %v1699_v47 = vunpack.i.l.bf16 %v1698_v44  ;;  %430 = vrot.lane.b32.xlu0 %v428_v43, %s1819_s12  ;;  %v1695_v48 = vunpack.i.h.bf16 %v2004_v45  ;;  %v1694_v49 = vunpack.i.l.bf16 %v2004_v45  ;;  %s1837_s12 = smov 104  }
 0x10e   : > { %v337_v52 = vsel %vm335_vm0, %v1695_v48, %v1700_v46  ;;  %v336_v53 = vsel %vm335_vm0, %v1694_v49, %v1699_v47 }
 0x10f   : > { %v1708_v54 = vpop.permute.xlu1 %1707  ;;  %v356_v55 = vmul.f32 %v337_v52, %v1941_v18  ;;  %v355_v56 = vmul.f32 %v336_v53, %v1946_v19  ;;  %v2020_v57 = vpop.permute.xlu0 %1702 }
 0x110   : > { %v1710_v58 = vunpack.i.h.bf16 %v1708_v54  ;;  %v1709_v59 = vunpack.i.l.bf16 %v1708_v54  ;;  %1717 = vrot.lane.b32.xlu0 %v1902_v3, %s1820_s13  ;;  %v1705_v60 = vunpack.i.h.bf16 %v2020_v57  ;;  %v1704_v61 = vunpack.i.l.bf16 %v2020_v57 }
 0x111   : > { %v358_v62 = vadd.f32 %v356_v55, %v354_v50  ;;  %v357_v63 = vadd.f32 %v355_v56, %v353_v51 }
 0x112   : > { %v352_v20 = vsel %vm350_vm1, %v1705_v60, %v1710_v58  ;;  %v351_v21 = vsel %vm350_vm1, %v1704_v61, %v1709_v59 }
 0x113   : > { %v2031_v22 = vpop.permute.xlu1 %1712  ;;  %v360_v23 = vmul.f32 %v352_v20, %v1963_v24  ;;  %v359_v25 = vmul.f32 %v351_v21, %v1973_v26 }
 0x114   : > { %v1714_v27 = vunpack.i.l.bf16 %v2031_v22  ;;  %1727 = vrot.lane.b32.xlu0 %v1902_v3, %s1821_s14  ;;  %v1715_v36 = vunpack.i.h.bf16 %v2031_v22 }
 0x115   : > { %v361_v28 = vadd.f32 %v359_v25, %v357_v63  ;;  %v362_v29 = vadd.f32 %v360_v23, %v358_v62 }
 0x116   : > { %v665_v30 = vsel %vm335_vm0, %v1714_v27, %v1674_v11  ;;  %v666_v11 = vsel %vm335_vm0, %v1715_v36, %v1675_v10 }
 0x117   : > { %v683_v31 = vmul.f32 %v665_v30, %v1946_v19  ;;  %v363_v33 = vmul.f32 0.35355338, %v361_v28  ;;  %v364_v34 = vmul.f32 0.35355338, %v362_v29  ;;  %v684_v37 = vmul.f32 %v666_v11, %v1941_v18  ;;  %v1723_v51 = vpop.permute.xlu1 %1722 }
 0x118   : > { %1737 = vrot.lane.b32.xlu0 %v1902_v3, %s1822_s15  ;;  %v1724_v52 = vunpack.i.l.bf16 %v1723_v51  ;;  %v1725_v53 = vunpack.i.h.bf16 %v1723_v51 }
 0x119   : > { %687 = vrot.lane.b32.xlu1 %v683_v31, %s1816_s11  ;;  %v365_v35 = vpack.c.bf16 %v364_v34, %v363_v33 }
 0x11a   : > { %v614_v54 = vsel %vm335_vm0, %v1724_v52, %v1694_v49  ;;  %v615_v58 = vsel %vm335_vm0, %v1725_v53, %v1695_v48 }
 0x11b   : > { %v632_v56 = vmul.f32 %v614_v54, %v1946_v19  ;;  %v633_v62 = vmul.f32 %v615_v58, %v1941_v18  ;;  %v2092_v63 = vpop.permute.xlu1 %1732 }
 0x11c   : > { %1747 = vrot.lane.b32.xlu0 %v1902_v3, %s1823_s16  ;;  %v1734_v21 = vunpack.i.l.bf16 %v2092_v63  ;;  %v1735_v45 = vunpack.i.h.bf16 %v2092_v63 }
 0x11f   : > { %v2129_v31 = vpop.permute.xlu1 %1742 }
 0x120   : > { %677 = vrot.lane.b32.xlu0 %v1911_v4, %s1816_s11 }
 0x124   : > { %689 = vrot.lane.b32.xlu0 %v684_v37, %s1816_s11 }
 0x17e   : > { %v431_v38 = vpop.permute.xlu0 %430 }
 0x17f   : > { %v437_v39 = vsel %vm432_vm3, %v431_v38, 0  ;;  %v1745_v38 = vunpack.i.h.bf16 %v2129_v31 }
 0x180   : > { %1543 = vmatpush3.bf16.xpose.msra.mxu0 %v437_v39 }
 0x181   : > { %1548 = vmatprep.subr.bf16.mxu0 %v1817_v32 }
 0x182   : > { %v1718_v40 = vpop.permute.xlu0 %1717 }
 0x183   : > { %v1720_v7 = vunpack.i.h.bf16 %v1718_v40  ;;  %v1719_v41 = vunpack.i.l.bf16 %v1718_v40  ;;  %v889_v40 = vsel %vm335_vm0, %v1745_v38, %v1725_v53 }
 0x185   : > { %v674_v10 = vsel %vm350_vm1, %v1720_v7, %v1685_v8  ;;  %v673_v42 = vsel %vm350_vm1, %v1719_v41, %v1684_v9 }
 0x186   : > { %v696_v43 = vmul.f32 %v674_v10, %v1963_v24  ;;  %v695_v44 = vmul.f32 %v673_v42, %v1973_v26  ;;  %v1728_v55 = vpop.permute.xlu0 %1727  ;;  %v907_v42 = vmul.f32 %v889_v40, %v1941_v18 }
 0x187   : > { %1545 = vmatmul.mubr.msk.bf16.vlgmr.msra.gmra.mrb[0].mxu0 %vm432_vm3, %v365_v35  ;;  %v1729_v59 = vunpack.i.l.bf16 %v1728_v55  ;;  %v1730_v20 = vunpack.i.h.bf16 %v1728_v55  ;;  %v1744_v35 = vunpack.i.l.bf16 %v2129_v31  ;;  %v2353_v31 = vunpack.i.l.bf16 %v1930_v12 }
 0x188   : > { %701 = vrot.lane.b32.xlu0 %v696_v43, %s1816_s11  ;;  %699 = vrot.lane.b32.xlu1 %v695_v44, %s1816_s11 }
 0x189   : > { %1550 = vmatprep.mubr.msk.bf16.mxu0 %vm1818_vm2, %v1817_v32  ;;  %v622_v49 = vsel %vm350_vm1, %v1729_v59, %v1704_v61  ;;  %v623_v25 = vsel %vm350_vm1, %v1730_v20, %v1705_v60  ;;  %v939_v61 = vsel %vm335_vm0, %v1734_v21, %v1714_v27  ;;  %v940_v60 = vsel %vm335_vm0, %v1735_v45, %v1715_v36 }
 0x18a   : > { %v2102_v48 = vpop.permute.xlu0 %1737  ;;  %v644_v23 = vmul.f32 %v622_v49, %v1973_v26  ;;  %v645_v29 = vmul.f32 %v623_v25, %v1963_v24  ;;  %v957_v57 = vmul.f32 %v939_v61, %v1946_v19  ;;  %v958_v33 = vmul.f32 %v940_v60, %v1941_v18 }
 0x18b   : > { %v1739_v28 = vunpack.i.l.bf16 %v2102_v48  ;;  %v1740_v30 = vunpack.i.h.bf16 %v2102_v48  ;;  %v888_v37 = vsel %vm335_vm0, %v1744_v35, %v1724_v52 }
 0x18c   : > { %624 = vrot.lane.b32.xlu1 %v1916_v5, %s1824_s17  ;;  %626 = vrot.lane.b32.xlu0 %v1911_v4, %s1824_s17 }
 0x18d   : > { %v947_v27 = vsel %vm350_vm1, %v1739_v28, %v1719_v41  ;;  %v948_v22 = vsel %vm350_vm1, %v1740_v30, %v1720_v7  ;;  %v906_v7 = vmul.f32 %v888_v37, %v1946_v19 }
 0x18e   : > { %v969_v34 = vmul.f32 %v947_v27, %v1973_v26  ;;  %v2139_v36 = vpop.permute.xlu0 %1747  ;;  %v970_v11 = vmul.f32 %v948_v22, %v1963_v24 }
 0x18f   : > { %v2347_v39 = vunpack.i.l.bf16 %v2139_v36  ;;  %v2349_v10 = vunpack.i.h.bf16 %v2139_v36 }
 0x191   : > { %v896_v41 = vsel %vm350_vm1, %v2347_v39, %v1729_v59  ;;  %v897_v43 = vsel %vm350_vm1, %v2349_v10, %v1730_v20 }
 0x192   : > { %v918_v44 = vmul.f32 %v896_v41, %v1973_v26 }
 0x25a   : > { %v2075_v6 = vpop.f32.mrb[0].mxu0 }
 0x25b   : > { %v1546_v8 = vpop.f32.mrb[1].mxu0  ;;  %v481_v9 = vsel %vm480_vm4, %v2075_v6, -inf }
 0x25c   : > { %482 = vmax.xlane.f32.xlu0 %v481_v9  ;;  %v2079_v46 = vpop.f32.mrb[2].mxu0  ;;  %v919_v8 = vmul.f32 %v897_v43, %v1963_v24  ;;  %v678_v9 = vpop.permute.xlu0 %677 }
 0x25d   : > { %v1547_v47 = vpop.f32.mrb[3].mxu0  ;;  %v484_v50 = vsel %vm480_vm4, %v2079_v46, -inf  ;;  %v682_v40 = vmul.f32 %v678_v9, %v1898_v2 }
 0x25e   : > { %485 = vmax.xlane.f32.xlu1 %v484_v50  ;;  %v676_v47 = vpop.permute.xlu1 %675 }
 0x25f   : > { %v681_v37 = vmul.f32 %v676_v47, %v1895_v1 }
 0x260   : > { %v690_v50 = vpop.permute.xlu0 %689 }
 0x262   : > { %v688_v51 = vpop.permute.xlu1 %687 }
 0x264   : > { %v702_v52 = vpop.permute.xlu0 %701 }
 0x266   : > { %v700_v53 = vpop.permute.xlu1 %699 }
 0x268   : > { %v627_v54 = vpop.permute.xlu0 %626 }
 0x26a   : > { %v625_v55 = vpop.permute.xlu1 %624 }
 0x26b   : > { %v630_v41 = vmul.f32 %v625_v55, %v1895_v1 }
 0x26f   : > { %636 = vrot.lane.b32.xlu1 %v632_v56, %s1824_s17 }
 0x272   : > { %638 = vrot.lane.b32.xlu0 %v633_v62, %s1824_s17 }
 0x273   : > { %949 = vrot.lane.b32.xlu1 %v1916_v5, %s1825_s18 }
 0x276   : > { %951 = vrot.lane.b32.xlu0 %v1911_v4, %s1825_s18 }
 0x277   : > { %648 = vrot.lane.b32.xlu1 %v644_v23, %s1824_s17 }
 0x27a   : > { %650 = vrot.lane.b32.xlu0 %v645_v29, %s1824_s17 }
 0x27b   : > { %961 = vrot.lane.b32.xlu1 %v957_v57, %s1825_s18 }
 0x27e   : > { %963 = vrot.lane.b32.xlu0 %v958_v33, %s1825_s18 }
 0x27f   : > { %973 = vrot.lane.b32.xlu1 %v969_v34, %s1825_s18 }
 0x282   : > { %975 = vrot.lane.b32.xlu0 %v970_v11, %s1825_s18 }
 0x283   : > { %898 = vrot.lane.b32.xlu1 %v1916_v5, %s1826_s19 }
 0x286   : > { %900 = vrot.lane.b32.xlu0 %v1911_v4, %s1826_s19 }
 0x287   : > { %910 = vrot.lane.b32.xlu1 %v906_v7, %s1826_s19 }
 0x28a   : > { %912 = vrot.lane.b32.xlu0 %v907_v42, %s1826_s19 }
 0x28b   : > { %922 = vrot.lane.b32.xlu1 %v918_v44, %s1826_s19  ;;  %v693_v44 = vadd.f32 %v688_v51, %v681_v37 }
 0x28e   : > { %924 = vrot.lane.b32.xlu0 %v919_v8, %s1826_s19  ;;  %v694_v8 = vadd.f32 %v690_v50, %v682_v40 }
 0x2e9   : > { %v483_v56 = vpop.xlane.xlu0 %482 }
 0x2ea   : > { %v487_v58 = vsub.f32 %v2075_v6, %v483_v56  ;;  %v631_v56 = vmul.f32 %v627_v54, %v1898_v2 }
 0x2eb   : > { %v486_v59 = vpop.xlane.xlu1 %485 }
 0x2ec   : > { %v489_v62 = vmul.f32 1.442695, %v487_v58  ;;  %v488_v20 = vsub.f32 %v2079_v46, %v486_v59 }
 0x2ed   : > { %v639_v49 = vpop.permute.xlu0 %638 }
 0x2ee   : > { %1763 = vpow2.f32 %v489_v62  ;;  %v491_v23 = vmul.f32 1.442695, %v488_v20  ;;  %v706_v20 = vadd.f32 %v702_v52, %v694_v8 }
 0x2ef   : > { %v637_v25 = vpop.permute.xlu1 %636 }
 0x2f0   : > { %1765 = vpow2.f32 %v491_v23  ;;  %v642_v58 = vadd.f32 %v637_v25, %v630_v41  ;;  %v705_v23 = vadd.f32 %v700_v53, %v693_v44 }
 0x2f1   : > { %v952_v61 = vpop.permute.xlu0 %951 }
 0x2f2   : > { %v707_v14 = vpack.c.bf16 %v706_v20, %v705_v23  ;;  %v956_v52 = vmul.f32 %v952_v61, %v1898_v2 }
 0x2f3   : > { %v950_v29 = vpop.permute.xlu1 %949 }
 0x2f4   : > { %v955_v50 = vmul.f32 %v950_v29, %v1895_v1 }
 0x2f5   : > { %v651_v57 = vpop.permute.xlu0 %650 }
 0x2f7   : > { %v649_v60 = vpop.permute.xlu1 %648 }
 0x2f8   : > { %v2167_v27 = vpop.eup %1763  ;;  %v654_v47 = vadd.f32 %v649_v60, %v642_v58 }
 0x2f9   : > { %v964_v33 = vpop.permute.xlu0 %963  ;;  %v493_v34 = vsel %vm480_vm4, %v2167_v27, 0.0 }
 0x2fa   : > { %v2171_v6 = vpop.eup %1765  ;;  %494 = vadd.xlane.f32.xlu1 %v493_v34  ;;  %v643_v34 = vadd.f32 %v639_v49, %v631_v56  ;;  %v656_v10 = vmul.f32 0.35355338, %v654_v47 }
 0x2fb   : > { %v962_v22 = vpop.permute.xlu1 %961  ;;  %v496_v46 = vsel %vm480_vm4, %v2171_v6, 0.0 }
 0x2fc   : > { %497 = vadd.xlane.f32.xlu0 %v496_v46  ;;  %v655_v15 = vadd.f32 %v651_v57, %v643_v34  ;;  %v967_v37 = vadd.f32 %v962_v22, %v955_v50 }
 0x2fd   : > { %v976_v11 = vpop.permute.xlu0 %975 }
 0x2fe   : > { %v657_v54 = vmul.f32 0.35355338, %v655_v15 }
 0x2ff   : > { %v974_v7 = vpop.permute.xlu1 %973 }
 0x300   : > { %v658_v60 = vpack.c.bf16 %v657_v54, %v656_v10  ;;  %v979_v57 = vadd.f32 %v974_v7, %v967_v37 }
 0x301   : > { %v901_v42 = vpop.permute.xlu0 %900 }
 0x302   : > { %v905_v43 = vmul.f32 %v901_v42, %v1898_v2 }
 0x303   : > { %v899_v59 = vpop.permute.xlu1 %898 }
 0x304   : > { %v904_v62 = vmul.f32 %v899_v59, %v1895_v1 }
 0x305   : > { %v913_v46 = vpop.permute.xlu0 %912 }
 0x306   : > { %v917_v9 = vadd.f32 %v913_v46, %v905_v43 }
 0x307   : > { %v911_v39 = vpop.permute.xlu1 %910 }
 0x308   : > { %v916_v55 = vadd.f32 %v911_v39, %v904_v62  ;;  %v968_v39 = vadd.f32 %v964_v33, %v956_v52 }
 0x309   : > { %v925_v42 = vpop.permute.xlu0 %924 }
 0x30a   : > { %v929_v51 = vadd.f32 %v925_v42, %v917_v9  ;;  %v980_v43 = vadd.f32 %v976_v11, %v968_v39 }
 0x30b   : > { %712 = vrot.lane.b32.xlu1 %v707_v14, %s1827_s20  ;;  %v923_v25 = vpop.permute.xlu1 %922 }
 0x30c   : > { %v931_v53 = vmul.f32 0.35355338, %v929_v51  ;;  %v928_v49 = vadd.f32 %v923_v25, %v916_v55  ;;  %v981_v14 = vpack.c.bf16 %v980_v43, %v979_v57 }
 0x30e   : > { %v930_v40 = vmul.f32 0.35355338, %v928_v49 }
 0x30f   : > { %709 = vrot.lane.b32.xlu1 %v658_v60, %s1828_s21 }
 0x310   : > { %v932_v41 = vpack.c.bf16 %v931_v53, %v930_v40 }
 0x312   : > { %509 = vrot.lane.b32.xlu0 %v1892_v0, %s1829_s22 }
 0x313   : > { %983 = vrot.lane.b32.xlu1 %v932_v41, %s1830_s23 }
 0x316   : > { %986 = vrot.lane.b32.xlu0 %v981_v14, %s1831_s26 }
 0x317   : > { %1757 = vrot.lane.b32.xlu1 %v1902_v3, %s1832_s27 }
 0x31a   : > { %1752 = vrot.lane.b32.xlu0 %v1902_v3, %s1833_s28 }
 0x387   : > { %v495_v15 = vpop.xlane.xlu1 %494 }
 0x388   : > { %1767 = vrcp.f32 %v495_v15 }
 0x389   : > { %v498_v10 = vpop.xlane.xlu0 %497 }
 0x38a   : > { %1769 = vrcp.f32 %v498_v10 }
 0x38b   : > { %v713_v7 = vpop.permute.xlu1 %712 }
 0x38c   : > { %v718_v8 = vsel %vm432_vm3, %v713_v7, 0 }
 0x38d   : > { %v510_v61 = vpop.permute.xlu0 %509 }
 0x38e   : > { %1549 = vmatpush3.bf16.msra.mxu0 %v510_v61 }
 0x38f   : > { %1560 = vmatprep.subr.bf16.mxu0 %v1817_v32  ;;  %v710_v56 = vpop.permute.xlu1 %709 }
 0x391   : > { %v987_v3 = vpop.permute.xlu0 %986 }
 0x392   : > { %v1768_v29 = vpop.eup %1767  ;;  %v992_v58 = vsel %vm432_vm3, %v987_v3, 0 }
 0x393   : > { %v501_v22 = vmul.f32 %v1768_v29, %v2167_v27  ;;  %v984_v27 = vpop.permute.xlu1 %983  ;;  %v2351_v29 = vunpack.i.h.bf16 %v1930_v12 }
 0x394   : > { %v1770_v33 = vpop.eup %1769 }
 0x395   : > { %v502_v11 = vmul.f32 %v1770_v33, %v2171_v6  ;;  %v557_v6 = vld [vmem:[%s2343_s5] sm:$0xf]  ;;  %v1753_v49 = vpop.permute.xlu0 %1752 }
 0x396   : > { %v563_v59 = vsel %vm561_vm5, %v557_v6, 0  ;;  %v1755_v60 = vunpack.i.h.bf16 %v1753_v49  ;;  %v1754_v40 = vunpack.i.l.bf16 %v1753_v49 }
 0x397   : > { %v503_v44 = vpack.c.bf16 %v502_v11, %v501_v22  ;;  %1555 = vmatpush3.bf16.msra.mxu1 %v563_v59  ;;  %v1758_v37 = vpop.permute.xlu1 %1757 }
 0x398   : > { %1566 = vmatprep.subr.bf16.mxu1 %v1817_v32  ;;  %v1760_v39 = vunpack.i.h.bf16 %v1758_v37  ;;  %v1202_v57 = vsel %vm335_vm0, %v1755_v60, %v1735_v45  ;;  %v1759_v41 = vunpack.i.l.bf16 %v1758_v37  ;;  %v1201_v14 = vsel %vm335_vm0, %v1754_v40, %v1734_v21 }
 0x399   : > { %1551 = vmatmul.mubr.msk.bf16.vlgmr.msra.gmra.mrb[4].mxu0 %vm480_vm4, %v503_v44  ;;  %v1220_v43 = vmul.f32 %v1202_v57, %v1941_v18  ;;  %v1219_v45 = vmul.f32 %v1201_v14, %v1946_v19  ;;  %v1157_v21 = vsel %vm335_vm0, %v1680_v16, %v1745_v38 }
 0x39a   : > { %1561 = vmatpush3.bf16.xpose.msra.mxu0 %v718_v8  ;;  %1562 = vmatprep.mubr.msk.bf16.mxu0 %vm1818_vm2, %v1817_v32  ;;  %v1210_v15 = vsel %vm350_vm1, %v1760_v39, %v1740_v30  ;;  %v1209_v61 = vsel %vm350_vm1, %v1759_v41, %v1739_v28  ;;  %v1169_v48 = vmul.f32 %v1157_v21, %v1941_v18  ;;  %v2350_v30 = vunpack.i.h.bf16 %v2139_v36 }
 0x39b   : > { %1578 = vmatprep.subr.bf16.mxu0 %v1817_v32  ;;  %v1232_v10 = vmul.f32 %v1210_v15, %v1963_v24  ;;  %v1231_v63 = vmul.f32 %v1209_v61, %v1973_v26  ;;  %v1156_v28 = vsel %vm335_vm0, %v1679_v17, %v1744_v35  ;;  %v2352_v18 = vunpack.i.l.bf16 %v2139_v36 }
 0x39c   : > { %v1159_v33 = vsel %vm350_vm1, %v2351_v29, %v2350_v30  ;;  %v1168_v16 = vmul.f32 %v1156_v28, %v1946_v19 }
 0x39d   : > { %v1158_v13 = vsel %vm350_vm1, %v2353_v31, %v2352_v18 }
 0x3a1   : > { %1563 = vmatmul.mubr.msk.bf16.vlgmr.msra.gmra.mrb[8].mxu0 %vm432_vm3, %v710_v56 }
 0x3a2   : > { %1579 = vmatpush3.bf16.xpose.msra.mxu0 %v992_v58  ;;  %1580 = vmatprep.mubr.msk.bf16.mxu0 %vm1818_vm2, %v1817_v32 }
 0x3a3   : > { %1584 = vmatprep.subr.bf16.mxu0 %v1817_v32 }
 0x3a9   : > { %1581 = vmatmul.mubr.msk.bf16.vlgmr.msra.gmra.mrb[12].mxu0 %vm432_vm3, %v984_v27 }
 0x3aa   : > { %1586 = vmatprep.mubr.msk.bf16.mxu0 %vm1818_vm2, %v1817_v32 }
 0x46c   : > { %v549_v62 = vpop.f32.mrb[4].mxu0 }
 0x46d   : > { %v1552_v20 = vpop.f32.mrb[5].mxu0 }
 0x46e   : > { %v552_v23 = vpop.f32.mrb[6].mxu0 }
 0x46f   : > { %v556_v34 = vpack.c.bf16 %v552_v23, %v549_v62  ;;  %v1553_v47 = vpop.f32.mrb[7].mxu0 }
 0x471   : > { %1557 = vmatmul.mubr.msk.bf16.vlgmr.msra.gmra.mrb[0].mxu1 %vm432_vm3, %v556_v34 }
 0x472   : > { %1568 = vmatprep.mubr.msk.bf16.mxu1 %vm1818_vm2, %v1817_v32 }
 0x474   : > { %v2210_v46 = vpop.f32.mrb[8].mxu0 }
 0x475   : > { %v1564_v9 = vpop.f32.mrb[9].mxu0 }
 0x476   : > { %v2212_v55 = vpop.f32.mrb[10].mxu0 }
 0x477   : > { %v1565_v42 = vpop.f32.mrb[11].mxu0  ;;  %v764_v57 = vsel %vm480_vm4, %v2212_v55, -inf }
 0x47c   : > { %v1028_v50 = vpop.f32.mrb[12].mxu0 }
 0x47d   : > { %v1582_v51 = vpop.f32.mrb[13].mxu0  ;;  %v1035_v54 = vsel %vm480_vm4, %v1028_v50, -inf }
 0x47e   : > { %1036 = vmax.xlane.f32.xlu0 %v1035_v54  ;;  %v1031_v25 = vpop.f32.mrb[14].mxu0 }
 0x47f   : > { %v1583_v52 = vpop.f32.mrb[15].mxu0  ;;  %v1038_v53 = vsel %vm480_vm4, %v1031_v25, -inf }
 0x480   : > { %1039 = vmax.xlane.f32.xlu1 %v1038_v53 }
 0x491   : > { %1213 = vrot.lane.b32.xlu1 %v1911_v4, %s1834_s8 }
 0x494   : > { %1211 = vrot.lane.b32.xlu0 %v1916_v5, %s1834_s8 }
 0x495   : > { %1225 = vrot.lane.b32.xlu1 %v1220_v43, %s1834_s8 }
 0x498   : > { %1223 = vrot.lane.b32.xlu0 %v1219_v45, %s1834_s8 }
 0x499   : > { %1237 = vrot.lane.b32.xlu1 %v1232_v10, %s1834_s8 }
 0x49c   : > { %1235 = vrot.lane.b32.xlu0 %v1231_v63, %s1834_s8 }
 0x49d   : > { %1162 = vrot.lane.b32.xlu1 %v1911_v4, %s1835_s9  ;;  %v1181_v4 = vmul.f32 %v1159_v33, %v1963_v24 }
 0x4a0   : > { %1160 = vrot.lane.b32.xlu0 %v1916_v5, %s1835_s9  ;;  %v1180_v5 = vmul.f32 %v1158_v13, %v1973_v26 }
 0x4a1   : > { %1174 = vrot.lane.b32.xlu1 %v1169_v48, %s1835_s9 }
 0x4a4   : > { %1172 = vrot.lane.b32.xlu0 %v1168_v16, %s1835_s9 }
 0x4a5   : > { %1186 = vrot.lane.b32.xlu1 %v1181_v4, %s1835_s9 }
 0x4a8   : > { %1184 = vrot.lane.b32.xlu0 %v1180_v5, %s1835_s9 }
 0x50b   : > { %v1037_v17 = vpop.xlane.xlu0 %1036 }
 0x50c   : > { %v1041_v35 = vsub.f32 %v1028_v50, %v1037_v17 }
 0x50d   : > { %v1040_v38 = vpop.xlane.xlu1 %1039 }
 0x50e   : > { %v1043_v22 = vmul.f32 1.442695, %v1041_v35  ;;  %v1042_v11 = vsub.f32 %v1031_v25, %v1040_v38 }
 0x50f   : > { %v1212_v7 = vpop.permute.xlu0 %1211 }
 0x510   : > { %1771 = vpow2.f32 %v1043_v22  ;;  %v1045_v19 = vmul.f32 1.442695, %v1042_v11  ;;  %v1217_v20 = vmul.f32 %v1212_v7, %v1895_v1 }
 0x511   : > { %v1214_v24 = vpop.permute.xlu1 %1213 }
 0x512   : > { %1773 = vpow2.f32 %v1045_v19  ;;  %v1218_v59 = vmul.f32 %v1214_v24, %v1898_v2 }
 0x513   : > { %v1224_v36 = vpop.permute.xlu0 %1223 }
 0x514   : > { %v1229_v42 = vadd.f32 %v1224_v36, %v1217_v20 }
 0x515   : > { %v1226_v44 = vpop.permute.xlu1 %1225 }
 0x516   : > { %v1230_v47 = vadd.f32 %v1226_v44, %v1218_v59  ;;  %v832_v59 = vld [vmem:[%s2343_s5 + $0x4] sm:$0xf] }
 0x517   : > { %v1236_v12 = vpop.permute.xlu0 %1235 }
 0x518   : > { %v1241_v25 = vadd.f32 %v1236_v12, %v1229_v42 }
 0x519   : > { %v1238_v8 = vpop.permute.xlu1 %1237 }
 0x51a   : > { %v1772_v3 = vpop.eup %1771  ;;  %v1242_v50 = vadd.f32 %v1238_v8, %v1230_v47 }
 0x51b   : > { %v1047_v56 = vsel %vm480_vm4, %v1772_v3, 0.0  ;;  %v1161_v6 = vpop.permute.xlu0 %1160 }
 0x51c   : > { %v1774_v58 = vpop.eup %1773  ;;  %1048 = vadd.xlane.f32.xlu0 %v1047_v56  ;;  %v1166_v9 = vmul.f32 %v1161_v6, %v1895_v1  ;;  %v1243_v60 = vpack.c.bf16 %v1242_v50, %v1241_v25  ;;  %v761_v1 = vsel %vm480_vm4, %v2210_v46, -inf }
 0x51d   : > { %v1163_v26 = vpop.permute.xlu1 %1162  ;;  %v1050_v27 = vsel %vm480_vm4, %v1774_v58, 0.0 }
 0x51e   : > { %1051 = vadd.xlane.f32.xlu1 %v1050_v27  ;;  %v1167_v34 = vmul.f32 %v1163_v26, %v1898_v2 }
 0x51f   : > { %v1173_v23 = vpop.permute.xlu0 %1172 }
 0x520   : > { %v1178_v53 = vadd.f32 %v1173_v23, %v1166_v9 }
 0x521   : > { %v1175_v62 = vpop.permute.xlu1 %1174 }
 0x522   : > { %v1179_v54 = vadd.f32 %v1175_v62, %v1167_v34  ;;  %v837_v62 = vsel %vm561_vm5, %v832_v59, 0 }
 0x523   : > { %v1185_v52 = vpop.permute.xlu0 %1184 }
 0x524   : > { %v1190_v37 = vadd.f32 %v1185_v52, %v1178_v53  ;;  %v1106_v53 = vld [vmem:[%s2343_s5 + $0x8] sm:$0xf] }
 0x525   : > { %v1187_v51 = vpop.permute.xlu1 %1186 }
 0x526   : > { %v1191_v49 = vadd.f32 %v1187_v51, %v1179_v54  ;;  %v1192_v39 = vmul.f32 0.35355338, %v1190_v37 }
 0x528   : > { %v1193_v40 = vmul.f32 0.35355338, %v1191_v49 }
 0x52a   : > { %v1194_v2 = vpack.c.bf16 %v1193_v40, %v1192_v39  ;;  %v1111_v39 = vsel %vm561_vm5, %v1106_v53, 0 }
 0x52f   : > { %1248 = vrot.lane.b32.xlu1 %v1243_v60, %s1836_s10 }
 0x532   : > { %1058 = vrot.lane.b32.xlu0 %v1892_v0, %s1825_s18  ;;  %s1516_s18 = sshll.u32 %s2355_s25, 4 }
 0x533   : > { %s293_s21 = scalar_lea.vmem %s2342_s4, %s1516_s18  ;;  %s298_s28 = scalar_lea.vmem %s2345_s7, %s1516_s18 }
 0x536   : > { %1245 = vrot.lane.b32.xlu0 %v1194_v2, %s1837_s12 }
 0x553   : > { %762 = vmax.xlane.f32.xlu1 %v761_v1 }
 0x555   : > { %765 = vmax.xlane.f32.xlu0 %v764_v57 }
 0x5a9   : > { %v1049_v41 = vpop.xlane.xlu0 %1048 }
 0x5aa   : > { %1775 = vrcp.f32 %v1049_v41 }
 0x5ab   : > { %v1052_v43 = vpop.xlane.xlu1 %1051 }
 0x5ac   : > { %1777 = vrcp.f32 %v1052_v43  ;;  %v1368_v43 = vld [vmem:[%s2343_s5 + $0xc] sm:$0xf] }
 0x5ad   : > { %v1059_v14 = vpop.permute.xlu0 %1058 }
 0x5ae   : > { %1585 = vmatpush3.bf16.msra.mxu0 %v1059_v14 }
 0x5af   : > { %1596 = vmatprep.subr.bf16.mxu0 %v1817_v32  ;;  %v1249_v63 = vpop.permute.xlu1 %1248 }
 0x5b0   : > { %v1254_v48 = vsel %vm432_vm3, %v1249_v63, 0 }
 0x5b1   : > { %v1246_v28 = vpop.permute.xlu0 %1245 }
 0x5b4   : > { %v1776_v15 = vpop.eup %1775 }
 0x5b5   : > { %v1055_v10 = vmul.f32 %v1776_v15, %v1772_v3 }
 0x5b6   : > { %v1778_v45 = vpop.eup %1777 }
 0x5b7   : > { %v1056_v61 = vmul.f32 %v1778_v45, %v1774_v58 }
 0x5b9   : > { %v1057_v21 = vpack.c.bf16 %v1056_v61, %v1055_v10  ;;  %v1373_v10 = vsel %vm561_vm5, %v1368_v43, 0 }
 0x5bb   : > { %1587 = vmatmul.mubr.msk.bf16.vlgmr.msra.gmra.mrb[16].mxu0 %vm480_vm4, %v1057_v21 }
 0x5bc   : > { %1597 = vmatpush3.bf16.xpose.msra.mxu0 %v1254_v48  ;;  %1598 = vmatprep.mubr.msk.bf16.mxu0 %vm1818_vm2, %v1817_v32 }
 0x5c3   : > { %1599 = vmatmul.mubr.msk.bf16.vlgmr.msra.gmra.mrb[20].mxu0 %vm432_vm3, %v1246_v28 }
 0x5e0   : > { %v763_v30 = vpop.xlane.xlu1 %762 }
 0x5e1   : > { %v767_v29 = vsub.f32 %v2210_v46, %v763_v30  ;;  %v306_v30 = vld [vmem:[%s293_s21] sm:$0xff] }
 0x5e2   : > { %v766_v33 = vpop.xlane.xlu0 %765 }
 0x5e3   : > { %v769_v16 = vmul.f32 1.442695, %v767_v29  ;;  %v768_v4 = vsub.f32 %v2212_v55, %v766_v33  ;;  %v1499_v29 = vld [vmem:[%s2344_s6] ss:$0 sm:$0xff]  ;;  %v307_v33 = vld [vmem:[%s293_s21 + $0x8] sm:$0xff] }
 0x5e5   : > { %1779 = vpow2.f32 %v769_v16  ;;  %v771_v18 = vmul.f32 1.442695, %v768_v4  ;;  %v315_v16 = vadd.f32 %v1499_v29, %v306_v30 }
 0x5e7   : > { %1781 = vpow2.f32 %v771_v18 }
 0x5ef   : > { %v1780_v31 = vpop.eup %1779 }
 0x5f0   : > { %v773_v13 = vsel %vm480_vm4, %v1780_v31, 0.0 }
 0x5f1   : > { %v1782_v5 = vpop.eup %1781  ;;  %774 = vadd.xlane.f32.xlu0 %v773_v13 }
 0x5f2   : > { %v776_v17 = vsel %vm480_vm4, %v1782_v5, 0.0 }
 0x5f3   : > { %777 = vadd.xlane.f32.xlu1 %v776_v17 }
 0x607   : > { %784 = vrot.lane.b32.xlu0 %v1892_v0, %s1834_s8 }
 0x67e   : > { %v775_v35 = vpop.xlane.xlu0 %774 }
 0x67f   : > { %1783 = vrcp.f32 %v775_v35 }
 0x680   : > { %v778_v46 = vpop.xlane.xlu1 %777 }
 0x681   : > { %1785 = vrcp.f32 %v778_v46 }
 0x682   : > { %v785_v38 = vpop.permute.xlu0 %784 }
 0x683   : > { %1567 = vmatpush3.bf16.msra.mxu1 %v785_v38 }
 0x684   : > { %1572 = vmatprep.subr.bf16.mxu1 %v1817_v32 }
 0x689   : > { %v1784_v55 = vpop.eup %1783 }
 0x68a   : > { %v781_v11 = vmul.f32 %v1784_v55, %v1780_v31 }
 0x68b   : > { %v1786_v22 = vpop.eup %1785 }
 0x68c   : > { %v782_v7 = vmul.f32 %v1786_v22, %v1782_v5 }
 0x68e   : > { %v1098_v19 = vpop.f32.mrb[16].mxu0  ;;  %v783_v24 = vpack.c.bf16 %v782_v7, %v781_v11 }
 0x68f   : > { %v1588_v36 = vpop.f32.mrb[17].mxu0 }
 0x690   : > { %1569 = vmatmul.mubr.msk.bf16.vlgmr.msra.gmra.mrb[4].mxu1 %vm480_vm4, %v783_v24  ;;  %v1101_v44 = vpop.f32.mrb[18].mxu0 }
 0x691   : > { %v1105_v12 = vpack.c.bf16 %v1101_v44, %v1098_v19  ;;  %v1589_v8 = vpop.f32.mrb[19].mxu0  ;;  %1574 = vmatprep.mubr.msk.bf16.mxu1 %vm1818_vm2, %v1817_v32  ;;  %1573 = vmatpush3.bf16.msra.mxu1 %v837_v62 }
 0x692   : > { %1590 = vmatprep.subr.bf16.mxu1 %v1817_v32 }
 0x696   : > { %v1290_v3 = vpop.f32.mrb[20].mxu0 }
 0x697   : > { %v1600_v56 = vpop.f32.mrb[21].mxu0  ;;  %v1297_v58 = vsel %vm480_vm4, %v1290_v3, -inf }
 0x698   : > { %1298 = vmax.xlane.f32.xlu1 %v1297_v58  ;;  %v1293_v26 = vpop.f32.mrb[22].mxu0 }
 0x699   : > { %v1601_v27 = vpop.f32.mrb[23].mxu0  ;;  %v1300_v6 = vsel %vm480_vm4, %v1293_v26, -inf }
 0x69c   : > { %1301 = vmax.xlane.f32.xlu1 %v1300_v6 }
 0x725   : > { %v1299_v20 = vpop.xlane.xlu1 %1298 }
 0x726   : > { %v1303_v23 = vsub.f32 %v1290_v3, %v1299_v20 }
 0x728   : > { %v1305_v34 = vmul.f32 1.442695, %v1303_v23 }
 0x729   : > { %v1302_v47 = vpop.xlane.xlu1 %1301 }
 0x72a   : > { %1787 = vpow2.f32 %v1305_v34  ;;  %v1304_v9 = vsub.f32 %v1293_v26, %v1302_v47 }
 0x72c   : > { %v1307_v42 = vmul.f32 1.442695, %v1304_v9 }
 0x72e   : > { %1789 = vpow2.f32 %v1307_v42 }
 0x734   : > { %v1788_v50 = vpop.eup %1787 }
 0x735   : > { %v1309_v51 = vsel %vm480_vm4, %v1788_v50, 0.0 }
 0x736   : > { %1310 = vadd.xlane.f32.xlu1 %v1309_v51 }
 0x738   : > { %v1790_v54 = vpop.eup %1789 }
 0x739   : > { %v1312_v25 = vsel %vm480_vm4, %v1790_v54, 0.0 }
 0x73a   : > { %1313 = vadd.xlane.f32.xlu1 %v1312_v25 }
 0x74b   : > { %1320 = vrot.lane.b32.xlu1 %v1892_v0, %s1816_s11 }
 0x763   : > { %v824_v52 = vpop.f32.mrb[4].mxu1 }
 0x764   : > { %v1570_v49 = vpop.f32.mrb[5].mxu1 }
 0x765   : > { %v827_v60 = vpop.f32.mrb[6].mxu1 }
 0x766   : > { %v831_v37 = vpack.c.bf16 %v827_v60, %v824_v52  ;;  %v1571_v40 = vpop.f32.mrb[7].mxu1 }
 0x768   : > { %1575 = vmatmul.mubr.msk.bf16.vlgmr.msra.gmra.mrb[0].mxu1 %vm432_vm3, %v831_v37 }
 0x769   : > { %1591 = vmatpush3.bf16.msra.mxu1 %v1111_v39  ;;  %1592 = vmatprep.mubr.msk.bf16.mxu1 %vm1818_vm2, %v1817_v32 }
 0x76a   : > { %1602 = vmatprep.subr.bf16.mxu1 %v1817_v32 }
 0x774   : > { %1593 = vmatmul.mubr.msk.bf16.vlgmr.msra.gmra.mrb[0].mxu1 %vm432_vm3, %v1105_v12 }
 0x775   : > { %1604 = vmatprep.mubr.msk.bf16.mxu1 %vm1818_vm2, %v1817_v32 }
 0x7c3   : > { %v1311_v0 = vpop.xlane.xlu1 %1310 }
 0x7c4   : > { %1791 = vrcp.f32 %v1311_v0 }
 0x7c7   : > { %v1314_v2 = vpop.xlane.xlu1 %1313 }
 0x7c8   : > { %1793 = vrcp.f32 %v1314_v2 }
 0x7cb   : > { %v1321_v1 = vpop.permute.xlu1 %1320 }
 0x7cc   : > { %1603 = vmatpush3.bf16.msra.mxu1 %v1321_v1 }
 0x7cd   : > { %1608 = vmatprep.subr.bf16.mxu1 %v1817_v32 }
 0x7ce   : > { %v1792_v57 = vpop.eup %1791 }
 0x7cf   : > { %v1317_v14 = vmul.f32 %v1792_v57, %v1788_v50 }
 0x7d2   : > { %v1794_v41 = vpop.eup %1793 }
 0x7d3   : > { %v1318_v15 = vmul.f32 %v1794_v41, %v1790_v54 }
 0x7d5   : > { %v1319_v45 = vpack.c.bf16 %v1318_v15, %v1317_v14 }
 0x7d7   : > { %1605 = vmatmul.mubr.msk.bf16.vlgmr.msra.gmra.mrb[8].mxu1 %vm480_vm4, %v1319_v45 }
 0x7d8   : > { %1609 = vmatpush3.bf16.msra.mxu1 %v1373_v10  ;;  %1610 = vmatprep.mubr.msk.bf16.mxu1 %vm1818_vm2, %v1817_v32  ;;  %v316_v32 = vadd.f32 %v1499_v29, %v307_v33 }
 0x8aa   : > { %v1360_v61 = vpop.f32.mrb[8].mxu1 }
 0x8ab   : > { %v1606_v63 = vpop.f32.mrb[9].mxu1 }
 0x8ac   : > { %v1363_v21 = vpop.f32.mrb[10].mxu1 }
 0x8ad   : > { %v1367_v48 = vpack.c.bf16 %v1363_v21, %v1360_v61  ;;  %v1607_v28 = vpop.f32.mrb[11].mxu1 }
 0x8af   : > { %1611 = vmatmul.mubr.msk.bf16.vlgmr.msra.gmra.mrb[0].mxu1 %vm432_vm3, %v1367_v48 }
 0x982   : > { %v1409_v4 = vpop.f32.mrb[0].mxu1 }
 0x983   : > { %v1614_v18 = vadd.f32 %v1409_v4, %v315_v16  ;;  %v1612_v31 = vpop.f32.mrb[1].mxu1 }
 0x984   : > { %v1412_v13 = vpop.f32.mrb[2].mxu1 }
 0x985   : > { %1419 = vst.msk [vmem:[%s298_s28] sm:$0xff] %vm1418_vm6, %v1614_v18  ;;  %v1615_v5 = vadd.f32 %v1412_v13, %v316_v32  ;;  %v1613_v17 = vpop.f32.mrb[3].mxu1 }
 0x987   : > { %1420 = vst.msk [vmem:[%s298_s28 + $0x8] sm:$0xff] %vm1418_vm6, %v1615_v5 }
 0x988 PF: > { %s17_s24 = sadd.s32 1, %s1801_s24  }
 0x989   : > { %p14_p4 = scmp.ge.s32.totalorder %s17_s24, 4  }
 0x98b   :  { %16 = sbr.rel (!%p14_p4) target bundleno = 1 (0x1), region = 81 }

// kernel: roformer_forward.8
= control target key start
LH: loop header
LB: loop body
LE: loop exit
PB: predicated region body
PF: predicated region fallthrough
CT: control target
= control target key end

     0   :  { %vm37_vm0 = vcmask 261120   ;;  %vm350_vm5 = vcmask 523264   ;;  %s682_s0 = inlined_call_operand.vmem [shape: f32[32,32], index: 0, kind: input, shape index: {}]   ;;  %s683_s7 = inlined_call_operand.vmem [shape: f32[1,32], index: 7, kind: input, shape index: {}]   ;;  %s684_s8 = inlined_call_operand.vmem [shape: f32[1,32], index: 8, kind: input, shape index: {}]   ;;  %s685_s3 = inlined_call_operand.vmem [shape: bf16[32,64], index: 3, kind: input, shape index: {}]   ;;  %s686_s1 = inlined_call_operand.vmem [shape: f32[1,32], index: 1, kind: input, shape index: {}]   ;;  %s687_s2 = inlined_call_operand.vmem [shape: f32[1,32], index: 2, kind: input, shape index: {}]   ;;  %s688_s5 = inlined_call_operand.vmem [shape: bf16[64,32], index: 5, kind: input, shape index: {}]   ;;  %s689_s4 = inlined_call_operand.vmem [shape: f32[1,64], index: 4, kind: input, shape index: {}]   ;;  %s690_s6 = inlined_call_operand.vmem [shape: f32[1,32], index: 6, kind: input, shape index: {}]   ;;  %s691_s9 = inlined_call_operand.vmem [shape: f32[32,32], index: 9, kind: output, shape index: {}]  }
   0x1   :  { %v545_v0 = vld [vmem:[%s682_s0] sm:$0xff]  ;;  %v550_v1 = vld [vmem:[%s682_s0 + $0x10] sm:$0xff]  ;;  %v555_v2 = vld [vmem:[%s682_s0 + $0x8] sm:$0xff] }
   0x2   :  { %v38_v3 = vsel %vm37_vm0, %v545_v0, 0.0  ;;  %v44_v4 = vsel %vm37_vm0, %v550_v1, 0.0  ;;  %v564_v5 = vld [vmem:[%s682_s0 + $0x18] sm:$0xff]  ;;  %v41_v6 = vsel %vm37_vm0, %v555_v2, 0.0  ;;  %v462_v28 = vld [vmem:[%s685_s3] sm:$0xff]   ;;  %v463_v29 = vld [vmem:[%s685_s3 + $0x8] sm:$0xff]  }
   0x3   :  { %39 = vadd.xlane.f32.xlu0 %v38_v3  ;;  %45 = vadd.xlane.f32.xlu1 %v44_v4  ;;  %v47_v7 = vsel %vm37_vm0, %v564_v5, 0.0  ;;  %v418_v44 = vld [vmem:[%s686_s1] ss:$0 sm:$0xff]  ;;  %v465_v63 = vld [vmem:[%s688_s5 + $0x8] sm:$0xff]   ;;  %v466_v3 = vld [vmem:[%s688_s5 + $0x10] sm:$0xff]  }
   0x4   :  { %442 = vmatprep.subr.bf16.mxu0 %v462_v28  ;;  %v419_v50 = vld [vmem:[%s687_s2] ss:$0 sm:$0xff]  ;;  %v467_v4 = vld [vmem:[%s688_s5 + $0x18] sm:$0xff]  }
   0x5   :  { %443 = vmatpush3.bf16.msra.mxu0 %v462_v28  ;;  %v464_v62 = vld [vmem:[%s688_s5] sm:$0xff]  }
   0x6   :  { %444 = vmatprep.subr.bf16.mxu0 %v463_v29  ;;  %450 = vmatprep.subr.bf16.mxu1 %v464_v62 }
   0x7   :  { %42 = vadd.xlane.f32.xlu0 %v41_v6  ;;  %48 = vadd.xlane.f32.xlu1 %v47_v7  ;;  %v421_v6 = vld [vmem:[%s689_s4] ss:$0 sm:$0xff] }
   0x8   :  { %451 = vmatpush3.bf16.msra.mxu1 %v464_v62 }
   0x9   :  { %445 = vmatpush3.bf16.msra.mxu0 %v463_v29  ;;  %452 = vmatprep.subr.bf16.mxu1 %v465_v63 }
   0xc   :  { %453 = vmatpush3.bf16.msra.mxu1 %v465_v63 }
   0xd   :  { %454 = vmatprep.subr.bf16.mxu1 %v466_v3 }
  0x10   :  { %455 = vmatpush3.bf16.msra.mxu1 %v466_v3 }
  0x11   :  { %456 = vmatprep.subr.bf16.mxu1 %v467_v4 }
  0x14   :  { %457 = vmatpush3.bf16.msra.mxu1 %v467_v4 }
  0x90   :  { %v40_v8 = vpop.xlane.xlu0 %39  ;;  %v46_v9 = vpop.xlane.xlu1 %45 }
  0x91   :  { %v51_v10 = vmul.f32 0.03125, %v40_v8  ;;  %v53_v11 = vmul.f32 0.03125, %v46_v9 }
  0x93   :  { %v55_v12 = vsub.f32 %v545_v0, %v51_v10  ;;  %v57_v13 = vsub.f32 %v550_v1, %v53_v11 }
  0x94   :  { %v43_v14 = vpop.xlane.xlu0 %42  ;;  %v49_v15 = vpop.xlane.xlu1 %48 }
  0x95   :  { %v52_v16 = vmul.f32 0.03125, %v43_v14  ;;  %v54_v17 = vmul.f32 0.03125, %v49_v15  ;;  %v59_v18 = vmul.f32 %v55_v12, %v55_v12  ;;  %v61_v19 = vmul.f32 %v57_v13, %v57_v13 }
  0x97   :  { %v56_v20 = vsub.f32 %v555_v2, %v52_v16  ;;  %v58_v21 = vsub.f32 %v564_v5, %v54_v17  ;;  %v63_v22 = vsel %vm37_vm0, %v59_v18, 0.0  ;;  %v69_v23 = vsel %vm37_vm0, %v61_v19, 0.0 }
  0x98   :  { %64 = vadd.xlane.f32.xlu0 %v63_v22 }
  0x99   :  { %v60_v24 = vmul.f32 %v56_v20, %v56_v20  ;;  %v62_v25 = vmul.f32 %v58_v21, %v58_v21 }
  0x9b   :  { %v66_v26 = vsel %vm37_vm0, %v60_v24, 0.0  ;;  %v72_v27 = vsel %vm37_vm0, %v62_v25, 0.0 }
  0x9c   :  { %70 = vadd.xlane.f32.xlu0 %v69_v23  ;;  %67 = vadd.xlane.f32.xlu1 %v66_v26 }
  0xa0   :  { %73 = vadd.xlane.f32.xlu1 %v72_v27 }
 0x125   :  { %v65_v30 = vpop.xlane.xlu0 %64 }
 0x126   :  { %v75_v31 = vmul.f32 0.03125, %v65_v30 }
 0x128   :  { %v79_v32 = vadd.f32 1e-05, %v75_v31 }
 0x129   :  { %v68_v33 = vpop.xlane.xlu1 %67  ;;  %v71_v34 = vpop.xlane.xlu0 %70 }
 0x12a   :  { %468 = vrsqrt.f32 %v79_v32  ;;  %v76_v35 = vmul.f32 0.03125, %v68_v33  ;;  %v77_v36 = vmul.f32 0.03125, %v71_v34 }
 0x12c   :  { %v80_v37 = vadd.f32 1e-05, %v76_v35  ;;  %v81_v38 = vadd.f32 1e-05, %v77_v36 }
 0x12d   :  { %v74_v39 = vpop.xlane.xlu1 %73 }
 0x12e   :  { %470 = vrsqrt.f32 %v80_v37  ;;  %v78_v40 = vmul.f32 0.03125, %v74_v39 }
 0x12f   :  { %472 = vrsqrt.f32 %v81_v38 }
 0x130   :  { %v82_v41 = vadd.f32 1e-05, %v78_v40 }
 0x132   :  { %474 = vrsqrt.f32 %v82_v41 }
 0x134   :  { %v469_v42 = vpop.eup %468 }
 0x135   :  { %v87_v43 = vmul.f32 %v469_v42, %v55_v12 }
 0x137   :  { %v98_v48 = vmul.f32 %v418_v44, %v87_v43 }
 0x138   :  { %v471_v45 = vpop.eup %470 }
 0x139   :  { %v473_v46 = vpop.eup %472  ;;  %v88_v47 = vmul.f32 %v471_v45, %v56_v20  ;;  %v109_v54 = vadd.f32 %v419_v50, %v98_v48 }
 0x13a   :  { %v89_v49 = vmul.f32 %v473_v46, %v57_v13 }
 0x13b   :  { %v99_v51 = vmul.f32 %v418_v44, %v88_v47 }
 0x13c   :  { %v475_v52 = vpop.eup %474  ;;  %v100_v56 = vmul.f32 %v418_v44, %v89_v49 }
 0x13d   :  { %v90_v53 = vmul.f32 %v475_v52, %v58_v21  ;;  %v110_v55 = vadd.f32 %v419_v50, %v99_v51 }
 0x13e   :  { %v111_v59 = vadd.f32 %v419_v50, %v100_v56 }
 0x13f   :  { %v113_v57 = vpack.c.bf16 %v110_v55, %v109_v54  ;;  %v101_v58 = vmul.f32 %v418_v44, %v90_v53 }
 0x141   :  { %446 = vmatprep.mubr.msk.bf16.mxu0 %vm37_vm0, %v113_v57  ;;  %v112_v60 = vadd.f32 %v419_v50, %v101_v58 }
 0x143   :  { %v114_v61 = vpack.c.bf16 %v112_v60, %v111_v59 }
 0x145   :  { %447 = vmatmul.mubr.msk.bf16.vlgmr.msra.gmra.mrb[0].mxu0 %vm37_vm0, %v114_v61 }
 0x218   :  { %v448_v7 = vpop.f32.mrb[0].mxu0 }
 0x219   :  { %v607_v8 = vadd.f32 %v448_v7, %v421_v6  ;;  %v189_v9 = vpop.f32.mrb[1].mxu0 }
 0x21a   :  { %v609_v10 = vadd.f32 %v421_v6, %v189_v9  ;;  %v449_v11 = vpop.f32.mrb[2].mxu0 }
 0x21b   :  { %v612_v12 = vmul.f32 0.70710677, %v607_v8  ;;  %v614_v13 = vadd.f32 %v449_v11, %v421_v6  ;;  %v192_v14 = vpop.f32.mrb[3].mxu0 }
 0x21c   :  { %v617_v15 = vmul.f32 0.70710677, %v609_v10  ;;  %v619_v16 = vadd.f32 %v421_v6, %v192_v14 }
 0x21d   :  { %vm214_vm1 = vcmp.lt.f32.partialorder %v612_v12, 0.0  ;;  %v218_v17 = vsub.f32 0.0, %v612_v12  ;;  %v624_v18 = vmul.f32 0.70710677, %v614_v13 }
 0x21e   :  { %vm212_vm2 = vcmp.lt.f32.partialorder %v617_v15, 0.0  ;;  %v216_v19 = vsub.f32 0.0, %v617_v15  ;;  %v629_v20 = vmul.f32 0.70710677, %v619_v16 }
 0x21f   :  { %v222_v21 = vsel %vm214_vm1, %v218_v17, %v612_v12  ;;  %vm215_vm3 = vcmp.lt.f32.partialorder %v624_v18, 0.0  ;;  %v219_v22 = vsub.f32 0.0, %v624_v18  ;;  %v204_v12 = vmul.f32 0.5, %v609_v10 }
 0x220   :  { %v226_v23 = vmul.f32 0.3275911, %v222_v21  ;;  %v220_v24 = vsel %vm212_vm2, %v216_v19, %v617_v15  ;;  %vm213_vm4 = vcmp.lt.f32.partialorder %v629_v20, 0.0  ;;  %v217_v27 = vsub.f32 0.0, %v629_v20 }
 0x221   :  { %v224_v25 = vmul.f32 0.3275911, %v220_v24  ;;  %v223_v26 = vsel %vm215_vm3, %v219_v22, %v624_v18  ;;  %v278_v35 = vsub.f32 0.0, %v222_v21  ;;  %v276_v36 = vsub.f32 0.0, %v220_v24 }
 0x222   :  { %v230_v28 = vadd.f32 1.0, %v226_v23  ;;  %v227_v29 = vmul.f32 0.3275911, %v223_v26  ;;  %v221_v31 = vsel %vm213_vm4, %v217_v27, %v629_v20  ;;  %v279_v39 = vsub.f32 0.0, %v223_v26 }
 0x223   :  { %v228_v30 = vadd.f32 1.0, %v224_v25  ;;  %v225_v33 = vmul.f32 0.3275911, %v221_v31  ;;  %v282_v38 = vmul.f32 %v278_v35, %v222_v21  ;;  %v280_v42 = vmul.f32 %v276_v36, %v220_v24 }
 0x224   :  { %476 = vrcp.f32 %v230_v28  ;;  %v231_v32 = vadd.f32 1.0, %v227_v29  ;;  %v277_v43 = vsub.f32 0.0, %v221_v31  ;;  %v283_v48 = vmul.f32 %v279_v39, %v223_v26 }
 0x225   :  { %478 = vrcp.f32 %v228_v30  ;;  %v229_v34 = vadd.f32 1.0, %v225_v33  ;;  %v288_v47 = vmul.f32 1.442695, %v282_v38  ;;  %v284_v51 = vmul.f32 1.442695, %v280_v42 }
 0x226   :  { %480 = vrcp.f32 %v231_v32  ;;  %v281_v54 = vmul.f32 %v277_v43, %v221_v31  ;;  %v290_v59 = vmul.f32 1.442695, %v283_v48  ;;  %v205_v15 = vmul.f32 0.5, %v619_v16 }
 0x227   :  { %482 = vrcp.f32 %v229_v34 }
 0x228   :  { %484 = vpow2.f32 %v288_v47  ;;  %v286_v3 = vmul.f32 1.442695, %v281_v54 }
 0x229   :  { %486 = vpow2.f32 %v284_v51 }
 0x22a   :  { %488 = vpow2.f32 %v290_v59 }
 0x22b   :  { %490 = vpow2.f32 %v286_v3 }
 0x22e   :  { %v477_v37 = vpop.eup %476 }
 0x22f   :  { %v479_v40 = vpop.eup %478  ;;  %v242_v41 = vmul.f32 1.0614054, %v477_v37 }
 0x230   :  { %v240_v44 = vmul.f32 1.0614054, %v479_v40  ;;  %v481_v46 = vpop.eup %480 }
 0x231   :  { %v246_v45 = vadd.f32 -1.4531521, %v242_v41  ;;  %v243_v52 = vmul.f32 1.0614054, %v481_v46  ;;  %v483_v53 = vpop.eup %482 }
 0x232   :  { %v244_v49 = vadd.f32 -1.4531521, %v240_v44  ;;  %v241_v58 = vmul.f32 1.0614054, %v483_v53  ;;  %v485_v29 = vpop.eup %484 }
 0x233   :  { %v250_v50 = vmul.f32 %v477_v37, %v246_v45  ;;  %v247_v57 = vadd.f32 -1.4531521, %v243_v52  ;;  %v487_v31 = vpop.eup %486 }
 0x234   :  { %v248_v55 = vmul.f32 %v479_v40, %v244_v49  ;;  %v245_v63 = vadd.f32 -1.4531521, %v241_v58  ;;  %v489_v41 = vpop.eup %488 }
 0x235   :  { %v254_v56 = vadd.f32 1.4214138, %v250_v50  ;;  %v251_v62 = vmul.f32 %v481_v46, %v247_v57  ;;  %v491_v47 = vpop.eup %490 }
 0x236   :  { %v252_v60 = vadd.f32 1.4214138, %v248_v55  ;;  %v249_v9 = vmul.f32 %v483_v53, %v245_v63 }
 0x237   :  { %v258_v61 = vmul.f32 %v477_v37, %v254_v56  ;;  %v255_v7 = vadd.f32 1.4214138, %v251_v62  ;;  %v206_v56 = vmul.f32 0.5, %v607_v8  ;;  %v420_v8 = vld [vmem:[%s690_s6] ss:$0 sm:$0xff] }
 0x238   :  { %v256_v4 = vmul.f32 %v479_v40, %v252_v60  ;;  %v253_v19 = vadd.f32 1.4214138, %v249_v9  ;;  %v124_v10 = vadd.f32 %v420_v8, %v550_v1  ;;  %v125_v20 = vadd.f32 %v420_v8, %v564_v5 }
 0x239   :  { %v262_v6 = vadd.f32 -0.28449672, %v258_v61  ;;  %v259_v17 = vmul.f32 %v481_v46, %v255_v7  ;;  %v123_v16 = vadd.f32 %v420_v8, %v555_v2 }
 0x23a   :  { %v260_v11 = vadd.f32 -0.28449672, %v256_v4  ;;  %v257_v24 = vmul.f32 %v483_v53, %v253_v19 }
 0x23b   :  { %v266_v14 = vmul.f32 %v477_v37, %v262_v6  ;;  %v263_v23 = vadd.f32 -0.28449672, %v259_v17 }
 0x23c   :  { %v264_v21 = vmul.f32 %v479_v40, %v260_v11  ;;  %v261_v28 = vadd.f32 -0.28449672, %v257_v24 }
 0x23d   :  { %v270_v22 = vadd.f32 0.2548296, %v266_v14  ;;  %v267_v27 = vmul.f32 %v481_v46, %v263_v23 }
 0x23e   :  { %v268_v25 = vadd.f32 0.2548296, %v264_v21  ;;  %v265_v34 = vmul.f32 %v483_v53, %v261_v28 }
 0x23f   :  { %v274_v26 = vmul.f32 %v477_v37, %v270_v22  ;;  %v271_v33 = vadd.f32 0.2548296, %v267_v27 }
 0x240   :  { %v272_v30 = vmul.f32 %v479_v40, %v268_v25  ;;  %v269_v39 = vadd.f32 0.2548296, %v265_v34 }
 0x241   :  { %v294_v32 = vmul.f32 %v485_v29, %v274_v26  ;;  %v275_v38 = vmul.f32 %v481_v46, %v271_v33 }
 0x242   :  { %v292_v35 = vmul.f32 %v487_v31, %v272_v30  ;;  %v273_v45 = vmul.f32 %v483_v53, %v269_v39  ;;  %v207_v53 = vmul.f32 0.5, %v614_v13  ;;  %v122_v13 = vadd.f32 %v420_v8, %v545_v0 }
 0x243   :  { %v298_v36 = vsub.f32 1.0, %v294_v32  ;;  %v295_v44 = vmul.f32 %v489_v41, %v275_v38 }
 0x244   :  { %v296_v42 = vsub.f32 1.0, %v292_v35  ;;  %v293_v40 = vmul.f32 %v491_v47, %v273_v45 }
 0x245   :  { %v302_v43 = vsub.f32 0.0, %v298_v36  ;;  %v299_v49 = vsub.f32 1.0, %v295_v44 }
 0x246   :  { %v300_v48 = vsub.f32 0.0, %v296_v42  ;;  %v297_v51 = vsub.f32 1.0, %v293_v40 }
 0x247   :  { %v306_v37 = vsel %vm214_vm1, %v302_v43, %v298_v36  ;;  %v303_v50 = vsub.f32 0.0, %v299_v49 }
 0x248   :  { %v304_v52 = vsel %vm212_vm2, %v300_v48, %v296_v42  ;;  %v310_v54 = vadd.f32 1.0, %v306_v37  ;;  %v301_v55 = vsub.f32 0.0, %v297_v51 }
 0x249   :  { %v307_v46 = vsel %vm215_vm3, %v303_v50, %v299_v49  ;;  %v308_v58 = vadd.f32 1.0, %v304_v52 }
 0x24a   :  { %v311_v57 = vadd.f32 1.0, %v307_v46  ;;  %v305_v59 = vsel %vm213_vm4, %v301_v55, %v297_v51  ;;  %v314_v60 = vmul.f32 %v310_v54, %v206_v56 }
 0x24b   :  { %v309_v62 = vadd.f32 1.0, %v305_v59  ;;  %v312_v18 = vmul.f32 %v308_v58, %v204_v12 }
 0x24c   :  { %v315_v61 = vmul.f32 %v311_v57, %v207_v53 }
 0x24d   :  { %v313_v3 = vmul.f32 %v309_v62, %v205_v15 }
 0x24e   :  { %v317_v63 = vpack.c.bf16 %v315_v61, %v314_v60 }
 0x24f   :  { %v316_v4 = vpack.c.bf16 %v313_v3, %v312_v18 }
 0x251   :  { %458 = vmatprep.mubr.msk.bf16.mxu1 %vm350_vm5, %v316_v4 }
 0x252   :  { %459 = vmatmul.mubr.msk.bf16.vlgmr.msra.gmra.mrb[0].mxu1 %vm350_vm5, %v317_v63 }
 0x325   :  { %v460_v6 = vpop.f32.mrb[0].mxu1 }
 0x326   :  { %v408_v7 = vadd.f32 %v460_v6, %v124_v10  ;;  %v391_v9 = vpop.f32.mrb[1].mxu1 }
 0x327   :  { %v406_v11 = vadd.f32 %v391_v9, %v122_v13  ;;  %v461_v14 = vpop.f32.mrb[2].mxu1 }
 0x328   :  { %412 = vst.msk [vmem:[%s691_s9 + $0x10] sm:$0xff] %vm37_vm0, %v408_v7  ;;  %v409_v17 = vadd.f32 %v461_v14, %v125_v20  ;;  %v394_v19 = vpop.f32.mrb[3].mxu1 }
 0x329   :  { %410 = vst.msk [vmem:[%s691_s9] sm:$0xff] %vm37_vm0, %v406_v11  ;;  %v407_v0 = vadd.f32 %v394_v19, %v123_v16 }
 0x32a   :  { %413 = vst.msk [vmem:[%s691_s9 + $0x18] sm:$0xff] %vm37_vm0, %v409_v17 }
 0x32b   :  { %411 = vst.msk [vmem:[%s691_s9 + $0x8] sm:$0xff] %vm37_vm0, %v407_v0 }

// kernel: roformer_forward.11
= control target key start
LH: loop header
LB: loop body
LE: loop exit
PB: predicated region body
PF: predicated region fallthrough
CT: control target
= control target key end

     0   :  { %vm38_vm0 = vcmask 261120   ;;  %s823_s0 = inlined_call_operand.vmem [shape: f32[32,32], index: 0, kind: input, shape index: {}]   ;;  %s824_s1 = inlined_call_operand.vmem [shape: f32[1,32], index: 1, kind: input, shape index: {}]   ;;  %s825_s2 = inlined_call_operand.vmem [shape: f32[1,32], index: 2, kind: input, shape index: {}]   ;;  %s826_s3 = inlined_call_operand.vmem [shape: bf16[32,64], index: 3, kind: input, shape index: {}]   ;;  %s827_s4 = inlined_call_operand.vmem [shape: f32[1,64], index: 4, kind: input, shape index: {}]   ;;  %s828_s5 = inlined_call_operand.vmem [shape: bf16[64,32], index: 5, kind: input, shape index: {}]   ;;  %s829_s6 = inlined_call_operand.vmem [shape: f32[1,32], index: 6, kind: input, shape index: {}]   ;;  %s830_s7 = inlined_call_operand.vmem [shape: f32[1,32], index: 7, kind: input, shape index: {}]   ;;  %s831_s8 = inlined_call_operand.vmem [shape: f32[1,32], index: 8, kind: input, shape index: {}]   ;;  %s832_s9 = inlined_call_operand.hbm [shape: f32[32,32], index: 9, kind: output, shape index: {}]  }
   0x1   :  { %v672_v0 = vld [vmem:[%s823_s0] sm:$0xff]  ;;  %v677_v1 = vld [vmem:[%s823_s0 + $0x10] sm:$0xff]  ;;  %v682_v2 = vld [vmem:[%s823_s0 + $0x8] sm:$0xff] }
   0x2   :  { %v39_v3 = vsel %vm38_vm0, %v672_v0, 0.0  ;;  %v45_v4 = vsel %vm38_vm0, %v677_v1, 0.0  ;;  %v691_v5 = vld [vmem:[%s823_s0 + $0x18] sm:$0xff]  ;;  %v42_v6 = vsel %vm38_vm0, %v682_v2, 0.0 }
   0x3   :  { %40 = vadd.xlane.f32.xlu0 %v39_v3  ;;  %46 = vadd.xlane.f32.xlu1 %v45_v4  ;;  %v48_v7 = vsel %vm38_vm0, %v691_v5, 0.0 }
   0x7   :  { %43 = vadd.xlane.f32.xlu0 %v42_v6  ;;  %49 = vadd.xlane.f32.xlu1 %v48_v7 }
   0x8   :  { %14 = vsyncpa [#allocation3], 0  ;;  %v554_v28 = vld [vmem:[%s826_s3] sm:$0xff]   ;;  %v555_v29 = vld [vmem:[%s826_s3 + $0x8] sm:$0xff]   ;;  %vm351_vm5 = vcmask 523264   ;;  %s616_s13 = smov [#allocation2]  }
   0x9   :  { %531 = vmatprep.subr.bf16.mxu0 %v554_v28  ;;  %v505_v44 = vld [vmem:[%s824_s1] ss:$0 sm:$0xff]  ;;  %v557_v63 = vld [vmem:[%s828_s5 + $0x8] sm:$0xff]   ;;  %v558_v3 = vld [vmem:[%s828_s5 + $0x10] sm:$0xff]  }
   0xa   :  { %532 = vmatpush3.bf16.msra.mxu0 %v554_v28  ;;  %v506_v50 = vld [vmem:[%s825_s2] ss:$0 sm:$0xff]  ;;  %v559_v4 = vld [vmem:[%s828_s5 + $0x18] sm:$0xff]  }
   0xb   :  { %533 = vmatprep.subr.bf16.mxu0 %v555_v29  ;;  %v556_v62 = vld [vmem:[%s828_s5] sm:$0xff]  }
   0xc   :  { %539 = vmatprep.subr.bf16.mxu1 %v556_v62  ;;  %v508_v6 = vld [vmem:[%s827_s4] ss:$0 sm:$0xff] }
   0xd   :  { %540 = vmatpush3.bf16.msra.mxu1 %v556_v62 }
   0xe   :  { %534 = vmatpush3.bf16.msra.mxu0 %v555_v29  ;;  %541 = vmatprep.subr.bf16.mxu1 %v557_v63 }
  0x11   :  { %542 = vmatpush3.bf16.msra.mxu1 %v557_v63 }
  0x12   :  { %543 = vmatprep.subr.bf16.mxu1 %v558_v3 }
  0x15   :  { %544 = vmatpush3.bf16.msra.mxu1 %v558_v3 }
  0x16   :  { %545 = vmatprep.subr.bf16.mxu1 %v559_v4 }
  0x19   :  { %546 = vmatpush3.bf16.msra.mxu1 %v559_v4 }
  0x90   :  { %v41_v8 = vpop.xlane.xlu0 %40  ;;  %v47_v9 = vpop.xlane.xlu1 %46 }
  0x91   :  { %v52_v10 = vmul.f32 0.03125, %v41_v8  ;;  %v54_v11 = vmul.f32 0.03125, %v47_v9 }
  0x93   :  { %v56_v12 = vsub.f32 %v672_v0, %v52_v10  ;;  %v58_v13 = vsub.f32 %v677_v1, %v54_v11 }
  0x94   :  { %v44_v14 = vpop.xlane.xlu0 %43  ;;  %v50_v15 = vpop.xlane.xlu1 %49 }
  0x95   :  { %v53_v16 = vmul.f32 0.03125, %v44_v14  ;;  %v55_v17 = vmul.f32 0.03125, %v50_v15  ;;  %v60_v18 = vmul.f32 %v56_v12, %v56_v12  ;;  %v62_v19 = vmul.f32 %v58_v13, %v58_v13 }
  0x97   :  { %v57_v20 = vsub.f32 %v682_v2, %v53_v16  ;;  %v59_v21 = vsub.f32 %v691_v5, %v55_v17  ;;  %v64_v22 = vsel %vm38_vm0, %v60_v18, 0.0  ;;  %v70_v23 = vsel %vm38_vm0, %v62_v19, 0.0 }
  0x98   :  { %65 = vadd.xlane.f32.xlu0 %v64_v22 }
  0x99   :  { %v61_v24 = vmul.f32 %v57_v20, %v57_v20  ;;  %v63_v25 = vmul.f32 %v59_v21, %v59_v21 }
  0x9b   :  { %v67_v26 = vsel %vm38_vm0, %v61_v24, 0.0  ;;  %v73_v27 = vsel %vm38_vm0, %v63_v25, 0.0 }
  0x9c   :  { %71 = vadd.xlane.f32.xlu0 %v70_v23  ;;  %68 = vadd.xlane.f32.xlu1 %v67_v26 }
  0xa0   :  { %74 = vadd.xlane.f32.xlu1 %v73_v27 }
 0x125   :  { %v66_v30 = vpop.xlane.xlu0 %65 }
 0x126   :  { %v76_v31 = vmul.f32 0.03125, %v66_v30 }
 0x128   :  { %v80_v32 = vadd.f32 1e-05, %v76_v31 }
 0x129   :  { %v69_v33 = vpop.xlane.xlu1 %68  ;;  %v72_v34 = vpop.xlane.xlu0 %71 }
 0x12a   :  { %560 = vrsqrt.f32 %v80_v32  ;;  %v77_v35 = vmul.f32 0.03125, %v69_v33  ;;  %v78_v36 = vmul.f32 0.03125, %v72_v34 }
 0x12c   :  { %v81_v37 = vadd.f32 1e-05, %v77_v35  ;;  %v82_v38 = vadd.f32 1e-05, %v78_v36 }
 0x12d   :  { %v75_v39 = vpop.xlane.xlu1 %74 }
 0x12e   :  { %562 = vrsqrt.f32 %v81_v37  ;;  %v79_v40 = vmul.f32 0.03125, %v75_v39 }
 0x12f   :  { %564 = vrsqrt.f32 %v82_v38 }
 0x130   :  { %v83_v41 = vadd.f32 1e-05, %v79_v40 }
 0x132   :  { %566 = vrsqrt.f32 %v83_v41 }
 0x134   :  { %v561_v42 = vpop.eup %560 }
 0x135   :  { %v88_v43 = vmul.f32 %v561_v42, %v56_v12 }
 0x137   :  { %v99_v48 = vmul.f32 %v505_v44, %v88_v43 }
 0x138   :  { %v563_v45 = vpop.eup %562 }
 0x139   :  { %v565_v46 = vpop.eup %564  ;;  %v89_v47 = vmul.f32 %v563_v45, %v57_v20  ;;  %v110_v54 = vadd.f32 %v506_v50, %v99_v48 }
 0x13a   :  { %v90_v49 = vmul.f32 %v565_v46, %v58_v13 }
 0x13b   :  { %v100_v51 = vmul.f32 %v505_v44, %v89_v47 }
 0x13c   :  { %v567_v52 = vpop.eup %566  ;;  %v101_v56 = vmul.f32 %v505_v44, %v90_v49 }
 0x13d   :  { %v91_v53 = vmul.f32 %v567_v52, %v59_v21  ;;  %v111_v55 = vadd.f32 %v506_v50, %v100_v51 }
 0x13e   :  { %v112_v59 = vadd.f32 %v506_v50, %v101_v56 }
 0x13f   :  { %v114_v57 = vpack.c.bf16 %v111_v55, %v110_v54  ;;  %v102_v58 = vmul.f32 %v505_v44, %v91_v53 }
 0x141   :  { %535 = vmatprep.mubr.msk.bf16.mxu0 %vm38_vm0, %v114_v57  ;;  %v113_v60 = vadd.f32 %v506_v50, %v102_v58 }
 0x143   :  { %v115_v61 = vpack.c.bf16 %v113_v60, %v112_v59 }
 0x145   :  { %536 = vmatmul.mubr.msk.bf16.vlgmr.msra.gmra.mrb[0].mxu0 %vm38_vm0, %v115_v61 }
 0x218   :  { %v537_v7 = vpop.f32.mrb[0].mxu0 }
 0x219   :  { %v734_v8 = vadd.f32 %v537_v7, %v508_v6  ;;  %v190_v9 = vpop.f32.mrb[1].mxu0 }
 0x21a   :  { %v736_v10 = vadd.f32 %v508_v6, %v190_v9  ;;  %v538_v11 = vpop.f32.mrb[2].mxu0 }
 0x21b   :  { %v739_v12 = vmul.f32 0.70710677, %v734_v8  ;;  %v741_v13 = vadd.f32 %v538_v11, %v508_v6  ;;  %v193_v14 = vpop.f32.mrb[3].mxu0 }
 0x21c   :  { %v744_v15 = vmul.f32 0.70710677, %v736_v10  ;;  %v746_v16 = vadd.f32 %v508_v6, %v193_v14 }
 0x21d   :  { %vm215_vm1 = vcmp.lt.f32.partialorder %v739_v12, 0.0  ;;  %v219_v17 = vsub.f32 0.0, %v739_v12  ;;  %v751_v18 = vmul.f32 0.70710677, %v741_v13 }
 0x21e   :  { %vm213_vm2 = vcmp.lt.f32.partialorder %v744_v15, 0.0  ;;  %v217_v19 = vsub.f32 0.0, %v744_v15  ;;  %v756_v20 = vmul.f32 0.70710677, %v746_v16 }
 0x21f   :  { %v223_v21 = vsel %vm215_vm1, %v219_v17, %v739_v12  ;;  %vm216_vm3 = vcmp.lt.f32.partialorder %v751_v18, 0.0  ;;  %v220_v22 = vsub.f32 0.0, %v751_v18  ;;  %v205_v12 = vmul.f32 0.5, %v736_v10 }
 0x220   :  { %v227_v23 = vmul.f32 0.3275911, %v223_v21  ;;  %v221_v24 = vsel %vm213_vm2, %v217_v19, %v744_v15  ;;  %vm214_vm4 = vcmp.lt.f32.partialorder %v756_v20, 0.0  ;;  %v218_v27 = vsub.f32 0.0, %v756_v20 }
 0x221   :  { %v225_v25 = vmul.f32 0.3275911, %v221_v24  ;;  %v224_v26 = vsel %vm216_vm3, %v220_v22, %v751_v18  ;;  %v279_v35 = vsub.f32 0.0, %v223_v21  ;;  %v277_v36 = vsub.f32 0.0, %v221_v24 }
 0x222   :  { %v231_v28 = vadd.f32 1.0, %v227_v23  ;;  %v228_v29 = vmul.f32 0.3275911, %v224_v26  ;;  %v222_v31 = vsel %vm214_vm4, %v218_v27, %v756_v20  ;;  %v280_v39 = vsub.f32 0.0, %v224_v26 }
 0x223   :  { %v229_v30 = vadd.f32 1.0, %v225_v25  ;;  %v226_v33 = vmul.f32 0.3275911, %v222_v31  ;;  %v283_v38 = vmul.f32 %v279_v35, %v223_v21  ;;  %v281_v42 = vmul.f32 %v277_v36, %v221_v24 }
 0x224   :  { %568 = vrcp.f32 %v231_v28  ;;  %v232_v32 = vadd.f32 1.0, %v228_v29  ;;  %v278_v43 = vsub.f32 0.0, %v222_v31  ;;  %v284_v48 = vmul.f32 %v280_v39, %v224_v26 }
 0x225   :  { %570 = vrcp.f32 %v229_v30  ;;  %v230_v34 = vadd.f32 1.0, %v226_v33  ;;  %v289_v47 = vmul.f32 1.442695, %v283_v38  ;;  %v285_v51 = vmul.f32 1.442695, %v281_v42 }
 0x226   :  { %572 = vrcp.f32 %v232_v32  ;;  %v282_v54 = vmul.f32 %v278_v43, %v222_v31  ;;  %v291_v59 = vmul.f32 1.442695, %v284_v48  ;;  %v206_v15 = vmul.f32 0.5, %v746_v16 }
 0x227   :  { %574 = vrcp.f32 %v230_v34 }
 0x228   :  { %576 = vpow2.f32 %v289_v47  ;;  %v287_v3 = vmul.f32 1.442695, %v282_v54 }
 0x229   :  { %578 = vpow2.f32 %v285_v51 }
 0x22a   :  { %580 = vpow2.f32 %v291_v59 }
 0x22b   :  { %582 = vpow2.f32 %v287_v3 }
 0x22e   :  { %v569_v37 = vpop.eup %568 }
 0x22f   :  { %v571_v40 = vpop.eup %570  ;;  %v243_v41 = vmul.f32 1.0614054, %v569_v37 }
 0x230   :  { %v241_v44 = vmul.f32 1.0614054, %v571_v40  ;;  %v573_v46 = vpop.eup %572 }
 0x231   :  { %v247_v45 = vadd.f32 -1.4531521, %v243_v41  ;;  %v244_v52 = vmul.f32 1.0614054, %v573_v46  ;;  %v575_v53 = vpop.eup %574 }
 0x232   :  { %v245_v49 = vadd.f32 -1.4531521, %v241_v44  ;;  %v242_v58 = vmul.f32 1.0614054, %v575_v53  ;;  %v577_v29 = vpop.eup %576 }
 0x233   :  { %v251_v50 = vmul.f32 %v569_v37, %v247_v45  ;;  %v248_v57 = vadd.f32 -1.4531521, %v244_v52  ;;  %v579_v31 = vpop.eup %578 }
 0x234   :  { %v249_v55 = vmul.f32 %v571_v40, %v245_v49  ;;  %v246_v63 = vadd.f32 -1.4531521, %v242_v58  ;;  %v581_v41 = vpop.eup %580 }
 0x235   :  { %v255_v56 = vadd.f32 1.4214138, %v251_v50  ;;  %v252_v62 = vmul.f32 %v573_v46, %v248_v57  ;;  %v583_v47 = vpop.eup %582 }
 0x236   :  { %v253_v60 = vadd.f32 1.4214138, %v249_v55  ;;  %v250_v9 = vmul.f32 %v575_v53, %v246_v63 }
 0x237   :  { %v259_v61 = vmul.f32 %v569_v37, %v255_v56  ;;  %v256_v7 = vadd.f32 1.4214138, %v252_v62  ;;  %v207_v56 = vmul.f32 0.5, %v734_v8  ;;  %v507_v8 = vld [vmem:[%s829_s6] ss:$0 sm:$0xff] }
 0x238   :  { %v257_v4 = vmul.f32 %v571_v40, %v253_v60  ;;  %v254_v19 = vadd.f32 1.4214138, %v250_v9  ;;  %v123_v10 = vadd.f32 %v507_v8, %v672_v0  ;;  %v126_v9 = vadd.f32 %v507_v8, %v691_v5 }
 0x239   :  { %v263_v6 = vadd.f32 -0.28449672, %v259_v61  ;;  %v260_v17 = vmul.f32 %v573_v46, %v256_v7 }
 0x23a   :  { %v261_v11 = vadd.f32 -0.28449672, %v257_v4  ;;  %v258_v24 = vmul.f32 %v575_v53, %v254_v19 }
 0x23b   :  { %v267_v14 = vmul.f32 %v569_v37, %v263_v6  ;;  %v264_v23 = vadd.f32 -0.28449672, %v260_v17  ;;  %v124_v6 = vadd.f32 %v507_v8, %v682_v2 }
 0x23c   :  { %v265_v21 = vmul.f32 %v571_v40, %v261_v11  ;;  %v262_v28 = vadd.f32 -0.28449672, %v258_v24 }
 0x23d   :  { %v271_v22 = vadd.f32 0.2548296, %v267_v14  ;;  %v268_v27 = vmul.f32 %v573_v46, %v264_v23 }
 0x23e   :  { %v269_v25 = vadd.f32 0.2548296, %v265_v21  ;;  %v266_v34 = vmul.f32 %v575_v53, %v262_v28 }
 0x23f   :  { %v275_v26 = vmul.f32 %v569_v37, %v271_v22  ;;  %v272_v33 = vadd.f32 0.2548296, %v268_v27 }
 0x240   :  { %v273_v30 = vmul.f32 %v571_v40, %v269_v25  ;;  %v270_v39 = vadd.f32 0.2548296, %v266_v34 }
 0x241   :  { %v295_v32 = vmul.f32 %v577_v29, %v275_v26  ;;  %v276_v38 = vmul.f32 %v573_v46, %v272_v33 }
 0x242   :  { %v293_v35 = vmul.f32 %v579_v31, %v273_v30  ;;  %v274_v45 = vmul.f32 %v575_v53, %v270_v39  ;;  %v208_v53 = vmul.f32 0.5, %v741_v13  ;;  %v125_v13 = vadd.f32 %v507_v8, %v677_v1 }
 0x243   :  { %v299_v36 = vsub.f32 1.0, %v295_v32  ;;  %v296_v44 = vmul.f32 %v581_v41, %v276_v38 }
 0x244   :  { %v297_v42 = vsub.f32 1.0, %v293_v35  ;;  %v294_v40 = vmul.f32 %v583_v47, %v274_v45 }
 0x245   :  { %v303_v43 = vsub.f32 0.0, %v299_v36  ;;  %v300_v49 = vsub.f32 1.0, %v296_v44 }
 0x246   :  { %v301_v48 = vsub.f32 0.0, %v297_v42  ;;  %v298_v51 = vsub.f32 1.0, %v294_v40 }
 0x247   :  { %v307_v37 = vsel %vm215_vm1, %v303_v43, %v299_v36  ;;  %v304_v50 = vsub.f32 0.0, %v300_v49 }
 0x248   :  { %v305_v52 = vsel %vm213_vm2, %v301_v48, %v297_v42  ;;  %v311_v54 = vadd.f32 1.0, %v307_v37  ;;  %v302_v55 = vsub.f32 0.0, %v298_v51 }
 0x249   :  { %v308_v46 = vsel %vm216_vm3, %v304_v50, %v300_v49  ;;  %v309_v58 = vadd.f32 1.0, %v305_v52 }
 0x24a   :  { %v312_v57 = vadd.f32 1.0, %v308_v46  ;;  %v306_v59 = vsel %vm214_vm4, %v302_v55, %v298_v51  ;;  %v315_v60 = vmul.f32 %v311_v54, %v207_v56  ;;  %v519_v56 = vld [vmem:[%s830_s7] ss:$0 sm:$0xff]  ;;  %s494_s7 = sshll.u32 %s616_s13, 4  ;;  %s495_s7 = int_to_ptr.vmem [resolvable:$true] %s494_s7 }
 0x24b   :  { %v310_v62 = vadd.f32 1.0, %v306_v59  ;;  %v313_v18 = vmul.f32 %v309_v58, %v205_v12  ;;  %v520_v58 = vld [vmem:[%s831_s8] ss:$0 sm:$0xff]  ;;  %s592_s8 = scalar_lea.vmem %s495_s7, 512  ;;  %p597_p1 = scmp.lt.s32.totalorder %s495_s7, %s495_s7 }
 0x24c   :  { %v316_v61 = vmul.f32 %v312_v57, %v208_v53  ;;  %p593_p0 = scmp.ne.s32.totalorder %s495_s7, %s592_s8  ;;  %p598_p2 = scmp.lt.s32.totalorder %s592_s8, %s592_s8 }
 0x24d   :  { %v314_v3 = vmul.f32 %v310_v62, %v206_v15 }
 0x24e   :  { %v318_v63 = vpack.c.bf16 %v316_v61, %v315_v60  ;;  %p599_p3 = por %p598_p2, %p597_p1 }
 0x24f   :  { %v317_v4 = vpack.c.bf16 %v314_v3, %v313_v18 }
 0x250   :  { %p600_p4 = pnand %p599_p3, %p593_p0 }
 0x251   :  { %547 = vmatprep.mubr.msk.bf16.mxu1 %vm351_vm5, %v317_v4 }
 0x252   :  { %548 = vmatmul.mubr.msk.bf16.vlgmr.msra.gmra.mrb[0].mxu1 %vm351_vm5, %v318_v63 }
 0x325   :  { %v549_v20 = vpop.f32.mrb[0].mxu1 }
 0x326   :  { %v392_v16 = vpop.f32.mrb[1].mxu1  ;;  %v409_v17 = vadd.f32 %v549_v20, %v125_v13 }
 0x327   :  { %v407_v7 = vadd.f32 %v392_v16, %v123_v10  ;;  %v550_v11 = vpop.f32.mrb[2].mxu1 }
 0x328   :  { %v395_v14 = vpop.f32.mrb[3].mxu1  ;;  %v410_v22 = vadd.f32 %v550_v11, %v126_v9  ;;  %v417_v0 = vsel %vm38_vm0, %v409_v17, 0.0 }
 0x329   :  { %v408_v19 = vadd.f32 %v395_v14, %v124_v6  ;;  %v411_v21 = vsel %vm38_vm0, %v407_v7, 0.0 }
 0x32a   :  { %412 = vadd.xlane.f32.xlu0 %v411_v21  ;;  %v420_v1 = vsel %vm38_vm0, %v410_v22, 0.0 }
 0x32b   :  { %v414_v23 = vsel %vm38_vm0, %v408_v19, 0.0 }
 0x32c   :  { %415 = vadd.xlane.f32.xlu1 %v414_v23 }
 0x32e   :  { %418 = vadd.xlane.f32.xlu0 %v417_v0 }
 0x330   :  { %421 = vadd.xlane.f32.xlu1 %v420_v1 }
 0x3b7   :  { %v413_v2 = vpop.xlane.xlu0 %412 }
 0x3b8   :  { %v423_v24 = vmul.f32 0.03125, %v413_v2 }
 0x3b9   :  { %v416_v5 = vpop.xlane.xlu1 %415 }
 0x3ba   :  { %v427_v25 = vsub.f32 %v407_v7, %v423_v24  ;;  %v424_v26 = vmul.f32 0.03125, %v416_v5 }
 0x3bb   :  { %v419_v27 = vpop.xlane.xlu0 %418 }
 0x3bc   :  { %v428_v28 = vsub.f32 %v408_v19, %v424_v26  ;;  %v425_v29 = vmul.f32 0.03125, %v419_v27  ;;  %v431_v30 = vmul.f32 %v427_v25, %v427_v25 }
 0x3bd   :  { %v422_v31 = vpop.xlane.xlu1 %421 }
 0x3be   :  { %v429_v32 = vsub.f32 %v409_v17, %v425_v29  ;;  %v426_v33 = vmul.f32 0.03125, %v422_v31  ;;  %v435_v34 = vsel %vm38_vm0, %v431_v30, 0.0  ;;  %v432_v35 = vmul.f32 %v428_v28, %v428_v28 }
 0x3bf   :  { %436 = vadd.xlane.f32.xlu0 %v435_v34 }
 0x3c0   :  { %v430_v36 = vsub.f32 %v410_v22, %v426_v33  ;;  %v438_v38 = vsel %vm38_vm0, %v432_v35, 0.0  ;;  %v433_v39 = vmul.f32 %v429_v32, %v429_v32 }
 0x3c1   :  { %439 = vadd.xlane.f32.xlu1 %v438_v38 }
 0x3c2   :  { %v441_v41 = vsel %vm38_vm0, %v433_v39, 0.0  ;;  %v434_v42 = vmul.f32 %v430_v36, %v430_v36 }
 0x3c3   :  { %442 = vadd.xlane.f32.xlu0 %v441_v41 }
 0x3c4   :  { %v444_v43 = vsel %vm38_vm0, %v434_v42, 0.0 }
 0x3c5   :  { %445 = vadd.xlane.f32.xlu1 %v444_v43 }
 0x44c   :  { %v437_v44 = vpop.xlane.xlu0 %436 }
 0x44d   :  { %v447_v45 = vmul.f32 0.03125, %v437_v44 }
 0x44e   :  { %v440_v47 = vpop.xlane.xlu1 %439 }
 0x44f   :  { %v451_v48 = vadd.f32 1e-05, %v447_v45  ;;  %v448_v37 = vmul.f32 0.03125, %v440_v47 }
 0x450   :  { %v443_v49 = vpop.xlane.xlu0 %442 }
 0x451   :  { %584 = vrsqrt.f32 %v451_v48  ;;  %v452_v40 = vadd.f32 1e-05, %v448_v37  ;;  %v449_v50 = vmul.f32 0.03125, %v443_v49 }
 0x452   :  { %v446_v51 = vpop.xlane.xlu1 %445 }
 0x453   :  { %586 = vrsqrt.f32 %v452_v40  ;;  %v453_v52 = vadd.f32 1e-05, %v449_v50  ;;  %v450_v54 = vmul.f32 0.03125, %v446_v51 }
 0x455   :  { %588 = vrsqrt.f32 %v453_v52  ;;  %v454_v46 = vadd.f32 1e-05, %v450_v54 }
 0x457   :  { %590 = vrsqrt.f32 %v454_v46 }
 0x45b   :  { %v585_v55 = vpop.eup %584 }
 0x45c   :  { %v459_v53 = vmul.f32 %v585_v55, %v427_v25 }
 0x45d   :  { %v587_v57 = vpop.eup %586 }
 0x45e   :  { %v470_v12 = vmul.f32 %v519_v56, %v459_v53  ;;  %v460_v59 = vmul.f32 %v587_v57, %v428_v28 }
 0x45f   :  { %v589_v60 = vpop.eup %588 }
 0x460   :  { %v481_v61 = vadd.f32 %v520_v58, %v470_v12  ;;  %v471_v15 = vmul.f32 %v519_v56, %v460_v59  ;;  %v461_v62 = vmul.f32 %v589_v60, %v429_v32 }
 0x461   :  { %v591_v63 = vpop.eup %590 }
 0x462   :  { %485 = vst.msk [vmem:[#allocation2] sm:$0xff] %vm38_vm0, %v481_v61  ;;  %v482_v18 = vadd.f32 %v520_v58, %v471_v15  ;;  %v472_v3 = vmul.f32 %v519_v56, %v461_v62  ;;  %v462_v4 = vmul.f32 %v591_v63, %v430_v36 }
 0x464   :  { %486 = vst.msk [vmem:[#allocation2 + $0x8] sm:$0xff] %vm38_vm0, %v482_v18  ;;  %v483_v8 = vadd.f32 %v520_v58, %v472_v3  ;;  %v473_v10 = vmul.f32 %v519_v56, %v462_v4 }
 0x466   :  { %487 = vst.msk [vmem:[#allocation2 + $0x10] sm:$0xff] %vm38_vm0, %v483_v8  ;;  %v484_v13 = vadd.f32 %v520_v58, %v473_v10 }
 0x468   :  { %488 = vst.msk [vmem:[#allocation2 + $0x18] sm:$0xff] %vm38_vm0, %v484_v13 }
 0x469   :  { %603 = shalt.err (!%p600_p4)
}
 0x46a   :  { %s604_s16 = scalar_lea.hbm %s832_s9, 512 }
 0x46b   :  { %p605_p5 = scmp.ne.s32.totalorder %s832_s9, %s604_s16  ;;  %p608_p6 = scmp.lt.u32.totalorder %s604_s16, %s832_s9 }
 0x46d   :  { %p610_p7 = pnand %p608_p6, %p605_p5 }
 0x46f   :  { %613 = shalt.err (!%p610_p7)
}
 0x470   :  { %s617_s3 = smov 128   ;;  %s618_s20 = smov 8  }
 0x471   :  { %500 = dma.vmem_to_hbm [thread:$0]  %s495_s7, 512, %s832_s9, [#allocation3], %s617_s3, %s617_s3, %s618_s20  }
 0x472   :  { %614 = dma.done.wait [#allocation3], 512  }
 0x473   :  { %615 = vsyncadd [#allocation3], 4294966784 }
 0x474   :  { %504 = vsyncpa [#allocation3], 1 }

</bundles_post_ra>
